<compile_context>
chip_gen: v5e
topology: v5e:2x2
jax: 0.10.0
libtpu: 0.0.40
codegen_flags: <defaults>
</compile_context>

<pallas_src>
import functools

import numpy as np

import jax
import jax.numpy as jnp
from jax import lax
from jax.experimental import pallas as pl
from jax.experimental.pallas import tpu as pltpu

# Deterministic stand-ins for hyp.* constants of the original repo.
FEAT3D_DIM = 4
C_IN = FEAT3D_DIM * 2          # Conv3d in_channels = hyp.feat3D_dim * 2
HID = 64                       # self.hidden_dim
SUB_SMOOTH_COEFF = 0.1         # hyp.sub_smooth_coeff
LEAKY_SLOPE = 0.01             # nn.LeakyReLU default negative_slope
K_TAPS = 27                    # 3*3*3
K_IM2COL = K_TAPS * C_IN       # 216


def _round_up(x, m):
    return ((x + m - 1) // m) * m


def _subnet_kernel(x_ref, w1_ref, b1_ref, w2_ref, b2_ref, m_ref,
                   out_ref, patch_ref, carry_ref, *,
                   Hp, Wp, R_out, R_out_pad):
    """One (batch, depth-slab) tile per grid step.

    x_ref     : (1, 1, C_IN, N_flat)  bf16  zero-padded slab, flat spatial on lanes
    w1_ref    : (HID, 27*C_IN)        bf16  fused 3x3x3 weights (tap-major, channel-minor)
    b1_ref    : (HID, 1)              f32
    w2_ref    : (HID, 1)              f32   1x1x1 conv weights
    b2_ref    : (1, 1)                f32
    m_ref     : (4, R_out_pad)        f32   [valid, dy, dx, stash-one-hot] lane masks
    out_ref   : (1, 1, 1, R_out_pad)  f32   sigmoid(logits) row; last lane = smooth partial
    patch_ref : (27*C_IN, R_out_pad)  f32   im2col scratch (8-row aligned stores)
    carry_ref : (1, Hp*Wp)            f32   previous slab's last logits depth-slice
    """
    HpWp = Hp * Wp
    s = pl.program_id(1)

    x = x_ref[0, 0]                                           # (C_IN, N_flat) bf16

    # ---- im2col: 27 contiguous lane-offset windows stacked on the sublane axis ------
    # Offsets are static; no strided slice + reshape relayouts.  The pieces are staged
    # through an f32 scratch so every store is a full (8,128)-aligned tile write, then
    # the assembled patch is cast to bf16 once for the MXU.
    for kd in range(3):
        for kh in range(3):
            for kw in range(3):
                k = (kd * 3 + kh) * 3 + kw
                off = kd * HpWp + kh * Wp + kw
                patch_ref[k * C_IN:(k + 1) * C_IN, :] = (
                    x[:, off:off + R_out_pad].astype(jnp.float32))
    patch = patch_ref[...].astype(jnp.bfloat16)               # (216, R_out_pad)

    # ---- Conv3d(k=3, pad=1): ONE fused MXU matmul, K=216, bf16 in / f32 accumulate --
    hid = jnp.dot(w1_ref[...], patch,
                  preferred_element_type=jnp.float32)         # (HID, R_out_pad) f32
    hid = hid + b1_ref[...]                                   # bias over lanes
    hid = jnp.where(hid >= 0.0, hid, LEAKY_SLOPE * hid)       # LeakyReLU (f32, VPU)

    # ---- Conv3d(k=1, Cout=1): VPU multiply + sublane reduce -> lane-dense logits ----
    logits = jnp.sum(hid * w2_ref[...], axis=0, keepdims=True) + b2_ref[...]  # (1, R)

    sub_e = 1.0 / (1.0 + jnp.exp(-logits))                    # sigmoid

    # ---- smooth loss partials: |dz|+|dy|+|dx| of logits (gradient3D, zero end-pad) --
    m = m_ref[...]
    m_valid = m[0:1, :]
    m_dy = m[1:2, :]
    m_dx = m[2:3, :]
    m_stash = m[3:4, :]

    dz = jnp.abs(logits[:, HpWp:R_out] - logits[:, :R_out - HpWp]) \
        * m_valid[:, :R_out - HpWp]
    dy = jnp.abs(logits[:, Wp:R_out] - logits[:, :R_out - Wp]) * m_dy[:, :R_out - Wp]
    dx = jnp.abs(logits[:, 1:R_out] - logits[:, :R_out - 1]) * m_dx[:, :R_out - 1]
    partial = (jnp.sum(dz, keepdims=True) + jnp.sum(dy, keepdims=True)
               + jnp.sum(dx, keepdims=True))                  # (1, 1)

    # dz across the slab boundary: carry the previous slab's last logits depth-slice.
    @pl.when(s == 0)
    def _():
        carry_ref[...] = jnp.zeros_like(carry_ref)

    prev = carry_ref[...]                                     # (1, HpWp)
    cross = jnp.sum(jnp.abs(logits[:, :HpWp] - prev) * m_valid[:, :HpWp],
                    keepdims=True)                            # (1, 1)
    partial = partial + jnp.where(s > 0, cross, 0.0)
    carry_ref[...] = logits[:, R_out - HpWp:R_out]

    # ---- one lane-dense row; scalar smooth partial stashed in the spare last lane ---
    out_ref[0, 0] = jnp.where(m_stash > 0.5, partial, sub_e)


def _choose_tile_d(D, Hp, Wp, max_rows=4096):
    """Largest divisor of D keeping TD*Hp*Wp <= max_rows so the per-step working set
    (im2col patch + f32 hid, ~1 KiB/row) stays at a few MiB of VMEM.  v7x (64 MiB VMEM)
    wants the smaller end; v5e/v6e (128 MiB VMEM) could raise max_rows for bigger
    resident slabs."""
    best = 1
    for td in range(1, D + 1):
        if D % td == 0 and td * Hp * Wp <= max_rows:
            best = td
    return best


def subnet_forward(feat, w1, b1, w2, b2, *, tile_d=None):
    """feat: [B, C_IN, D, H, W] (NCDHW, like the PyTorch module).

    Returns (total_loss, sub_e) with sub_e of shape [B, 1, D, H, W], matching
    SubNet.forward(feat) with obj_g/bkg_g/valid_g = None.
    """
    B, C, D, H, W = feat.shape
    assert C == C_IN
    Hp, Wp = H + 2, W + 2
    HpWp = Hp * Wp

    TD = _choose_tile_d(D, Hp, Wp) if tile_d is None else tile_d
    assert D % TD == 0
    S = D // TD

    R_out = TD * HpWp                          # flat rows per slab (h/w borders included)
    R_out_pad = _round_up(R_out + 1, 128)      # lane-dense + 1 spare lane for the stash
    max_off = 2 * HpWp + 2 * Wp + 2            # largest im2col tap offset
    N_flat = _round_up(R_out_pad + max_off, 128)
    slab_len = (TD + 2) * HpWp

    # ---- glue: channel-major flat layout, zero spatial pad, bf16, overlapping slabs --
    x_pad = jnp.pad(feat, ((0, 0), (0, 0), (1, 1), (1, 1), (1, 1)))
    x_flat = x_pad.reshape(B, C, (D + 2) * HpWp)
    slabs = [lax.slice_in_dim(x_flat, s * TD * HpWp, s * TD * HpWp + slab_len, axis=2)
             for s in range(S)]
    x_slab = jnp.stack(slabs, axis=1)                                    # (B,S,C,slab_len)
    x_slab = jnp.pad(x_slab, ((0, 0), (0, 0), (0, 0), (0, N_flat - slab_len)))
    x_slab = x_slab.astype(jnp.bfloat16)

    # ---- glue: weights.  torch Conv3d w1 (O,I,kD,kH,kW) -> (O, 27*I), tap-major ------
    w1_k = jnp.transpose(w1, (0, 2, 3, 4, 1)).reshape(HID, K_IM2COL).astype(jnp.bfloat16)
    b1_k = b1.reshape(HID, 1).astype(jnp.float32)
    w2_k = w2.reshape(1, HID).T.astype(jnp.float32)            # (HID, 1)
    b2_k = b2.reshape(1, 1).astype(jnp.float32)

    # ---- glue: lane-dense boundary masks (precomputed; keeps the kernel iota-free) ---
    lane = np.arange(R_out_pad)
    rem = lane % HpWp
    yy, xx = rem // Wp, rem % Wp
    in_r = lane < R_out
    m_valid = in_r & (yy < H) & (xx < W)
    m_dy = in_r & (yy < H - 1) & (xx < W)
    m_dx = in_r & (yy < H) & (xx < W - 1)
    m_stash = lane == (R_out_pad - 1)
    masks = jnp.asarray(np.stack([m_valid, m_dy, m_dx, m_stash]).astype(np.float32))

    kernel = functools.partial(_subnet_kernel, Hp=Hp, Wp=Wp,
                               R_out=R_out, R_out_pad=R_out_pad)
    out = pl.pallas_call(
        kernel,
        out_shape=jax.ShapeDtypeStruct((B, S, 1, R_out_pad), jnp.float32),
        grid_spec=pltpu.PrefetchScalarGridSpec(
            num_scalar_prefetch=0,
            grid=(B, S),
            in_specs=[
                pl.BlockSpec((1, 1, C_IN, N_flat), lambda b, s: (b, s, 0, 0)),
                pl.BlockSpec((HID, K_IM2COL), lambda b, s: (0, 0)),
                pl.BlockSpec((HID, 1), lambda b, s: (0, 0)),
                pl.BlockSpec((HID, 1), lambda b, s: (0, 0)),
                pl.BlockSpec((1, 1), lambda b, s: (0, 0)),
                pl.BlockSpec((4, R_out_pad), lambda b, s: (0, 0)),
            ],
            out_specs=pl.BlockSpec((1, 1, 1, R_out_pad), lambda b, s: (b, s, 0, 0)),
            scratch_shapes=[
                pltpu.VMEM((K_IM2COL, R_out_pad), jnp.float32),   # im2col patch
                pltpu.VMEM((1, HpWp), jnp.float32),               # dz carry across slabs
            ],
        ),
        compiler_params=pltpu.CompilerParams(
            dimension_semantics=("parallel", "arbitrary"),
            vmem_limit_bytes=32 * 1024 * 1024,
        ),
    )(x_slab, w1_k, b1_k, w2_k, b2_k, masks)

    rows = out[:, :, 0, :]                                     # (B, S, R_out_pad)
    smooth_partial = rows[:, :, R_out_pad - 1]                 # (B, S)
    sub_e = (rows[:, :, :R_out]
             .reshape(B, S, TD, Hp, Wp)[:, :, :, :H, :W]
             .reshape(B, D, H, W)[:, None])                    # (B, 1, D, H, W)

    # smooth_vox = mean over the size-1 channel dim; smooth_loss = mean over B*1*D*H*W
    # entries (end-padded gradient3D entries are zero).
    smooth_loss = jnp.sum(smooth_partial) / (B * 1 * D * H * W)
    total_loss = SUB_SMOOTH_COEFF * smooth_loss                # utils_misc.add_loss from 0.0
    # TODO(synk): compute_loss branch (obj_g/bkg_g/valid_g) and summ_writer summaries are
    # not exercised (forward called with the default None labels); sub_e_binary =
    # round(sub_e) is computed but unused in the original forward, so it is skipped.
    return total_loss, sub_e


def subnet_reference(feat, w1, b1, w2, b2):
    """Pure-JAX f32 reference (NCDHW convs) for validation."""
    dn = ('NCDHW', 'OIDHW', 'NCDHW')
    y = lax.conv_general_dilated(feat, w1, (1, 1, 1), ((1, 1),) * 3,
                                 dimension_numbers=dn,
                                 precision=lax.Precision.HIGHEST)
    y = y + b1[None, :, None, None, None]
    y = jnp.where(y >= 0, y, LEAKY_SLOPE * y)
    y = lax.conv_general_dilated(y, w2, (1, 1, 1), ((0, 0),) * 3,
                                 dimension_numbers=dn,
                                 precision=lax.Precision.HIGHEST)
    logits = y + b2[None, :, None, None, None]
    sub_e = jax.nn.sigmoid(logits)
    dz = jnp.abs(logits[:, :, 1:] - logits[:, :, :-1])
    dy = jnp.abs(logits[:, :, :, 1:] - logits[:, :, :, :-1])
    dx = jnp.abs(logits[:, :, :, :, 1:] - logits[:, :, :, :, :-1])
    B, _, D, H, W = logits.shape
    smooth_loss = (jnp.sum(dz) + jnp.sum(dy) + jnp.sum(dx)) / (B * D * H * W)
    return SUB_SMOOTH_COEFF * smooth_loss, sub_e


if __name__ == "__main__":
    key = jax.random.PRNGKey(0)
    k1, k2, k3, k4, k5 = jax.random.split(key, 5)

    B, D, H, W = 2, 8, 8, 8
    feat = jax.random.normal(k1, (B, C_IN, D, H, W), jnp.float32)

    # Deterministic synthetic parameters (Conv3d shapes from __init__).
    w1 = jax.random.normal(k2, (HID, C_IN, 3, 3, 3), jnp.float32) * 0.1
    b1 = jax.random.normal(k3, (HID,), jnp.float32) * 0.1
    w2 = jax.random.normal(k4, (1, HID, 1, 1, 1), jnp.float32) * 0.1
    b2 = jax.random.normal(k5, (1,), jnp.float32) * 0.1

    run = jax.jit(subnet_forward, static_argnames=("tile_d",))
    ref_loss, ref_sub_e = subnet_reference(feat, w1, b1, w2, b2)

    # Auto single-slab path, and an explicit 2-slab path that exercises the dz carry.
    for td in (None, 4):
        total_loss, sub_e = run(feat, w1, b1, w2, b2, tile_d=td)
        jax.block_until_ready((total_loss, sub_e))
        assert sub_e.shape == (B, 1, D, H, W)
        assert jnp.allclose(sub_e, ref_sub_e, atol=3e-2, rtol=3e-2), \
            f"sub_e mismatch (tile_d={td})"
        assert jnp.allclose(total_loss, ref_loss, atol=1e-3, rtol=5e-2), \
            f"loss mismatch (tile_d={td})"

    print("KERNEL_OK")
</pallas_src>

<mosaic_0001>
module attributes {stable_mosaic.version = 11 : i64} {
  func.func @_subnet_kernel(%arg0: i32, %arg1: i32, %arg2: memref<1x1x8x1152xbf16, #tpu.memory_space<vmem>>, %arg3: memref<64x216xbf16, #tpu.memory_space<vmem>>, %arg4: memref<64x1xf32, #tpu.memory_space<vmem>>, %arg5: memref<64x1xf32, #tpu.memory_space<vmem>>, %arg6: memref<1x1xf32, #tpu.memory_space<vmem>>, %arg7: memref<4x896xf32, #tpu.memory_space<vmem>>, %arg8: memref<1x1x1x896xf32, #tpu.memory_space<vmem>>, %arg9: memref<216x896xf32, #tpu.memory_space<vmem>>, %arg10: memref<1x100xf32, #tpu.memory_space<vmem>>) attributes {dimension_semantics = [#tpu.dimension_semantics<parallel>, #tpu.dimension_semantics<arbitrary>], iteration_bounds = array<i64: 2, 1>, scalar_prefetch = 0 : i64, scratch_operands = 2 : i64, tpu.core_type = #tpu.core_type<tc>, window_params = [{transform_indices = @transform_0, window_bounds = array<i64: 1, 1, 8, 1152>}, {pipeline_mode = #tpu.pipeline_mode<synchronous>, transform_indices = @transform_1, window_bounds = array<i64: 64, 216>}, {pipeline_mode = #tpu.pipeline_mode<synchronous>, transform_indices = @transform_2, window_bounds = array<i64: 64, 1>}, {pipeline_mode = #tpu.pipeline_mode<synchronous>, transform_indices = @transform_3, window_bounds = array<i64: 64, 1>}, {pipeline_mode = #tpu.pipeline_mode<synchronous>, transform_indices = @transform_4, window_bounds = array<i64: 1, 1>}, {pipeline_mode = #tpu.pipeline_mode<synchronous>, transform_indices = @transform_5, window_bounds = array<i64: 4, 896>}, {transform_indices = @transform_6, window_bounds = array<i64: 1, 1, 1, 896>}]} {
    %c0 = arith.constant 0 : index
    %c0_0 = arith.constant 0 : index
    %c0_1 = arith.constant 0 : index
    %c0_2 = arith.constant 0 : index
    %0 = vector.load %arg2[%c0, %c0_0, %c0_1, %c0_2] : memref<1x1x8x1152xbf16, #tpu.memory_space<vmem>>, vector<1x1x8x1152xbf16>
    %1 = vector.shape_cast %0 : vector<1x1x8x1152xbf16> to vector<8x1152xbf16>
    %2 = vector.extract_strided_slice %1 {offsets = [0, 0], sizes = [8, 896], strides = [1, 1]} : vector<8x1152xbf16> to vector<8x896xbf16>
    %3 = arith.extf %2 : vector<8x896xbf16> to vector<8x896xf32>
    %c0_3 = arith.constant 0 : index
    %c0_4 = arith.constant 0 : index
    %4 = vector.load %arg9[%c0_3, %c0_4] : memref<216x896xf32, #tpu.memory_space<vmem>>, vector<8x896xf32>
    tpu.vector_store %arg9[%c0_3, %c0_4], %3 {strides = array<i32>} : memref<216x896xf32, #tpu.memory_space<vmem>>, vector<8x896xf32>,
    %5 = vector.extract_strided_slice %1 {offsets = [0, 1], sizes = [8, 896], strides = [1, 1]} : vector<8x1152xbf16> to vector<8x896xbf16>
    %6 = arith.extf %5 : vector<8x896xbf16> to vector<8x896xf32>
    %c8 = arith.constant 8 : index
    %c0_5 = arith.constant 0 : index
    %7 = vector.load %arg9[%c8, %c0_5] : memref<216x896xf32, #tpu.memory_space<vmem>>, vector<8x896xf32>
    tpu.vector_store %arg9[%c8, %c0_5], %6 {strides = array<i32>} : memref<216x896xf32, #tpu.memory_space<vmem>>, vector<8x896xf32>,
    %8 = vector.extract_strided_slice %1 {offsets = [0, 2], sizes = [8, 896], strides = [1, 1]} : vector<8x1152xbf16> to vector<8x896xbf16>
    %9 = arith.extf %8 : vector<8x896xbf16> to vector<8x896xf32>
    %c16 = arith.constant 16 : index
    %c0_6 = arith.constant 0 : index
    %10 = vector.load %arg9[%c16, %c0_6] : memref<216x896xf32, #tpu.memory_space<vmem>>, vector<8x896xf32>
    tpu.vector_store %arg9[%c16, %c0_6], %9 {strides = array<i32>} : memref<216x896xf32, #tpu.memory_space<vmem>>, vector<8x896xf32>,
    %11 = vector.extract_strided_slice %1 {offsets = [0, 10], sizes = [8, 896], strides = [1, 1]} : vector<8x1152xbf16> to vector<8x896xbf16>
    %12 = arith.extf %11 : vector<8x896xbf16> to vector<8x896xf32>
    %c24 = arith.constant 24 : index
    %c0_7 = arith.constant 0 : index
    %13 = vector.load %arg9[%c24, %c0_7] : memref<216x896xf32, #tpu.memory_space<vmem>>, vector<8x896xf32>
    tpu.vector_store %arg9[%c24, %c0_7], %12 {strides = array<i32>} : memref<216x896xf32, #tpu.memory_space<vmem>>, vector<8x896xf32>,
    %14 = vector.extract_strided_slice %1 {offsets = [0, 11], sizes = [8, 896], strides = [1, 1]} : vector<8x1152xbf16> to vector<8x896xbf16>
    %15 = arith.extf %14 : vector<8x896xbf16> to vector<8x896xf32>
    %c32 = arith.constant 32 : index
    %c0_8 = arith.constant 0 : index
    %16 = vector.load %arg9[%c32, %c0_8] : memref<216x896xf32, #tpu.memory_space<vmem>>, vector<8x896xf32>
    tpu.vector_store %arg9[%c32, %c0_8], %15 {strides = array<i32>} : memref<216x896xf32, #tpu.memory_space<vmem>>, vector<8x896xf32>,
    %17 = vector.extract_strided_slice %1 {offsets = [0, 12], sizes = [8, 896], strides = [1, 1]} : vector<8x1152xbf16> to vector<8x896xbf16>
    %18 = arith.extf %17 : vector<8x896xbf16> to vector<8x896xf32>
    %c40 = arith.constant 40 : index
    %c0_9 = arith.constant 0 : index
    %19 = vector.load %arg9[%c40, %c0_9] : memref<216x896xf32, #tpu.memory_space<vmem>>, vector<8x896xf32>
    tpu.vector_store %arg9[%c40, %c0_9], %18 {strides = array<i32>} : memref<216x896xf32, #tpu.memory_space<vmem>>, vector<8x896xf32>,
    %20 = vector.extract_strided_slice %1 {offsets = [0, 20], sizes = [8, 896], strides = [1, 1]} : vector<8x1152xbf16> to vector<8x896xbf16>
    %21 = arith.extf %20 : vector<8x896xbf16> to vector<8x896xf32>
    %c48 = arith.constant 48 : index
    %c0_10 = arith.constant 0 : index
    %22 = vector.load %arg9[%c48, %c0_10] : memref<216x896xf32, #tpu.memory_space<vmem>>, vector<8x896xf32>
    tpu.vector_store %arg9[%c48, %c0_10], %21 {strides = array<i32>} : memref<216x896xf32, #tpu.memory_space<vmem>>, vector<8x896xf32>,
    %23 = vector.extract_strided_slice %1 {offsets = [0, 21], sizes = [8, 896], strides = [1, 1]} : vector<8x1152xbf16> to vector<8x896xbf16>
    %24 = arith.extf %23 : vector<8x896xbf16> to vector<8x896xf32>
    %c56 = arith.constant 56 : index
    %c0_11 = arith.constant 0 : index
    %25 = vector.load %arg9[%c56, %c0_11] : memref<216x896xf32, #tpu.memory_space<vmem>>, vector<8x896xf32>
    tpu.vector_store %arg9[%c56, %c0_11], %24 {strides = array<i32>} : memref<216x896xf32, #tpu.memory_space<vmem>>, vector<8x896xf32>,
    %26 = vector.extract_strided_slice %1 {offsets = [0, 22], sizes = [8, 896], strides = [1, 1]} : vector<8x1152xbf16> to vector<8x896xbf16>
    %27 = arith.extf %26 : vector<8x896xbf16> to vector<8x896xf32>
    %c64 = arith.constant 64 : index
    %c0_12 = arith.constant 0 : index
    %28 = vector.load %arg9[%c64, %c0_12] : memref<216x896xf32, #tpu.memory_space<vmem>>, vector<8x896xf32>
    tpu.vector_store %arg9[%c64, %c0_12], %27 {strides = array<i32>} : memref<216x896xf32, #tpu.memory_space<vmem>>, vector<8x896xf32>,
    %29 = vector.extract_strided_slice %1 {offsets = [0, 100], sizes = [8, 896], strides = [1, 1]} : vector<8x1152xbf16> to vector<8x896xbf16>
    %30 = arith.extf %29 : vector<8x896xbf16> to vector<8x896xf32>
    %c72 = arith.constant 72 : index
    %c0_13 = arith.constant 0 : index
    %31 = vector.load %arg9[%c72, %c0_13] : memref<216x896xf32, #tpu.memory_space<vmem>>, vector<8x896xf32>
    tpu.vector_store %arg9[%c72, %c0_13], %30 {strides = array<i32>} : memref<216x896xf32, #tpu.memory_space<vmem>>, vector<8x896xf32>,
    %32 = vector.extract_strided_slice %1 {offsets = [0, 101], sizes = [8, 896], strides = [1, 1]} : vector<8x1152xbf16> to vector<8x896xbf16>
    %33 = arith.extf %32 : vector<8x896xbf16> to vector<8x896xf32>
    %c80 = arith.constant 80 : index
    %c0_14 = arith.constant 0 : index
    %34 = vector.load %arg9[%c80, %c0_14] : memref<216x896xf32, #tpu.memory_space<vmem>>, vector<8x896xf32>
    tpu.vector_store %arg9[%c80, %c0_14], %33 {strides = array<i32>} : memref<216x896xf32, #tpu.memory_space<vmem>>, vector<8x896xf32>,
    %35 = vector.extract_strided_slice %1 {offsets = [0, 102], sizes = [8, 896], strides = [1, 1]} : vector<8x1152xbf16> to vector<8x896xbf16>
    %36 = arith.extf %35 : vector<8x896xbf16> to vector<8x896xf32>
    %c88 = arith.constant 88 : index
    %c0_15 = arith.constant 0 : index
    %37 = vector.load %arg9[%c88, %c0_15] : memref<216x896xf32, #tpu.memory_space<vmem>>, vector<8x896xf32>
    tpu.vector_store %arg9[%c88, %c0_15], %36 {strides = array<i32>} : memref<216x896xf32, #tpu.memory_space<vmem>>, vector<8x896xf32>,
    %38 = vector.extract_strided_slice %1 {offsets = [0, 110], sizes = [8, 896], strides = [1, 1]} : vector<8x1152xbf16> to vector<8x896xbf16>
    %39 = arith.extf %38 : vector<8x896xbf16> to vector<8x896xf32>
    %c96 = arith.constant 96 : index
    %c0_16 = arith.constant 0 : index
    %40 = vector.load %arg9[%c96, %c0_16] : memref<216x896xf32, #tpu.memory_space<vmem>>, vector<8x896xf32>
    tpu.vector_store %arg9[%c96, %c0_16], %39 {strides = array<i32>} : memref<216x896xf32, #tpu.memory_space<vmem>>, vector<8x896xf32>,
    %41 = vector.extract_strided_slice %1 {offsets = [0, 111], sizes = [8, 896], strides = [1, 1]} : vector<8x1152xbf16> to vector<8x896xbf16>
    %42 = arith.extf %41 : vector<8x896xbf16> to vector<8x896xf32>
    %c104 = arith.constant 104 : index
    %c0_17 = arith.constant 0 : index
    %43 = vector.load %arg9[%c104, %c0_17] : memref<216x896xf32, #tpu.memory_space<vmem>>, vector<8x896xf32>
    tpu.vector_store %arg9[%c104, %c0_17], %42 {strides = array<i32>} : memref<216x896xf32, #tpu.memory_space<vmem>>, vector<8x896xf32>,
    %44 = vector.extract_strided_slice %1 {offsets = [0, 112], sizes = [8, 896], strides = [1, 1]} : vector<8x1152xbf16> to vector<8x896xbf16>
    %45 = arith.extf %44 : vector<8x896xbf16> to vector<8x896xf32>
    %c112 = arith.constant 112 : index
    %c0_18 = arith.constant 0 : index
    %46 = vector.load %arg9[%c112, %c0_18] : memref<216x896xf32, #tpu.memory_space<vmem>>, vector<8x896xf32>
    tpu.vector_store %arg9[%c112, %c0_18], %45 {strides = array<i32>} : memref<216x896xf32, #tpu.memory_space<vmem>>, vector<8x896xf32>,
    %47 = vector.extract_strided_slice %1 {offsets = [0, 120], sizes = [8, 896], strides = [1, 1]} : vector<8x1152xbf16> to vector<8x896xbf16>
    %48 = arith.extf %47 : vector<8x896xbf16> to vector<8x896xf32>
    %c120 = arith.constant 120 : index
    %c0_19 = arith.constant 0 : index
    %49 = vector.load %arg9[%c120, %c0_19] : memref<216x896xf32, #tpu.memory_space<vmem>>, vector<8x896xf32>
    tpu.vector_store %arg9[%c120, %c0_19], %48 {strides = array<i32>} : memref<216x896xf32, #tpu.memory_space<vmem>>, vector<8x896xf32>,
    %50 = vector.extract_strided_slice %1 {offsets = [0, 121], sizes = [8, 896], strides = [1, 1]} : vector<8x1152xbf16> to vector<8x896xbf16>
    %51 = arith.extf %50 : vector<8x896xbf16> to vector<8x896xf32>
    %c128 = arith.constant 128 : index
    %c0_20 = arith.constant 0 : index
    %52 = vector.load %arg9[%c128, %c0_20] : memref<216x896xf32, #tpu.memory_space<vmem>>, vector<8x896xf32>
    tpu.vector_store %arg9[%c128, %c0_20], %51 {strides = array<i32>} : memref<216x896xf32, #tpu.memory_space<vmem>>, vector<8x896xf32>,
    %53 = vector.extract_strided_slice %1 {offsets = [0, 122], sizes = [8, 896], strides = [1, 1]} : vector<8x1152xbf16> to vector<8x896xbf16>
    %54 = arith.extf %53 : vector<8x896xbf16> to vector<8x896xf32>
    %c136 = arith.constant 136 : index
    %c0_21 = arith.constant 0 : index
    %55 = vector.load %arg9[%c136, %c0_21] : memref<216x896xf32, #tpu.memory_space<vmem>>, vector<8x896xf32>
    tpu.vector_store %arg9[%c136, %c0_21], %54 {strides = array<i32>} : memref<216x896xf32, #tpu.memory_space<vmem>>, vector<8x896xf32>,
    %56 = vector.extract_strided_slice %1 {offsets = [0, 200], sizes = [8, 896], strides = [1, 1]} : vector<8x1152xbf16> to vector<8x896xbf16>
    %57 = arith.extf %56 : vector<8x896xbf16> to vector<8x896xf32>
    %c144 = arith.constant 144 : index
    %c0_22 = arith.constant 0 : index
    %58 = vector.load %arg9[%c144, %c0_22] : memref<216x896xf32, #tpu.memory_space<vmem>>, vector<8x896xf32>
    tpu.vector_store %arg9[%c144, %c0_22], %57 {strides = array<i32>} : memref<216x896xf32, #tpu.memory_space<vmem>>, vector<8x896xf32>,
    %59 = vector.extract_strided_slice %1 {offsets = [0, 201], sizes = [8, 896], strides = [1, 1]} : vector<8x1152xbf16> to vector<8x896xbf16>
    %60 = arith.extf %59 : vector<8x896xbf16> to vector<8x896xf32>
    %c152 = arith.constant 152 : index
    %c0_23 = arith.constant 0 : index
    %61 = vector.load %arg9[%c152, %c0_23] : memref<216x896xf32, #tpu.memory_space<vmem>>, vector<8x896xf32>
    tpu.vector_store %arg9[%c152, %c0_23], %60 {strides = array<i32>} : memref<216x896xf32, #tpu.memory_space<vmem>>, vector<8x896xf32>,
    %62 = vector.extract_strided_slice %1 {offsets = [0, 202], sizes = [8, 896], strides = [1, 1]} : vector<8x1152xbf16> to vector<8x896xbf16>
    %63 = arith.extf %62 : vector<8x896xbf16> to vector<8x896xf32>
    %c160 = arith.constant 160 : index
    %c0_24 = arith.constant 0 : index
    %64 = vector.load %arg9[%c160, %c0_24] : memref<216x896xf32, #tpu.memory_space<vmem>>, vector<8x896xf32>
    tpu.vector_store %arg9[%c160, %c0_24], %63 {strides = array<i32>} : memref<216x896xf32, #tpu.memory_space<vmem>>, vector<8x896xf32>,
    %65 = vector.extract_strided_slice %1 {offsets = [0, 210], sizes = [8, 896], strides = [1, 1]} : vector<8x1152xbf16> to vector<8x896xbf16>
    %66 = arith.extf %65 : vector<8x896xbf16> to vector<8x896xf32>
    %c168 = arith.constant 168 : index
    %c0_25 = arith.constant 0 : index
    %67 = vector.load %arg9[%c168, %c0_25] : memref<216x896xf32, #tpu.memory_space<vmem>>, vector<8x896xf32>
    tpu.vector_store %arg9[%c168, %c0_25], %66 {strides = array<i32>} : memref<216x896xf32, #tpu.memory_space<vmem>>, vector<8x896xf32>,
    %68 = vector.extract_strided_slice %1 {offsets = [0, 211], sizes = [8, 896], strides = [1, 1]} : vector<8x1152xbf16> to vector<8x896xbf16>
    %69 = arith.extf %68 : vector<8x896xbf16> to vector<8x896xf32>
    %c176 = arith.constant 176 : index
    %c0_26 = arith.constant 0 : index
    %70 = vector.load %arg9[%c176, %c0_26] : memref<216x896xf32, #tpu.memory_space<vmem>>, vector<8x896xf32>
    tpu.vector_store %arg9[%c176, %c0_26], %69 {strides = array<i32>} : memref<216x896xf32, #tpu.memory_space<vmem>>, vector<8x896xf32>,
    %71 = vector.extract_strided_slice %1 {offsets = [0, 212], sizes = [8, 896], strides = [1, 1]} : vector<8x1152xbf16> to vector<8x896xbf16>
    %72 = arith.extf %71 : vector<8x896xbf16> to vector<8x896xf32>
    %c184 = arith.constant 184 : index
    %c0_27 = arith.constant 0 : index
    %73 = vector.load %arg9[%c184, %c0_27] : memref<216x896xf32, #tpu.memory_space<vmem>>, vector<8x896xf32>
    tpu.vector_store %arg9[%c184, %c0_27], %72 {strides = array<i32>} : memref<216x896xf32, #tpu.memory_space<vmem>>, vector<8x896xf32>,
    %74 = vector.extract_strided_slice %1 {offsets = [0, 220], sizes = [8, 896], strides = [1, 1]} : vector<8x1152xbf16> to vector<8x896xbf16>
    %75 = arith.extf %74 : vector<8x896xbf16> to vector<8x896xf32>
    %c192 = arith.constant 192 : index
    %c0_28 = arith.constant 0 : index
    %76 = vector.load %arg9[%c192, %c0_28] : memref<216x896xf32, #tpu.memory_space<vmem>>, vector<8x896xf32>
    tpu.vector_store %arg9[%c192, %c0_28], %75 {strides = array<i32>} : memref<216x896xf32, #tpu.memory_space<vmem>>, vector<8x896xf32>,
    %77 = vector.extract_strided_slice %1 {offsets = [0, 221], sizes = [8, 896], strides = [1, 1]} : vector<8x1152xbf16> to vector<8x896xbf16>
    %78 = arith.extf %77 : vector<8x896xbf16> to vector<8x896xf32>
    %c200 = arith.constant 200 : index
    %c0_29 = arith.constant 0 : index
    %79 = vector.load %arg9[%c200, %c0_29] : memref<216x896xf32, #tpu.memory_space<vmem>>, vector<8x896xf32>
    tpu.vector_store %arg9[%c200, %c0_29], %78 {strides = array<i32>} : memref<216x896xf32, #tpu.memory_space<vmem>>, vector<8x896xf32>,
    %80 = vector.extract_strided_slice %1 {offsets = [0, 222], sizes = [8, 896], strides = [1, 1]} : vector<8x1152xbf16> to vector<8x896xbf16>
    %81 = arith.extf %80 : vector<8x896xbf16> to vector<8x896xf32>
    %c208 = arith.constant 208 : index
    %c0_30 = arith.constant 0 : index
    %82 = vector.load %arg9[%c208, %c0_30] : memref<216x896xf32, #tpu.memory_space<vmem>>, vector<8x896xf32>
    tpu.vector_store %arg9[%c208, %c0_30], %81 {strides = array<i32>} : memref<216x896xf32, #tpu.memory_space<vmem>>, vector<8x896xf32>,
    %c0_31 = arith.constant 0 : index
    %c0_32 = arith.constant 0 : index
    %83 = vector.load %arg9[%c0_31, %c0_32] : memref<216x896xf32, #tpu.memory_space<vmem>>, vector<216x896xf32>
    %84 = arith.truncf %83 : vector<216x896xf32> to vector<216x896xbf16>
    %c0_33 = arith.constant 0 : index
    %c0_34 = arith.constant 0 : index
    %85 = vector.load %arg3[%c0_33, %c0_34] : memref<64x216xbf16, #tpu.memory_space<vmem>>, vector<64x216xbf16>
    %cst = arith.constant dense<0.000000e+00> : vector<64x896xf32>
    %86 = tpu.matmul %85, %84, %cst {dimension_numbers = #tpu.dot_dimension_numbers<[1], [0], [0], [1], [0, 0, 1, 1], [], []>} : vector<64x216xbf16>, vector<216x896xbf16>, vector<64x896xf32> -> vector<64x896xf32>
    %c0_35 = arith.constant 0 : index
    %c0_36 = arith.constant 0 : index
    %87 = vector.load %arg4[%c0_35, %c0_36] : memref<64x1xf32, #tpu.memory_space<vmem>>, vector<64x1xf32>
    %88 = vector.broadcast %87 : vector<64x1xf32> to vector<64x896xf32>
    %89 = arith.addf %86, %88 : vector<64x896xf32>
    %cst_37 = arith.constant 0.000000e+00 : f32
    %90 = vector.broadcast %cst_37 : f32 to vector<64x896xf32>
    %91 = arith.cmpf oge, %89, %90 : vector<64x896xf32>
    %cst_38 = arith.constant 0.00999999977 : f32
    %92 = vector.broadcast %cst_38 : f32 to vector<64x896xf32>
    %93 = arith.mulf %92, %89 : vector<64x896xf32>
    %94 = arith.select %91, %89, %93 : vector<64x896xi1>, vector<64x896xf32>
    %c0_39 = arith.constant 0 : index
    %c0_40 = arith.constant 0 : index
    %95 = vector.load %arg5[%c0_39, %c0_40] : memref<64x1xf32, #tpu.memory_space<vmem>>, vector<64x1xf32>
    %96 = vector.broadcast %95 : vector<64x1xf32> to vector<64x896xf32>
    %97 = arith.mulf %94, %96 : vector<64x896xf32>
    %cst_41 = arith.constant dense<0.000000e+00> : vector<896xf32>
    %98 = vector.multi_reduction <add>, %97, %cst_41 [0] : vector<64x896xf32> to vector<896xf32>
    %99 = vector.shape_cast %98 : vector<896xf32> to vector<1x896xf32>
    %c0_42 = arith.constant 0 : index
    %c0_43 = arith.constant 0 : index
    %100 = vector.load %arg6[%c0_42, %c0_43] : memref<1x1xf32, #tpu.memory_space<vmem>>, vector<1x1xf32>
    %101 = vector.broadcast %100 : vector<1x1xf32> to vector<1x896xf32>
    %102 = arith.addf %99, %101 : vector<1x896xf32>
    %cst_44 = arith.constant 0.000000e+00 : f32
    %103 = vector.broadcast %cst_44 : f32 to vector<1x896xf32>
    %104 = arith.subf %103, %102 : vector<1x896xf32>
    %105 = math.exp %104 : vector<1x896xf32>
    %cst_45 = arith.constant 1.000000e+00 : f32
    %106 = vector.broadcast %cst_45 : f32 to vector<1x896xf32>
    %107 = arith.addf %106, %105 : vector<1x896xf32>
    %cst_46 = arith.constant 1.000000e+00 : f32
    %108 = vector.broadcast %cst_46 : f32 to vector<1x896xf32>
    %109 = arith.divf %108, %107 : vector<1x896xf32>
    %c0_47 = arith.constant 0 : index
    %c0_48 = arith.constant 0 : index
    %110 = vector.load %arg7[%c0_47, %c0_48] : memref<4x896xf32, #tpu.memory_space<vmem>>, vector<4x896xf32>
    %111 = vector.extract_strided_slice %110 {offsets = [0, 0], sizes = [1, 896], strides = [1, 1]} : vector<4x896xf32> to vector<1x896xf32>
    %112 = vector.extract_strided_slice %110 {offsets = [1, 0], sizes = [1, 896], strides = [1, 1]} : vector<4x896xf32> to vector<1x896xf32>
    %113 = vector.extract_strided_slice %110 {offsets = [2, 0], sizes = [1, 896], strides = [1, 1]} : vector<4x896xf32> to vector<1x896xf32>
    %114 = vector.extract_strided_slice %110 {offsets = [3, 0], sizes = [1, 896], strides = [1, 1]} : vector<4x896xf32> to vector<1x896xf32>
    %115 = vector.extract_strided_slice %102 {offsets = [0, 100], sizes = [1, 700], strides = [1, 1]} : vector<1x896xf32> to vector<1x700xf32>
    %116 = vector.extract_strided_slice %102 {offsets = [0, 0], sizes = [1, 700], strides = [1, 1]} : vector<1x896xf32> to vector<1x700xf32>
    %117 = arith.subf %115, %116 : vector<1x700xf32>
    %118 = math.absf %117 : vector<1x700xf32>
    %119 = vector.extract_strided_slice %111 {offsets = [0, 0], sizes = [1, 700], strides = [1, 1]} : vector<1x896xf32> to vector<1x700xf32>
    %120 = arith.mulf %118, %119 : vector<1x700xf32>
    %121 = vector.extract_strided_slice %102 {offsets = [0, 10], sizes = [1, 790], strides = [1, 1]} : vector<1x896xf32> to vector<1x790xf32>
    %122 = vector.extract_strided_slice %102 {offsets = [0, 0], sizes = [1, 790], strides = [1, 1]} : vector<1x896xf32> to vector<1x790xf32>
    %123 = arith.subf %121, %122 : vector<1x790xf32>
    %124 = math.absf %123 : vector<1x790xf32>
    %125 = vector.extract_strided_slice %112 {offsets = [0, 0], sizes = [1, 790], strides = [1, 1]} : vector<1x896xf32> to vector<1x790xf32>
    %126 = arith.mulf %124, %125 : vector<1x790xf32>
    %127 = vector.extract_strided_slice %102 {offsets = [0, 1], sizes = [1, 799], strides = [1, 1]} : vector<1x896xf32> to vector<1x799xf32>
    %128 = vector.extract_strided_slice %102 {offsets = [0, 0], sizes = [1, 799], strides = [1, 1]} : vector<1x896xf32> to vector<1x799xf32>
    %129 = arith.subf %127, %128 : vector<1x799xf32>
    %130 = math.absf %129 : vector<1x799xf32>
    %131 = vector.extract_strided_slice %113 {offsets = [0, 0], sizes = [1, 799], strides = [1, 1]} : vector<1x896xf32> to vector<1x799xf32>
    %132 = arith.mulf %130, %131 : vector<1x799xf32>
    %133 = vector.shape_cast %120 : vector<1x700xf32> to vector<1x1x700xf32>
    %cst_49 = arith.constant dense<0.000000e+00> : vector<1xf32>
    %134 = vector.multi_reduction <add>, %133, %cst_49 [1, 2] : vector<1x1x700xf32> to vector<1xf32>
    %135 = vector.shape_cast %134 : vector<1xf32> to vector<1x1x1xf32>
    %136 = vector.extract %135[0, 0, 0] : f32 from vector<1x1x1xf32>
    %137 = vector.broadcast %136 : f32 to vector<1x1xf32>
    %138 = vector.shape_cast %126 : vector<1x790xf32> to vector<1x1x790xf32>
    %cst_50 = arith.constant dense<0.000000e+00> : vector<1xf32>
    %139 = vector.multi_reduction <add>, %138, %cst_50 [1, 2] : vector<1x1x790xf32> to vector<1xf32>
    %140 = vector.shape_cast %139 : vector<1xf32> to vector<1x1x1xf32>
    %141 = vector.extract %140[0, 0, 0] : f32 from vector<1x1x1xf32>
    %142 = vector.broadcast %141 : f32 to vector<1x1xf32>
    %143 = arith.addf %137, %142 : vector<1x1xf32>
    %144 = vector.shape_cast %132 : vector<1x799xf32> to vector<1x1x799xf32>
    %cst_51 = arith.constant dense<0.000000e+00> : vector<1xf32>
    %145 = vector.multi_reduction <add>, %144, %cst_51 [1, 2] : vector<1x1x799xf32> to vector<1xf32>
    %146 = vector.shape_cast %145 : vector<1xf32> to vector<1x1x1xf32>
    %147 = vector.extract %146[0, 0, 0] : f32 from vector<1x1x1xf32>
    %148 = vector.broadcast %147 : f32 to vector<1x1xf32>
    %149 = arith.addf %143, %148 : vector<1x1xf32>
    %c0_i32 = arith.constant 0 : i32
    %150 = arith.cmpi eq, %arg1, %c0_i32 : i32
    %151 = arith.extui %150 : i1 to i32
    %c0_i32_52 = arith.constant 0 : i32
    %152 = arith.cmpi ne, %151, %c0_i32_52 : i32
    scf.if %152 {
      %cst_65 = arith.constant 0.000000e+00 : f32
      %178 = vector.broadcast %cst_65 : f32 to vector<1x100xf32>
      %c0_66 = arith.constant 0 : index
      %c0_67 = arith.constant 0 : index
      %179 = vector.load %arg10[%c0_66, %c0_67] : memref<1x100xf32, #tpu.memory_space<vmem>>, vector<1x100xf32>
      tpu.vector_store %arg10[%c0_66, %c0_67], %178 {strides = array<i32>} : memref<1x100xf32, #tpu.memory_space<vmem>>, vector<1x100xf32>,
    } else {
    }
    %c0_53 = arith.constant 0 : index
    %c0_54 = arith.constant 0 : index
    %153 = vector.load %arg10[%c0_53, %c0_54] : memref<1x100xf32, #tpu.memory_space<vmem>>, vector<1x100xf32>
    %154 = vector.extract_strided_slice %102 {offsets = [0, 0], sizes = [1, 100], strides = [1, 1]} : vector<1x896xf32> to vector<1x100xf32>
    %155 = arith.subf %154, %153 : vector<1x100xf32>
    %156 = math.absf %155 : vector<1x100xf32>
    %157 = vector.extract_strided_slice %111 {offsets = [0, 0], sizes = [1, 100], strides = [1, 1]} : vector<1x896xf32> to vector<1x100xf32>
    %158 = arith.mulf %156, %157 : vector<1x100xf32>
    %159 = vector.shape_cast %158 : vector<1x100xf32> to vector<1x1x100xf32>
    %cst_55 = arith.constant dense<0.000000e+00> : vector<1xf32>
    %160 = vector.multi_reduction <add>, %159, %cst_55 [1, 2] : vector<1x1x100xf32> to vector<1xf32>
    %161 = vector.shape_cast %160 : vector<1xf32> to vector<1x1x1xf32>
    %162 = vector.extract %161[0, 0, 0] : f32 from vector<1x1x1xf32>
    %163 = vector.broadcast %162 : f32 to vector<1x1xf32>
    %c0_i32_56 = arith.constant 0 : i32
    %164 = arith.cmpi sgt, %arg1, %c0_i32_56 : i32
    %cst_57 = arith.constant 0.000000e+00 : f32
    %165 = vector.broadcast %cst_57 : f32 to vector<1x1xf32>
    %166 = arith.select %164, %163, %165 : vector<1x1xf32>
    %167 = arith.addf %149, %166 : vector<1x1xf32>
    %168 = vector.extract_strided_slice %102 {offsets = [0, 700], sizes = [1, 100], strides = [1, 1]} : vector<1x896xf32> to vector<1x100xf32>
    %c0_58 = arith.constant 0 : index
    %c0_59 = arith.constant 0 : index
    %169 = vector.load %arg10[%c0_58, %c0_59] : memref<1x100xf32, #tpu.memory_space<vmem>>, vector<1x100xf32>
    tpu.vector_store %arg10[%c0_58, %c0_59], %168 {strides = array<i32>} : memref<1x100xf32, #tpu.memory_space<vmem>>, vector<1x100xf32>,
    %cst_60 = arith.constant 5.000000e-01 : f32
    %170 = vector.broadcast %cst_60 : f32 to vector<1x896xf32>
    %171 = arith.cmpf ogt, %114, %170 : vector<1x896xf32>
    %172 = vector.shape_cast %167 : vector<1x1xf32> to vector<1x1xf32>
    %173 = vector.broadcast %172 : vector<1x1xf32> to vector<1x896xf32>
    %174 = arith.select %171, %173, %109 : vector<1x896xi1>, vector<1x896xf32>
    %c0_61 = arith.constant 0 : index
    %c0_62 = arith.constant 0 : index
    %c0_63 = arith.constant 0 : index
    %c0_64 = arith.constant 0 : index
    %175 = vector.load %arg8[%c0_61, %c0_62, %c0_63, %c0_64] : memref<1x1x1x896xf32, #tpu.memory_space<vmem>>, vector<1x1x1x896xf32>
    %176 = vector.shape_cast %175 : vector<1x1x1x896xf32> to vector<1x896xf32>
    %177 = vector.shape_cast %174 : vector<1x896xf32> to vector<1x1x1x896xf32>
    tpu.vector_store %arg8[%c0_61, %c0_62, %c0_63, %c0_64], %177 {strides = array<i32>} : memref<1x1x1x896xf32, #tpu.memory_space<vmem>>, vector<1x1x1x896xf32>,
    return
  }
  func.func @transform_0(%arg0: i32, %arg1: i32) -> (i32, i32, i32, i32) {
    %c0_i32 = arith.constant 0 : i32
    %c0_i32_0 = arith.constant 0 : i32
    %c0_i32_1 = arith.constant 0 : i32
    return %arg0, %arg1, %c0_i32, %c0_i32_0 : i32, i32, i32, i32
  }
  func.func @transform_1(%arg0: i32, %arg1: i32) -> (i32, i32) {
    %c0_i32 = arith.constant 0 : i32
    %c0_i32_0 = arith.constant 0 : i32
    %c0_i32_1 = arith.constant 0 : i32
    return %c0_i32, %c0_i32_0 : i32, i32
  }
  func.func @transform_2(%arg0: i32, %arg1: i32) -> (i32, i32) {
    %c0_i32 = arith.constant 0 : i32
    %c0_i32_0 = arith.constant 0 : i32
    %c0_i32_1 = arith.constant 0 : i32
    return %c0_i32, %c0_i32_0 : i32, i32
  }
  func.func @transform_3(%arg0: i32, %arg1: i32) -> (i32, i32) {
    %c0_i32 = arith.constant 0 : i32
    %c0_i32_0 = arith.constant 0 : i32
    %c0_i32_1 = arith.constant 0 : i32
    return %c0_i32, %c0_i32_0 : i32, i32
  }
  func.func @transform_4(%arg0: i32, %arg1: i32) -> (i32, i32) {
    %c0_i32 = arith.constant 0 : i32
    %c0_i32_0 = arith.constant 0 : i32
    %c0_i32_1 = arith.constant 0 : i32
    return %c0_i32, %c0_i32_0 : i32, i32
  }
  func.func @transform_5(%arg0: i32, %arg1: i32) -> (i32, i32) {
    %c0_i32 = arith.constant 0 : i32
    %c0_i32_0 = arith.constant 0 : i32
    %c0_i32_1 = arith.constant 0 : i32
    return %c0_i32, %c0_i32_0 : i32, i32
  }
  func.func @transform_6(%arg0: i32, %arg1: i32) -> (i32, i32, i32, i32) {
    %c0_i32 = arith.constant 0 : i32
    %c0_i32_0 = arith.constant 0 : i32
    %c0_i32_1 = arith.constant 0 : i32
    return %arg0, %arg1, %c0_i32, %c0_i32_0 : i32, i32, i32, i32
  }
}

</mosaic_0001>

<bundles_post_ra>
// kernel: subnet_forward.1
= control target key start
LH: loop header
LB: loop body
LE: loop exit
PB: predicated region body
PF: predicated region fallthrough
CT: control target
= control target key end

     0   :  { %s3842_s23 = smov 0   ;;  %s3844_s24 = smov 0   ;;  %s6102_s0 = inlined_call_operand.vmem [shape: bf16[2,1,8,1152], index: 0, kind: input, shape index: {}]   ;;  %s6103_s1 = inlined_call_operand.vmem [shape: bf16[64,216], index: 1, kind: input, shape index: {}]   ;;  %s6104_s2 = inlined_call_operand.vmem [shape: f32[64,1], index: 2, kind: input, shape index: {}]   ;;  %s6105_s3 = inlined_call_operand.vmem [shape: f32[64,1], index: 3, kind: input, shape index: {}]   ;;  %s6106_s4 = inlined_call_operand.<no memory space> [shape: f32[1,1], index: 4, kind: input, shape index: {}]   ;;  %s6107_s5 = inlined_call_operand.vmem [shape: f32[4,896], index: 5, kind: input, shape index: {}]   ;;  %s6108_s6 = inlined_call_operand.vmem [shape: f32[2,1,1,896], index: 6, kind: output, shape index: {}]  }
   0x1   :  { %v11_v0 = vstv %s6106_s4  ;;  %s3846_s25 = smov 0  }
   0x2   :  { %12 = vst [vmem:[#allocation4] sm:$0x1] %v11_v0 }
   0x3 LB: > { %s30_s4 = sadd.s32 1, %s3767_s24  ;;  %p3261_p0 = scmp.ge.s32.totalorder %s3771_s25, 1  ;;  %s3771_s25 = sphi %s3846_s25, %s18_s25   ;;  %s3767_s24 = sphi %s3844_s24, %s6430_s24   ;;  %s3763_s23 = sphi %s3842_s23, %s6429_s23  }
   0x4   : > { %p32_p1 = scmp.ge.s32.totalorder %s30_s4, 2  ;;  %p234_p2 = scmp.lt.s32.totalorder %s3771_s25, 3 }
   0x6   : > { %s6432_s4 = smov (%p32_p1, %s30_s4), 0  ;;  %p235_p3 = pnand %p3261_p0, %p234_p2 }
   0x8   : > { %238 = sbr.rel (%p235_p3) target bundleno = 1197 (0x4ad), region = 44 }
   0xd   : > { %p271_p4 = scmp.lt.s32.totalorder %s3763_s23, 1  ;;  %s6173_s30 = smov 127   ;;  %vm6177_vm0 = vcmask 1031168   ;;  %vm485_vm1 = vcmask 949248   ;;  %vm6178_vm2 = vcmask 965632   ;;  %vm447_vm3 = vcmask 957440  }
   0xe   : > { %s3774_s7 = smov 126   ;;  %s6171_s8 = smov 118   ;;  %vm6176_vm4 = vcmask 867328   ;;  %vm561_vm5 = vcmask 875520   ;;  %vm523_vm6 = vcmask 883712   ;;  %vm6168_vm7 = vcmask 228352  }
   0xf   : > { %s6434_s23 = smov (!%p271_p4, %s3763_s23), 1  ;;  %s3776_s9 = smov 117   ;;  %vm6179_vm8 = vcmask 220160   ;;  %vm6189_vm9 = vcmask 64512   ;;  %vm827_vm10 = vcmask 130048   ;;  %vm6165_vm11 = vcmask 138240  }
  0x10   : > { %s3345_s26 = smul.u32 36, %s6434_s23  ;;  %s3777_s10 = smov 116   ;;  %vm6167_vm12 = vcmask 146432   ;;  %vm982_vm13 = vcmask 1043456   ;;  %vm1304_vm14 = vcmask 277504   ;;  %vm713_vm15 = vcmask 211968  }
  0x11   : > { %s3778_s11 = smov 108   ;;  %s3779_s12 = smov 107  }
  0x12   : > { %s3866_s29 = scalar_lea.vmem %s6102_s0, %s3345_s26  ;;  %s3780_s13 = smov 106  }
  0x13   : > { %v3869_v1 = vld [vmem:[%s3866_s29 + $0x10] sm:$0xff]  ;;  %v3872_v2 = vld [vmem:[%s3866_s29] sm:$0xff]  ;;  %v3883_v7 = vld [vmem:[%s3866_s29 + $0x18] sm:$0xff]  ;;  %s6169_s14 = smov 28   ;;  %s3782_s15 = smov 27  }
  0x14   : > { %6212 = vst [vmem:[#allocation5_spill] sm:$0xff] %v3869_v1  ;;  %v6111_v3 = vunpack.c.l.bf16 %v3869_v1  ;;  %v6110_v4 = vunpack.c.h.bf16 %v3869_v1  ;;  %v3877_v5 = vunpack.c.l.bf16 %v3872_v2  ;;  %v3880_v6 = vunpack.c.h.bf16 %v3872_v2  ;;  %v3886_v8 = vld [vmem:[%s3866_s29 + $0x8] sm:$0xff]  ;;  %s3783_s16 = smov 16   ;;  %s3784_s17 = smov 8  }
  0x15   : > { %v6109_v11 = vunpack.c.l.bf16 %v3883_v7  ;;  %v308_v12 = vunpack.c.h.bf16 %v3883_v7  ;;  %v3901_v13 = vunpack.c.l.bf16 %v3886_v8  ;;  %v3904_v14 = vunpack.c.h.bf16 %v3886_v8  ;;  %s3785_s18 = smov 17   ;;  %s3786_s19 = smov 18  }
  0x16   : > { %v3892_v9 = vpack.i.bf16 %v6110_v4, %v6111_v3  ;;  %v3429_v10 = vpack.i.bf16 %v3880_v6, %v3877_v5  ;;  %s3787_s20 = smov 34   ;;  %s3788_s21 = smov 26  }
  0x17   : > { %6213 = vst [vmem:[#allocation6_spill] sm:$0xff] %v3904_v14  ;;  %v3909_v15 = vpack.i.bf16 %v308_v12, %v6109_v11  ;;  %v3434_v16 = vpack.i.bf16 %v3904_v14, %v3901_v13  ;;  %v3949_v21 = vpack.i.bf16 %v3901_v13, %v3880_v6  ;;  %s3789_s22 = smov 36   ;;  %s3790_s26 = smov 35  }
  0x18   : > { %3420 = vrot.lane.b32.xlu1 %v3892_v9, %s6173_s30  ;;  %3430 = vrot.lane.b32.xlu2 %v3429_v10, %s3774_s7  ;;  %s3791_s27 = smov 45   ;;  %s3792_s28 = smov 44  }
  0x19   : > { %3410 = vrot.lane.b32.xlu0 %v3429_v10, %s6173_s30 }
  0x20   : > { %3425 = vrot.lane.b32.xlu1 %v3909_v15, %s6173_s30  ;;  %3435 = vrot.lane.b32.xlu2 %v3434_v16, %s3774_s7 }
  0x21   : > { %3415 = vrot.lane.b32.xlu0 %v3434_v16, %s6173_s30 }
  0x28   : > { %3445 = vrot.lane.b32.xlu1 %v3909_v15, %s3774_s7  ;;  %3450 = vrot.lane.b32.xlu2 %v3429_v10, %s6171_s8 }
  0x29   : > { %3440 = vrot.lane.b32.xlu0 %v3892_v9, %s3774_s7  ;;  %s3793_s7 = smov 54  }
  0x30   : > { %3460 = vrot.lane.b32.xlu1 %v3892_v9, %s6171_s8  ;;  %3465 = vrot.lane.b32.xlu2 %v3909_v15, %s6171_s8 }
  0x31   : > { %3455 = vrot.lane.b32.xlu0 %v3434_v16, %s6171_s8  ;;  %s3801_s8 = smov 10  }
  0x38   : > { %3475 = vrot.lane.b32.xlu1 %v3434_v16, %s3776_s9  ;;  %3480 = vrot.lane.b32.xlu2 %v3892_v9, %s3776_s9 }
  0x39   : > { %3470 = vrot.lane.b32.xlu0 %v3429_v10, %s3776_s9 }
  0x40   : > { %3490 = vrot.lane.b32.xlu1 %v3429_v10, %s3777_s10  ;;  %3495 = vrot.lane.b32.xlu2 %v3434_v16, %s3777_s10 }
  0x41   : > { %3485 = vrot.lane.b32.xlu0 %v3909_v15, %s3776_s9  ;;  %s3794_s9 = smov 46  }
  0x48   : > { %3505 = vrot.lane.b32.xlu1 %v3909_v15, %s3777_s10  ;;  %3510 = vrot.lane.b32.xlu2 %v3429_v10, %s3778_s11 }
  0x49   : > { %3500 = vrot.lane.b32.xlu0 %v3892_v9, %s3777_s10  ;;  %s3795_s10 = smov 56  }
  0x50   : > { %3520 = vrot.lane.b32.xlu1 %v3892_v9, %s3778_s11  ;;  %3525 = vrot.lane.b32.xlu2 %v3909_v15, %s3778_s11 }
  0x51   : > { %3515 = vrot.lane.b32.xlu0 %v3434_v16, %s3778_s11  ;;  %s3796_s11 = smov 55  }
  0x58   : > { %3535 = vrot.lane.b32.xlu1 %v3434_v16, %s3779_s12  ;;  %3540 = vrot.lane.b32.xlu2 %v3892_v9, %s3779_s12 }
  0x59   : > { %3530 = vrot.lane.b32.xlu0 %v3429_v10, %s3779_s12 }
  0x60   : > { %3550 = vrot.lane.b32.xlu1 %v3429_v10, %s3780_s13  ;;  %3555 = vrot.lane.b32.xlu2 %v3434_v16, %s3780_s13 }
  0x61   : > { %3545 = vrot.lane.b32.xlu0 %v3909_v15, %s3779_s12  ;;  %s3797_s12 = smov 7  }
  0x68   : > { %3565 = vrot.lane.b32.xlu1 %v3909_v15, %s3780_s13  ;;  %3570 = vrot.lane.b32.xlu2 %v3429_v10, %s6169_s14 }
  0x69   : > { %3560 = vrot.lane.b32.xlu0 %v3892_v9, %s3780_s13  ;;  %s3798_s13 = smov 6  }
  0x70   : > { %3580 = vrot.lane.b32.xlu1 %v3892_v9, %s6169_s14  ;;  %3585 = vrot.lane.b32.xlu2 %v3909_v15, %s6169_s14 }
  0x71   : > { %3575 = vrot.lane.b32.xlu0 %v3434_v16, %s6169_s14  ;;  %s3802_s14 = smov 1  }
  0x72   : > { %v3940_v17 = vpop.permute.xlu2 %3430 }
  0x78   : > { %3595 = vrot.lane.b32.xlu1 %v3434_v16, %s3782_s15  ;;  %3600 = vrot.lane.b32.xlu2 %v3892_v9, %s3782_s15 }
  0x79   : > { %3590 = vrot.lane.b32.xlu0 %v3429_v10, %s3782_s15 }
  0x7a   : > { %v3943_v18 = vpop.permute.xlu2 %3435 }
  0x7b   : > { %v6112_v19 = vunpack.i.h.bf16 %v3943_v18  ;;  %v6115_v20 = vunpack.i.l.bf16 %v3943_v18 }
  0x7d   : > { %v3956_v22 = vsel %vm6177_vm0, %v6115_v20, %v6112_v19 }
  0x80   : > { %3610 = vrot.lane.b32.xlu1 %v3949_v21, %s3783_s16  ;;  %3615 = vrot.lane.b32.xlu2 %v3949_v21, %s3784_s17 }
  0x81   : > { %3605 = vrot.lane.b32.xlu0 %v3909_v15, %s3782_s15  ;;  %s3800_s15 = smov 100  }
  0x82   : > { %v3963_v23 = vpop.permute.xlu2 %3450 }
  0x88   : > { %3625 = vrot.lane.b32.xlu1 %v3949_v21, %s3785_s18  ;;  %811 = vrot.lane.b32.xlu2 %v3877_v5, %s3783_s16 }
  0x89   : > { %3620 = vrot.lane.b32.xlu0 %v3949_v21, %s3786_s19 }
  0x8a   : > { %v3971_v24 = vpop.permute.xlu1 %3420  ;;  %v3973_v25 = vpop.permute.xlu2 %3465 }
  0x8b   : > { %6214 = vst [vmem:[#allocation7_spill] sm:$0xff] %v3971_v24  ;;  %v3975_v26 = vpop.permute.xlu0 %3410 }
  0x8c   : > { %6215 = vst [vmem:[#allocation8_spill] sm:$0xff] %v3973_v25 }
  0x90   : > { %1289 = vrot.lane.b32.xlu1 %v3872_v2, %s3787_s20  ;;  %1291 = vrot.lane.b32.xlu2 %v3886_v8, %s3787_s20 }
  0x91   : > { %849 = vrot.lane.b32.xlu0 %v3877_v5, %s3784_s17 }
  0x92   : > { %v3983_v27 = vpop.permute.xlu1 %3425  ;;  %v3985_v28 = vpop.permute.xlu2 %3480 }
  0x93   : > { %6216 = vst [vmem:[#allocation9_spill] sm:$0xff] %v3983_v27  ;;  %v3987_v29 = vpop.permute.xlu0 %3415  ;;  %v3483_v53 = vunpack.i.h.bf16 %v3985_v28  ;;  %v3482_v54 = vunpack.i.l.bf16 %v3985_v28 }
  0x95   : > { %v4078_v60 = vsel %vm447_vm3, %v3482_v54, %v3483_v53 }
  0x96   : > { %6222 = vst [vmem:[#allocation15_spill] sm:$0xff] %v4078_v60 }
  0x98   : > { %735 = vrot.lane.b32.xlu1 %v3877_v5, %s3786_s19  ;;  %773 = vrot.lane.b32.xlu2 %v3877_v5, %s3785_s18 }
  0x99   : > { %3630 = vrot.lane.b32.xlu0 %v3949_v21, %s3788_s21 }
  0x9a   : > { %v3995_v30 = vpop.permute.xlu1 %3445  ;;  %v3997_v31 = vpop.permute.xlu2 %3495 }
  0x9b   : > { %6217 = vst [vmem:[#allocation10_spill] sm:$0xff] %v3995_v30  ;;  %v3498_v32 = vunpack.i.h.bf16 %v3997_v31  ;;  %v6118_v33 = vunpack.i.l.bf16 %v3997_v31  ;;  %v4001_v34 = vpop.permute.xlu0 %3440 }
  0x9c   : > { %6218 = vst [vmem:[#allocation11_spill] sm:$0xff] %v4001_v34 }
  0x9d   : > { %v4008_v35 = vsel %vm485_vm1, %v6118_v33, %v3498_v32 }
  0xa0   : > { %1211 = vrot.lane.b32.xlu1 %v3886_v8, %s3789_s22  ;;  %1249 = vrot.lane.b32.xlu2 %v3872_v2, %s3790_s26 }
  0xa1   : > { %1209 = vrot.lane.b32.xlu0 %v3872_v2, %s3789_s22 }
  0xa2   : > { %v4016_v36 = vpop.permute.xlu1 %3460  ;;  %v4018_v37 = vpop.permute.xlu2 %3510 }
  0xa3   : > { %6219 = vst [vmem:[#allocation12_spill] sm:$0xff] %v4016_v36  ;;  %v4020_v38 = vpop.permute.xlu0 %3455  ;;  %v6164_v36 = vunpack.i.h.bf16 %v4018_v37 }
  0xa4   : > { %v6113_v39 = vunpack.i.h.bf16 %v4020_v38  ;;  %v6116_v40 = vunpack.i.l.bf16 %v4020_v38 }
  0xa6   : > { %v4029_v41 = vsel %vm6178_vm2, %v6116_v40, %v6113_v39 }
  0xa8   : > { %697 = vrot.lane.b32.xlu1 %v3877_v5, %s3788_s21  ;;  %1129 = vrot.lane.b32.xlu2 %v3872_v2, %s3791_s27 }
  0xa9   : > { %1251 = vrot.lane.b32.xlu0 %v3886_v8, %s3790_s26 }
  0xaa   : > { %v4039_v43 = vpop.permute.xlu1 %3475  ;;  %v4041_v44 = vpop.permute.xlu2 %3525 }
  0xab   : > { %v3478_v45 = vunpack.i.h.bf16 %v4039_v43  ;;  %v6117_v46 = vunpack.i.l.bf16 %v4039_v43  ;;  %v4045_v47 = vpop.permute.xlu0 %3470 }
  0xad   : > { %v4050_v48 = vsel %vm447_vm3, %v6117_v46, %v3478_v45  ;;  %v4075_v59 = vsel %vm447_vm3, %v3478_v45, %v3482_v54 }
  0xae   : > { %6221 = vst [vmem:[#allocation14_spill] sm:$0xff] %v4075_v59 }
  0xb0   : > { %1169 = vrot.lane.b32.xlu1 %v3872_v2, %s3792_s28  ;;  %1171 = vrot.lane.b32.xlu2 %v3886_v8, %s3792_s28 }
  0xb1   : > { %1131 = vrot.lane.b32.xlu0 %v3886_v8, %s3791_s27 }
  0xb2   : > { %v4060_v50 = vpop.permute.xlu1 %3490  ;;  %v4062_v51 = vpop.permute.xlu2 %3540 }
  0xb3   : > { %v3486_v52 = vpop.permute.xlu0 %3485  ;;  %v3543_v12 = vunpack.i.h.bf16 %v4062_v51 }
  0xb4   : > { %v3488_v55 = vunpack.i.h.bf16 %v3486_v52  ;;  %v3487_v56 = vunpack.i.l.bf16 %v3486_v52 }
  0xb6   : > { %v4091_v52 = vsel %vm447_vm3, %v3483_v53, %v3487_v56  ;;  %v4094_v54 = vsel %vm447_vm3, %v3487_v56, %v3488_v55  ;;  %v3542_v55 = vunpack.i.l.bf16 %v4062_v51 }
  0xb7   : > { %6223 = vst [vmem:[#allocation16_spill] sm:$0xff] %v4091_v52 }
  0xb8   : > { %1051 = vrot.lane.b32.xlu1 %v3886_v8, %s3793_s7  ;;  %1089 = vrot.lane.b32.xlu2 %v3872_v2, %s3794_s9  ;;  %6224 = vst [vmem:[#allocation17_spill] sm:$0xff] %v4094_v54 }
  0xb9   : > { %1049 = vrot.lane.b32.xlu0 %v3872_v2, %s3793_s7 }
  0xba   : > { %v3506_v57 = vpop.permute.xlu1 %3505  ;;  %v4072_v58 = vpop.permute.xlu2 %3555 }
  0xbb   : > { %6220 = vst [vmem:[#allocation13_spill] sm:$0xff] %v4072_v58  ;;  %v3508_v61 = vunpack.i.h.bf16 %v3506_v57  ;;  %v3507_v62 = vunpack.i.l.bf16 %v3506_v57  ;;  %v6114_v63 = vunpack.i.h.bf16 %v4072_v58  ;;  %v6121_v0 = vunpack.i.l.bf16 %v4072_v58  ;;  %v3501_v10 = vpop.permute.xlu0 %3500 }
  0xbc   : > { %v3503_v16 = vunpack.i.h.bf16 %v3501_v10  ;;  %v3502_v28 = vunpack.i.l.bf16 %v3501_v10 }
  0xbd   : > { %v4088_v45 = vsel %vm6176_vm4, %v6121_v0, %v6114_v63  ;;  %v4097_v57 = vsel %vm485_vm1, %v3507_v62, %v3508_v61 }
  0xbe   : > { %6225 = vst [vmem:[#allocation18_spill] sm:$0xff] %v4097_v57  ;;  %v4102_v10 = vsel %vm485_vm1, %v3498_v32, %v3502_v28  ;;  %v4105_v11 = vsel %vm485_vm1, %v3502_v28, %v3503_v16  ;;  %v4108_v4 = vsel %vm485_vm1, %v3503_v16, %v3507_v62  ;;  %v4130_v32 = vsel %vm561_vm5, %v3542_v55, %v3543_v12 }
  0xbf   : > { %6226 = vst [vmem:[#allocation19_spill] sm:$0xff] %v4102_v10 }
  0xc0   : > { %6227 = vst [vmem:[#allocation20_spill] sm:$0xff] %v4105_v11  ;;  %968 = vrot.lane.b32.xlu1 %v3872_v2, %s3795_s10  ;;  %970 = vrot.lane.b32.xlu2 %v3886_v8, %s3795_s10 }
  0xc1   : > { %6228 = vst [vmem:[#allocation21_spill] sm:$0xff] %v4108_v4  ;;  %1091 = vrot.lane.b32.xlu0 %v3886_v8, %s3794_s9 }
  0xc2   : > { %v3521_v51 = vpop.permute.xlu1 %3520  ;;  %v4125_v62 = vpop.permute.xlu2 %3570  ;;  %6229 = vst [vmem:[#allocation22_spill] sm:$0xff] %v4130_v32 }
  0xc3   : > { %v3523_v16 = vunpack.i.h.bf16 %v3521_v51  ;;  %v3522_v28 = vunpack.i.l.bf16 %v3521_v51  ;;  %v4127_v53 = vpop.permute.xlu0 %3515 }
  0xc4   : > { %v3518_v3 = vunpack.i.h.bf16 %v4127_v53  ;;  %v6119_v19 = vunpack.i.l.bf16 %v4127_v53 }
  0xc5   : > { %v4135_v61 = vsel %vm523_vm6, %v3522_v28, %v3523_v16 }
  0xc6   : > { %6230 = vst [vmem:[#allocation23_spill] sm:$0xff] %v4135_v61  ;;  %v4140_v56 = vsel %vm523_vm6, %v6119_v19, %v3518_v3  ;;  %v4164_v20 = vsel %vm523_vm6, %v3518_v3, %v3522_v28  ;;  %v3528_v3 = vunpack.i.h.bf16 %v4041_v44 }
  0xc7   : > { %6232 = vst [vmem:[#allocation25_spill] sm:$0xff] %v4164_v20 }
  0xc8   : > { %1011 = vrot.lane.b32.xlu1 %v3886_v8, %s3796_s11  ;;  %3635 = vrot.lane.b32.xlu2 %v3949_v21, %s3797_s12 }
  0xc9   : > { %1009 = vrot.lane.b32.xlu0 %v3872_v2, %s3796_s11 }
  0xca   : > { %v4150_v39 = vpop.permute.xlu1 %3535  ;;  %v4152_v63 = vpop.permute.xlu2 %3585 }
  0xcb   : > { %6231 = vst [vmem:[#allocation24_spill] sm:$0xff] %v4152_v63  ;;  %v3538_v42 = vunpack.i.h.bf16 %v4150_v39  ;;  %v6120_v49 = vunpack.i.l.bf16 %v4150_v39  ;;  %v4156_v51 = vpop.permute.xlu0 %3530 }
  0xcd   : > { %v4161_v8 = vsel %vm561_vm5, %v6120_v49, %v3538_v42  ;;  %v4167_v2 = vsel %vm561_vm5, %v3538_v42, %v3542_v55  ;;  %v3527_v42 = vunpack.i.l.bf16 %v4041_v44 }
  0xce   : > { %6233 = vst [vmem:[#allocation26_spill] sm:$0xff] %v4167_v2 }
  0xcf   : > { %v4186_v19 = vsel %vm523_vm6, %v3523_v16, %v3527_v42  ;;  %v4192_v0 = vsel %vm523_vm6, %v3527_v42, %v3528_v3 }
  0xd0   : > { %887 = vrot.lane.b32.xlu1 %v3877_v5, %s3797_s12  ;;  %925 = vrot.lane.b32.xlu2 %v3877_v5, %s3798_s13  ;;  %6234 = vst [vmem:[#allocation27_spill] sm:$0xff] %v4186_v19 }
  0xd1   : > { %3640 = vrot.lane.b32.xlu0 %v3949_v21, %s3798_s13  ;;  %6236 = vst [vmem:[#allocation29_spill] sm:$0xff] %v4192_v0 }
  0xd2   : > { %v4181_v55 = vpop.permute.xlu1 %3550  ;;  %v4183_v28 = vpop.permute.xlu2 %3600 }
  0xd3   : > { %v3546_v40 = vpop.permute.xlu0 %3545 }
  0xd4   : > { %v3548_v46 = vunpack.i.h.bf16 %v3546_v40  ;;  %v3547_v33 = vunpack.i.l.bf16 %v3546_v40 }
  0xd6   : > { %v4189_v49 = vsel %vm561_vm5, %v3543_v12, %v3547_v33  ;;  %v4195_v21 = vsel %vm561_vm5, %v3547_v33, %v3548_v46 }
  0xd7   : > { %6235 = vst [vmem:[#allocation28_spill] sm:$0xff] %v4189_v49 }
  0xd8   : > { %6237 = vst [vmem:[#allocation30_spill] sm:$0xff] %v4195_v21  ;;  %817 = vrot.lane.b32.xlu1 %v3904_v14, %s3783_s16  ;;  %855 = vrot.lane.b32.xlu2 %v3904_v14, %s3784_s17 }
  0xd9   : > { %1293 = vrot.lane.b32.xlu0 %v3869_v1, %s3787_s20 }
  0xda   : > { %v4207_v40 = vpop.permute.xlu1 %3565  ;;  %v4209_v12 = vpop.permute.xlu2 %3615 }
  0xdb   : > { %6238 = vst [vmem:[#allocation31_spill] sm:$0xff] %v4207_v40  ;;  %v4211_v33 = vpop.permute.xlu0 %3560  ;;  %v3617_v21 = vunpack.i.l.bf16 %v4209_v12  ;;  %v6243_v30 = vunpack.i.h.bf16 %v4209_v12 }
  0xdc   : > { %6239 = vst [vmem:[#allocation32_spill] sm:$0xff] %v4211_v33  ;;  %v3572_v33 = vunpack.i.l.bf16 %v4125_v62 }
  0xdd   : > { %v867_v25 = vsel %vm6189_vm9, %v3617_v21, %v6243_v30 }
  0xe0   : > { %1253 = vrot.lane.b32.xlu1 %v3869_v1, %s3790_s26  ;;  %741 = vrot.lane.b32.xlu2 %v3904_v14, %s3786_s19 }
  0xe1   : > { %1213 = vrot.lane.b32.xlu0 %v3869_v1, %s3789_s22 }
  0xe2   : > { %v4219_v46 = vpop.permute.xlu1 %3580  ;;  %v812_v16 = vpop.permute.xlu2 %811 }
  0xe3   : > { %v4221_v3 = vpop.permute.xlu0 %3575 }
  0xe4   : > { %6240 = vst [vmem:[#allocation33_spill] sm:$0xff] %v4221_v3  ;;  %v6126_v42 = vunpack.i.h.bf16 %v4221_v3  ;;  %v6127_v54 = vunpack.i.l.bf16 %v4221_v3 }
  0xe6   : > { %v4230_v44 = vsel %vm6168_vm7, %v6127_v54, %v6126_v42 }
  0xe8   : > { %1133 = vrot.lane.b32.xlu1 %v3869_v1, %s3791_s27  ;;  %1173 = vrot.lane.b32.xlu2 %v3869_v1, %s3792_s28 }
  0xe9   : > { %779 = vrot.lane.b32.xlu0 %v3904_v14, %s3785_s18 }
  0xea   : > { %v4240_v52 = vpop.permute.xlu1 %3595  ;;  %v4242_v4 = vpop.permute.xlu2 %1291 }
  0xeb   : > { %6241 = vst [vmem:[#allocation34_spill] sm:$0xff] %v4240_v52  ;;  %v6133_v42 = vunpack.i.h.bf16 %v4240_v52  ;;  %v6134_v54 = vunpack.i.l.bf16 %v4240_v52  ;;  %v4246_v27 = vpop.permute.xlu0 %3590  ;;  %v6155_v10 = vrot.slane %v4242_v4, 4 }
  0xed   : > { %v4253_v57 = vsel %vm6179_vm8, %v6134_v54, %v6133_v42 }
  0xf0   : > { %1053 = vrot.lane.b32.xlu1 %v3869_v1, %s3793_s7  ;;  %1093 = vrot.lane.b32.xlu2 %v3869_v1, %s3794_s9 }
  0xf1   : > { %703 = vrot.lane.b32.xlu0 %v3904_v14, %s3788_s21 }
  0xf2   : > { %v4263_v19 = vpop.permute.xlu1 %3610  ;;  %v774_v49 = vpop.permute.xlu2 %773 }
  0xf3   : > { %v6141_v42 = vunpack.i.h.bf16 %v4263_v19  ;;  %v3612_v54 = vunpack.i.l.bf16 %v4263_v19  ;;  %v4267_v0 = vpop.permute.xlu0 %3605 }
  0xf4   : > { %6242 = vst [vmem:[#allocation35_spill] sm:$0xff] %v4267_v0 }
  0xf5   : > { %v829_v40 = vsel %vm827_vm10, %v3612_v54, %v6141_v42 }
  0xf6   : > { %v1568_v63 = vpack.c.bf16 %v867_v25, %v829_v40 }
  0xf8   : > { %1013 = vrot.lane.b32.xlu1 %v3869_v1, %s3796_s11  ;;  %893 = vrot.lane.b32.xlu2 %v3904_v14, %s3797_s12 }
  0xf9   : > { %1801 = vmatpush.bf16.msra.mxu2 %v1568_v63  ;;  %972 = vrot.lane.b32.xlu0 %v3869_v1, %s3795_s10 }
  0xfa   : > { %v4281_v0 = vpop.permute.xlu1 %3625  ;;  %v4283_v60 = vpop.permute.xlu2 %1249 }
  0xfb   : > { %v6149_v30 = vunpack.i.h.bf16 %v4281_v0  ;;  %v3627_v42 = vunpack.i.l.bf16 %v4281_v0  ;;  %v4287_v25 = vpop.permute.xlu0 %3620 }
  0xfc   : > { %v6151_v40 = vunpack.i.h.bf16 %v4287_v25  ;;  %v3622_v11 = vunpack.i.l.bf16 %v4287_v25 }
  0xfd   : > { %v791_v63 = vsel %vm6165_vm11, %v3627_v42, %v6149_v30 }
  0xfe   : > { %v753_v1 = vsel %vm6167_vm12, %v3622_v11, %v6151_v40 }
  0xff   : > { %v1561_v59 = vpack.c.bf16 %v791_v63, %v753_v1  ;;  %v828_v1 = vsel %vm827_vm10, %v812_v16, %v3612_v54 }
 0x100   : > { %3645 = vrot.lane.b32.xlu1 %v3892_v9, %s3783_s16  ;;  %3650 = vrot.lane.b32.xlu2 %v3892_v9, %s3784_s17 }
 0x101   : > { %931 = vrot.lane.b32.xlu0 %v3904_v14, %s3798_s13  ;;  %1802 = vmatpush.bf16.msra.mxu2 %v1561_v59 }
 0x102   : > { %v1290_v24 = vpop.permute.xlu1 %1289  ;;  %v4304_v61 = vpop.permute.xlu2 %1129 }
 0x103   : > { %v1299_v30 = vrot.slane %v1290_v24, 4  ;;  %v850_v32 = vpop.permute.xlu0 %849 }
 0x104   : > { %v866_v63 = vsel %vm6189_vm9, %v850_v32, %v3617_v21  ;;  %v6157_v32 = vunpack.i.h.bf16 %v4246_v27 }
 0x105   : > { %v1567_v40 = vpack.c.bf16 %v866_v63, %v828_v1  ;;  %v1303_v34 = vsel %vm982_vm13, %v1299_v30, %v6155_v10  ;;  %v790_v1 = vsel %vm6165_vm11, %v774_v49, %v3627_v42  ;;  %v3533_v10 = vunpack.i.h.bf16 %v4156_v51 }
 0x106   : > { %v1305_v14 = vsel %vm1304_vm14, %v1303_v34, %v4242_v4  ;;  %vm6187_vm11 = vcmask 293888  }
 0x107   : > { %1743 = vmatpush.bf16.msra.mxu0 %v1567_v40  ;;  %v1315_v59 = vunpack.c.l.bf16 %v1305_v14  ;;  %v1316_v20 = vunpack.c.h.bf16 %v1305_v14 }
 0x108   : > { %3655 = vrot.lane.b32.xlu1 %v3892_v9, %s3786_s19  ;;  %3660 = vrot.lane.b32.xlu2 %v3892_v9, %s3785_s18 }
 0x109   : > { %1295 = vrot.lane.b32.xlu0 %v3883_v7, %s3787_s20  ;;  %v1609_v24 = vpack.c.bf16 %v1315_v59, %v1315_v59  ;;  %v1610_v54 = vpack.c.bf16 %v1316_v20, %v1316_v20 }
 0x10a   : > { %v736_v21 = vpop.permute.xlu1 %735  ;;  %v4320_v16 = vpop.permute.xlu2 %1171 }
 0x10b   : > { %v752_v34 = vsel %vm6167_vm12, %v736_v21, %v3622_v11  ;;  %v4323_v14 = vpop.permute.xlu0 %3630  ;;  %v4326_v30 = vsel %vm982_vm13, %v1609_v24, 0  ;;  %v4329_v40 = vsel %vm982_vm13, %v1610_v54, 0  ;;  %v3573_v11 = vunpack.i.h.bf16 %v4125_v62 }
 0x10c   : > { %v6156_v20 = vunpack.i.h.bf16 %v4323_v14  ;;  %v3632_v63 = vunpack.i.l.bf16 %v4323_v14  ;;  %3333 = vmatpush.bf16.msra.mxu1 %v4326_v30  ;;  %3339 = vmatpush.bf16.msra.mxu3 %v4329_v40  ;;  %v1560_v59 = vpack.c.bf16 %v790_v1, %v752_v34  ;;  %v3553_v21 = vunpack.i.h.bf16 %v4181_v55 }
 0x10d   : > { %v6244_v24 = vunpack.i.l.bf16 %v4240_v52  ;;  %v6245_v34 = vunpack.i.l.bf16 %v4221_v3  ;;  %v6166_v52 = vunpack.i.h.bf16 %v4045_v47  ;;  %vm6188_vm12 = vcmask 285696  }
 0x10e   : > { %1744 = vmatpush.bf16.msra.mxu0 %v1560_v59  ;;  %v715_v42 = vsel %vm713_vm15, %v3632_v63, %v6156_v20  ;;  %v6248_v20 = vunpack.i.l.bf16 %v4127_v53 }
 0x10f   : > { %v677_v49 = vsel %vm6179_vm8, %v6157_v32, %v6244_v24  ;;  %v639_v1 = vsel %vm6168_vm7, %v3573_v11, %v6245_v34  ;;  %v6247_v34 = vunpack.i.l.bf16 %v4150_v39  ;;  %v3552_v39 = vunpack.i.l.bf16 %v4181_v55 }
 0x110   : > { %v1554_v54 = vpack.c.bf16 %v715_v42, %v677_v49  ;;  %1255 = vrot.lane.b32.xlu1 %v3883_v7, %s3790_s26  ;;  %3665 = vrot.lane.b32.xlu2 %v3892_v9, %s3788_s21  ;;  %v6246_v49 = vunpack.i.l.bf16 %v4072_v58  ;;  %v3532_v55 = vunpack.i.l.bf16 %v4156_v51  ;;  %v6255_v58 = vunpack.i.h.bf16 %v4246_v27 }
 0x111   : > { %1215 = vrot.lane.b32.xlu0 %v3883_v7, %s3789_s22  ;;  %v563_v3 = vsel %vm561_vm5, %v3533_v10, %v6247_v34  ;;  %v3512_v51 = vunpack.i.l.bf16 %v4018_v37 }
 0x112   : > { %1803 = vmatpush.bf16.msra.mxu2 %v1554_v54  ;;  %v4356_v59 = vpop.permute.xlu1 %1211  ;;  %v4358_v24 = vpop.permute.xlu2 %1089  ;;  %v601_v42 = vsel %vm6176_vm4, %v3553_v21, %v6246_v49  ;;  %v6249_v54 = vunpack.i.l.bf16 %v3997_v31  ;;  %v6251_v31 = vunpack.i.l.bf16 %v4039_v43  ;;  %v638_v43 = vsel %vm6168_vm7, %v3572_v33, %v3573_v11 }
 0x113   : > { %v1210_v32 = vpop.permute.xlu0 %1209  ;;  %v1547_v2 = vpack.c.bf16 %v639_v1, %v601_v42  ;;  %v525_v1 = vsel %vm523_vm6, %v6164_v36, %v6248_v20  ;;  %v3592_v42 = vunpack.i.l.bf16 %v4246_v27  ;;  %v6253_v20 = vunpack.i.h.bf16 %v3963_v23 }
 0x114   : > { %v1219_v49 = vrot.slane %v1210_v32, 4  ;;  %v1540_v34 = vpack.c.bf16 %v563_v3, %v525_v1  ;;  %v449_v3 = vsel %vm447_vm3, %v6166_v52, %v6251_v31  ;;  %v6252_v32 = vunpack.i.l.bf16 %v4020_v38 }
 0x115   : > { %v6254_v1 = vrot.slane %v4356_v59, 4  ;;  %vm6180_vm7 = vcmask 1039360   ;;  %v6258_v11 = vunpack.i.l.bf16 %v3987_v29 }
 0x116   : > { %1804 = vmatpush.bf16.msra.mxu2 %v1547_v2  ;;  %v6250_v2 = vunpack.i.h.bf16 %v4060_v50 }
 0x118   : > { %v487_v62 = vsel %vm485_vm1, %v6250_v2, %v6249_v54  ;;  %1175 = vrot.lane.b32.xlu1 %v3883_v7, %s3792_s28  ;;  %1055 = vrot.lane.b32.xlu2 %v3883_v7, %s3793_s7  ;;  %v411_v54 = vsel %vm6178_vm2, %v6253_v20, %v6252_v32  ;;  %v1223_v2 = vsel %vm982_vm13, %v1219_v49, %v6254_v1  ;;  %v1259_v49 = vrot.slane %v4283_v60, 4 }
 0x119   : > { %1135 = vrot.lane.b32.xlu0 %v3883_v7, %s3791_s27  ;;  %v676_v32 = vsel %vm6179_vm8, %v3592_v42, %v6255_v58  ;;  %v600_v20 = vsel %vm6176_vm4, %v3552_v39, %v3553_v21  ;;  %v6256_v58 = vunpack.i.l.bf16 %v3943_v18  ;;  %v6257_v60 = vunpack.i.h.bf16 %v3940_v17 }
 0x11a   : > { %1805 = vmatpush.bf16.msra.mxu2 %v1540_v34  ;;  %v698_v36 = vpop.permute.xlu1 %697  ;;  %v4406_v53 = vpop.permute.xlu2 %970  ;;  %v1533_v34 = vpack.c.bf16 %v487_v62, %v449_v3  ;;  %v6259_v21 = vunpack.i.h.bf16 %v3975_v26  ;;  %vm1144_vm4 = vcmask 367616   ;;  %vm941_vm8 = vcmask 48128  }
 0x11b   : > { %v714_v31 = vsel %vm713_vm15, %v698_v36, %v3632_v63  ;;  %v4411_v52 = vpop.permute.xlu0 %1251  ;;  %v1225_v36 = vsel %vm6187_vm11, %v1223_v2, %v4356_v59  ;;  %v373_v63 = vsel %vm6177_vm0, %v6257_v60, %v6256_v58  ;;  %v1546_v2 = vpack.c.bf16 %v638_v43, %v600_v20 }
 0x11c   : > { %v6175_v62 = vrot.slane %v4411_v52, 4  ;;  %v1553_v3 = vpack.c.bf16 %v714_v31, %v676_v32  ;;  %v335_v39 = vsel %vm6180_vm7, %v6259_v21, %v6258_v11  ;;  %v1526_v1 = vpack.c.bf16 %v411_v54, %v373_v63  ;;  %v3326_v54 = vld [vmem:[%s6103_s1 + $0x4] sm:$0xf0] }
 0x11d   : > { %v3452_v58 = vunpack.i.l.bf16 %v3963_v23  ;;  %v3492_v60 = vunpack.i.l.bf16 %v4060_v50  ;;  %v3472_v43 = vunpack.i.l.bf16 %v4045_v47  ;;  %v6260_v21 = vunpack.i.h.bf16 %v4018_v37 }
 0x11e   : > { %1806 = vmatpush.bf16.msra.mxu2 %v1533_v34  ;;  %v1263_v27 = vsel %vm982_vm13, %v1259_v49, %v6175_v62  ;;  %1745 = vmatpush.bf16.msra.mxu0 %v1553_v3  ;;  %v562_v34 = vsel %vm561_vm5, %v3532_v55, %v3533_v10  ;;  %v1235_v49 = vunpack.c.l.bf16 %v1225_v36  ;;  %v1236_v3 = vunpack.c.h.bf16 %v1225_v36  ;;  %v3265_v55 = vld [vmem:[%s6103_s1] sm:$0xf] }
 0x11f   : > { %v1265_v42 = vsel %vm6188_vm12, %v1263_v27, %v4411_v52  ;;  %v1180_v27 = vrot.slane %v4320_v16, 4  ;;  %v1519_v10 = vpack.c.bf16 %v335_v39, %v3880_v6  ;;  %v524_v6 = vsel %vm523_vm6, %v3512_v51, %v6260_v21 }
 0x120   : > { %v1275_v31 = vunpack.c.l.bf16 %v1265_v42  ;;  %v1276_v32 = vunpack.c.h.bf16 %v1265_v42  ;;  %974 = vrot.lane.b32.xlu1 %v3883_v7, %s3795_s10  ;;  %1015 = vrot.lane.b32.xlu2 %v3883_v7, %s3796_s11  ;;  %v1139_v39 = vrot.slane %v4304_v61, 4  ;;  %v1539_v62 = vpack.c.bf16 %v562_v34, %v524_v6 }
 0x121   : > { %1095 = vrot.lane.b32.xlu0 %v3883_v7, %s3794_s9  ;;  %vm1184_vm5 = vcmask 359424   ;;  %v6261_v61 = vunpack.i.h.bf16 %v4060_v50  ;;  %vm984_vm6 = vcmask 457728  }
 0x122   : > { %1807 = vmatpush.bf16.msra.mxu2 %v1526_v1  ;;  %v1170_v20 = vpop.permute.xlu1 %1169  ;;  %v4456_v36 = vpop.permute.xlu2 %3635  ;;  %1746 = vmatpush.bf16.msra.mxu0 %v1546_v2  ;;  %v4458_v63 = vpack.c.bf16 %v1275_v31, %v1235_v49  ;;  %v1603_v11 = vpack.c.bf16 %v1276_v32, %v1236_v3  ;;  %v4468_v2 = vor.u32 %v3326_v54, %v3265_v55  ;;  %v6262_v49 = vunpack.i.h.bf16 %v4045_v47 }
 0x123   : > { %v1179_v42 = vrot.slane %v1170_v20, 4  ;;  %v4464_v1 = vpop.permute.xlu0 %1131  ;;  %v486_v51 = vsel %vm485_vm1, %v3492_v60, %v6261_v61  ;;  %v3412_v60 = vunpack.i.l.bf16 %v3975_v26  ;;  %v6263_v47 = vunpack.i.h.bf16 %v3940_v17 }
 0x124   : > { %v1140_v33 = vrot.slane %v4464_v1, 4  ;;  %3334 = vmatpush.bf16.msra.mxu1 %v4458_v63  ;;  %3340 = vmatpush.bf16.msra.mxu3 %v1603_v11  ;;  %v448_v3 = vsel %vm447_vm3, %v3472_v43, %v6262_v49  ;;  %v6265_v20 = vunpack.i.h.bf16 %v3963_v23  ;;  %vm1064_vm1 = vcmask 441344  }
 0x125   : > { %v1183_v37 = vsel %vm982_vm13, %v1179_v42, %v1180_v27  ;;  %vm1104_vm3 = vcmask 375808  }
 0x126   : > { %1808 = vmatpush.bf16.msra.mxu2 %v1519_v10  ;;  %v1143_v34 = vsel %vm982_vm13, %v1139_v39, %v1140_v33  ;;  %1747 = vmatpush.bf16.msra.mxu0 %v1539_v62  ;;  %v1185_v31 = vsel %vm1184_vm5, %v1183_v37, %v4320_v16  ;;  %v6264_v62 = vunpack.i.l.bf16 %v3940_v17  ;;  %v410_v21 = vsel %vm6178_vm2, %v3452_v58, %v6265_v20  ;;  %v4512_v58 = vld [vmem:[%s3866_s29 + $0x20] sm:$0xf] }
 0x127   : > { %v1145_v32 = vsel %vm1144_vm4, %v1143_v34, %v4464_v1  ;;  %v1195_v50 = vunpack.c.l.bf16 %v1185_v31  ;;  %v1196_v10 = vunpack.c.h.bf16 %v1185_v31  ;;  %v6266_v17 = vunpack.i.h.bf16 %v3975_v26  ;;  %v3273_v26 = vld [vmem:[%s6103_s1 + $0x10] sm:$0xf]  ;;  %v1629_v1 = vld [vmem:[%s6104_s2 + $0x28] sm:$0xff] }
 0x128   : > { %v1155_v55 = vunpack.c.l.bf16 %v1145_v32  ;;  %v1156_v54 = vunpack.c.h.bf16 %v1145_v32  ;;  %3675 = vrot.lane.b32.xlu1 %v3892_v9, %s3798_s13  ;;  %3680 = vrot.lane.b32.xlu2 %v3909_v15, %s3783_s16  ;;  %v372_v43 = vsel %vm6177_vm0, %v6264_v62, %v6263_v47  ;;  %v3328_v32 = vld [vmem:[%s6103_s1 + $0x14] sm:$0xf0]  ;;  %vm1024_vm0 = vcmask 449536  }
 0x129   : > { %1809 = vmatmul.bf16.vlgmr.msra.gmra.mxu2 %v4468_v2  ;;  %3670 = vrot.lane.b32.xlu0 %v3892_v9, %s3797_s12  ;;  %v1525_v61 = vpack.c.bf16 %v410_v21, %v372_v43  ;;  %vm903_vm2 = vcmask 56320  }
 0x12a   : > { %1832 = vmatpush.bf16.msrb.mxu2 %v4329_v40  ;;  %v1532_v40 = vpack.c.bf16 %v486_v51, %v448_v3  ;;  %v4503_v6 = vpop.permute.xlu1 %1051  ;;  %v4505_v39 = vpop.permute.xlu2 %925  ;;  %v1595_v42 = vpack.c.bf16 %v1195_v50, %v1155_v55  ;;  %v1596_v37 = vpack.c.bf16 %v1196_v10, %v1156_v54  ;;  %v334_v51 = vsel %vm6180_vm7, %v3412_v60, %v6266_v17 }
 0x12b   : > { %v1050_v9 = vpop.permute.xlu0 %1049  ;;  %v1060_v23 = vrot.slane %v4503_v6, 4  ;;  %v1099_v3 = vrot.slane %v4358_v24, 4  ;;  %v4537_v60 = vor.u32 %v3328_v32, %v3273_v26  ;;  %v6186_v54 = vrot.slane %v4406_v53, 4 }
 0x12c   : > { %1748 = vmatpush.bf16.msra.mxu0 %v1532_v40  ;;  %3335 = vmatpush.bf16.msra.mxu1 %v1595_v42  ;;  %v1059_v34 = vrot.slane %v1050_v9, 4  ;;  %v3799_v17 = vmov 0   ;;  %vm1708_vm7 = vcmask 719872  }
 0x12d   : > { %3341 = vmatpush.bf16.msra.mxu3 %v1596_v37  ;;  %3715 = vset.pattern.permute.xlu1 %v3799_v17 }
 0x12e   : > { %1833 = vmatpush.bf16.msrb.mxu2 %v1603_v11  ;;  %v1518_v11 = vpack.c.bf16 %v334_v51, %v3877_v5  ;;  %v1063_v31 = vsel %vm982_vm13, %v1059_v34, %v1060_v23  ;;  %3714 = vset.pattern.permute.xlu0 %v3799_v17 }
 0x12f   : > { %v1065_v55 = vsel %vm1064_vm1, %v1063_v31, %v4503_v6  ;;  %3716 = vset.pattern.permute.xlu2 %v3799_v17 }
 0x130   : > { %1749 = vmatpush.bf16.msra.mxu0 %v1525_v61  ;;  %1297 = vrot.lane.b32.xlu1 %v4512_v58, %s3787_s20  ;;  %v1076_v20 = vunpack.c.h.bf16 %v1065_v55  ;;  %s6394_s20 = smov 127  }
 0x131   : > { %3690 = vrot.lane.b32.xlu2 %v3909_v15, %s3786_s19  ;;  %3685 = vrot.lane.b32.xlu0 %v3909_v15, %s3784_s17 }
 0x132   : > { %1834 = vmatpush.bf16.msrb.mxu2 %v1596_v37  ;;  %v969_v5 = vpop.permute.xlu1 %968  ;;  %v4530_v49 = vpop.permute.xlu2 %855 }
 0x133   : > { %v4533_v50 = vpop.permute.xlu0 %1091  ;;  %v978_v40 = vrot.slane %v969_v5, 4 }
 0x134   : > { %1750 = vmatpush.bf16.msra.mxu0 %v1518_v11  ;;  %v1100_v10 = vrot.slane %v4533_v50, 4 }
 0x135   : > { %v983_v21 = vsel %vm982_vm13, %v978_v40, %v6186_v54  ;;  %v3281_v40 = vld [vmem:[%s6103_s1 + $0x20] sm:$0xf]  ;;  %v6272_v54 = vunpack.i.h.bf16 %v4287_v25 }
 0x136   : > { %v1103_v24 = vsel %vm982_vm13, %v1099_v3, %v1100_v10  ;;  %v985_v31 = vsel %vm984_vm6, %v983_v21, %v4406_v53 }
 0x137   : > { %1751 = vmatmul.bf16.vlgmr.msra.gmra.mxu0 %v4468_v2  ;;  %v1105_v47 = vsel %vm1104_vm3, %v1103_v24, %v4533_v50  ;;  %v996_v3 = vunpack.c.h.bf16 %v985_v31  ;;  %v3330_v24 = vld [vmem:[%s6103_s1 + $0x24] sm:$0xf0] }
 0x138   : > { %1774 = vmatpush.bf16.msrb.mxu0 %v4326_v30  ;;  %v1075_v30 = vunpack.c.l.bf16 %v1065_v55  ;;  %v1115_v62 = vunpack.c.l.bf16 %v1105_v47  ;;  %v1116_v43 = vunpack.c.h.bf16 %v1105_v47  ;;  %3700 = vrot.lane.b32.xlu1 %v3909_v15, %s3788_s21  ;;  %v6185_v47 = vunpack.i.h.bf16 %v4456_v36  ;;  %s6395_s21 = smov 118  }
 0x139   : > { %1814 = vmatmul.bf16.gmra.mxu2 %v4537_v60  ;;  %1217 = vrot.lane.b32.xlu2 %v4512_v58, %s3789_s22  ;;  %s6396_s22 = smov 28  }
 0x13a   : > { %3695 = vrot.lane.b32.xlu0 %v3909_v15, %s3785_s18  ;;  %v4561_v37 = vpop.permute.xlu2 %741  ;;  %v1588_v9 = vpack.c.bf16 %v1115_v62, %v1075_v30  ;;  %v1589_v61 = vpack.c.bf16 %v1116_v43, %v1076_v20  ;;  %v3637_v30 = vunpack.i.l.bf16 %v4456_v36 }
 0x13b   : > { %v1010_v34 = vpop.permute.xlu0 %1009 }
 0x13c   : > { %1775 = vmatpush.bf16.msrb.mxu0 %v4458_v63  ;;  %v4559_v63 = vpop.permute.xlu1 %1011  ;;  %v1019_v11 = vrot.slane %v1010_v34, 4  ;;  %3336 = vmatpush.bf16.msra.mxu1 %v1588_v9  ;;  %v4591_v34 = vor.u32 %v3330_v24, %v3281_v40 }
 0x13d   : > { %v1020_v51 = vrot.slane %v4559_v63, 4  ;;  %1835 = vmatpush.bf16.msrb.mxu2 %v1589_v61  ;;  %3342 = vmatpush.bf16.msra.mxu3 %v1589_v61 }
 0x13f   : > { %v1023_v26 = vsel %vm982_vm13, %v1019_v11, %v1020_v51 }
 0x140   : > { %1776 = vmatpush.bf16.msrb.mxu0 %v1595_v42  ;;  %v1025_v32 = vsel %vm1024_vm0, %v1023_v26, %v4559_v63  ;;  %1137 = vrot.lane.b32.xlu1 %v4512_v58, %s3791_s27  ;;  %v995_v42 = vunpack.c.l.bf16 %v985_v31  ;;  %v905_v26 = vsel %vm903_vm2, %v3637_v30, %v6185_v47 }
 0x141   : > { %v1035_v5 = vunpack.c.l.bf16 %v1025_v32  ;;  %v1036_v55 = vunpack.c.h.bf16 %v1025_v32  ;;  %1177 = vrot.lane.b32.xlu2 %v4512_v58, %s3792_s28 }
 0x142   : > { %1257 = vrot.lane.b32.xlu0 %v4512_v58, %s3790_s26  ;;  %v4585_v43 = vpop.permute.xlu2 %1173  ;;  %s3803_s26 = smov 68  }
 0x143   : > { %v1581_v20 = vpack.c.bf16 %v1035_v5, %v995_v42  ;;  %v1582_v21 = vpack.c.bf16 %v1036_v55, %v996_v3  ;;  %v3329_v3 = vld [vmem:[%s6103_s1 + $0x24] sm:$0xf]  ;;  %v3283_v55 = vld [vmem:[%s6103_s1 + $0x28] sm:$0xf0] }
 0x144   : > { %1777 = vmatpush.bf16.msrb.mxu0 %v1588_v9  ;;  %v888_v62 = vpop.permute.xlu1 %887  ;;  %v4587_v9 = vpop.permute.xlu0 %3640  ;;  %v4618_v24 = vor.u32 %v3329_v3, %v3283_v55 }
 0x145   : > { %v6184_v61 = vunpack.i.h.bf16 %v4587_v9  ;;  %v3642_v17 = vunpack.i.l.bf16 %v4587_v9  ;;  %3337 = vmatpush.bf16.msra.mxu1 %v1581_v20  ;;  %1836 = vmatpush.bf16.msrb.mxu2 %v1582_v21  ;;  %v904_v11 = vsel %vm903_vm2, %v888_v62, %v3637_v30  ;;  %v6267_v30 = vunpack.i.h.bf16 %v4209_v12 }
 0x146   : > { %3343 = vmatpush.bf16.msra.mxu3 %v1582_v21  ;;  %v6269_v12 = vrot.slane %v4242_v4, 4  ;;  %v3289_v4 = vld [vmem:[%s6103_s1 + $0x30] sm:$0xf] }
 0x147   : > { %1756 = vmatmul.bf16.gmra.mxu0 %v4537_v60  ;;  %v942_v31 = vsel %vm941_vm8, %v4505_v39, %v3642_v17  ;;  %v943_v32 = vsel %vm941_vm8, %v3642_v17, %v6184_v61  ;;  %v868_v62 = vsel %vm6189_vm9, %v6267_v30, %v4530_v49 }
 0x148   : > { %1778 = vmatpush.bf16.msrb.mxu0 %v1581_v20  ;;  %v1574_v42 = vpack.c.bf16 %v942_v31, %v904_v11  ;;  %v1575_v5 = vpack.c.bf16 %v943_v32, %v905_v26  ;;  %1097 = vrot.lane.b32.xlu1 %v4512_v58, %s3794_s9  ;;  %v6268_v20 = vunpack.i.h.bf16 %v4263_v19 }
 0x149   : > { %1819 = vmatmul.bf16.gmra.mxu2 %v4591_v34  ;;  %976 = vrot.lane.b32.xlu2 %v4512_v58, %s3795_s10 }
 0x14a   : > { %1057 = vrot.lane.b32.xlu0 %v4512_v58, %s3793_s7  ;;  %3338 = vmatpush.bf16.msra.mxu1 %v1574_v42  ;;  %v4616_v40 = vpop.permute.xlu2 %1093 }
 0x14b   : > { %1837 = vmatpush.bf16.msrb.mxu2 %v1575_v5  ;;  %3344 = vmatpush.bf16.msra.mxu3 %v1575_v5  ;;  %v3332_v5 = vld [vmem:[%s6103_s1 + $0x34] sm:$0xf0] }
 0x14c   : > { %1779 = vmatpush.bf16.msrb.mxu0 %v1574_v42  ;;  %v4614_v39 = vpop.permute.xlu1 %817  ;;  %v4628_v17 = vpop.permute.xlu0 %1293 }
 0x14d   : > { %v830_v21 = vsel %vm827_vm10, %v6268_v20, %v4614_v39  ;;  %v6183_v11 = vrot.slane %v4628_v17, 4  ;;  %3297 = vmatmul.msk.bf16.vlgmr.msra.gmra.mxu1 %vm1708_vm7, %v4618_v24 }
 0x14e   : > { %v1569_v31 = vpack.c.bf16 %v868_v62, %v830_v21  ;;  %3301 = vmatmul.msk.bf16.vlgmr.msra.gmra.mxu3 %vm1708_vm7, %v4618_v24 }
 0x14f   : > { %v1306_v19 = vsel %vm982_vm13, %v6269_v12, %v6183_v11 }
 0x150   : > { %1859 = vmatpush.bf16.msrb.mxu1 %v1569_v31  ;;  %v1307_v26 = vsel %vm1304_vm14, %v1306_v19, %v4628_v17  ;;  %3705 = vrot.lane.b32.xlu1 %v3909_v15, %s3797_s12  ;;  %v4666_v19 = vor.u32 %v3332_v5, %v3289_v4  ;;  %v6271_v4 = vrot.slane %v4356_v59, 4  ;;  %v3291_v59 = vld [vmem:[%s6103_s1 + $0x38] sm:$0xf0] }
 0x151   : > { %v1317_v32 = vunpack.c.l.bf16 %v1307_v26  ;;  %v1318_v42 = vunpack.c.h.bf16 %v1307_v26  ;;  %3710 = vrot.lane.b32.xlu2 %v3909_v15, %s3798_s13  ;;  %v1181_v26 = vrot.slane %v4585_v43, 4  ;;  %v1625_v15 = vld [vmem:[%s6104_s2 + $0x8] sm:$0xff] }
 0x152   : > { %1017 = vrot.lane.b32.xlu0 %v4512_v58, %s3796_s11  ;;  %v4656_v30 = vpop.permute.xlu2 %893 }
 0x153   : > { %v1612_v3 = vpack.c.bf16 %v1318_v42, %v1318_v42  ;;  %v1611_v62 = vpack.c.bf16 %v1317_v32, %v1317_v32  ;;  %v6270_v32 = vrot.slane %v4411_v52, 4  ;;  %v1624_v52 = vld [vmem:[%s6104_s2] sm:$0xff] }
 0x154   : > { %v4654_v55 = vpop.permute.xlu1 %1253  ;;  %v4659_v21 = vpop.permute.xlu0 %1213 }
 0x155   : > { %v6182_v20 = vrot.slane %v4654_v55, 4  ;;  %v6181_v58 = vrot.slane %v4659_v21, 4  ;;  %v1729_v31 = vsel %vm982_vm13, %v1611_v62, 0  ;;  %v1732_v12 = vsel %vm982_vm13, %v1612_v3, 0 }
 0x156   : > { %1890 = vmatpush.bf16.msrb.mxu3 %v1729_v31  ;;  %1948 = vmatpush.bf16.msra.mxu2 %v1732_v12 }
 0x157   : > { %v1266_v42 = vsel %vm982_vm13, %v6270_v32, %v6182_v20  ;;  %v1226_v5 = vsel %vm982_vm13, %v6271_v4, %v6181_v58  ;;  %1761 = vmatmul.bf16.gmra.mxu0 %v4591_v34  ;;  %v3331_v32 = vld [vmem:[%s6103_s1 + $0x34] sm:$0xf] }
 0x158   : > { %v1267_v62 = vsel %vm6188_vm12, %v1266_v42, %v4654_v55  ;;  %v1227_v12 = vsel %vm6187_vm11, %v1226_v5, %v4659_v21  ;;  %1639 = vperm.xlu1 %3715, %v1625_v15   ;;  %v1186_v5 = vsel %vm982_vm13, %v1180_v27, %v1181_v26  ;;  %v4709_v61 = vor.u32 %v3331_v32, %v3291_v59 }
 0x159   : > { %v1277_v3 = vunpack.c.l.bf16 %v1267_v62  ;;  %v1278_v31 = vunpack.c.h.bf16 %v1267_v62  ;;  %v1237_v42 = vunpack.c.l.bf16 %v1227_v12  ;;  %v1238_v4 = vunpack.c.h.bf16 %v1227_v12  ;;  %1824 = vmatmul.bf16.gmra.mxu2 %v4666_v19  ;;  %v1626_v62 = vld [vmem:[%s6104_s2 + $0x10] sm:$0xff] }
 0x15a   : > { %1634 = vperm.xlu0 %3714, %v1624_v52   ;;  %v4707_v20 = vpop.permute.xlu2 %3650  ;;  %1644 = vperm.xlu2 %3716, %v1626_v62   ;;  %vm6273_vm11 = vcmask 146432   ;;  %v1187_v27 = vsel %vm1184_vm5, %v1186_v5, %v4585_v43  ;;  %v6274_v52 = vunpack.i.h.bf16 %v4281_v0  ;;  %vm6275_vm12 = vcmask 138240  }
 0x15b   : > { %v1604_v11 = vpack.c.bf16 %v1277_v3, %v1237_v42  ;;  %v1605_v12 = vpack.c.bf16 %v1278_v31, %v1238_v4  ;;  %v754_v16 = vsel %vm6273_vm11, %v6272_v54, %v4561_v37  ;;  %v6203_v31 = vrot.slane %v4616_v40, 4  ;;  %v1627_v54 = vld [vmem:[%s6104_s2 + $0x18] sm:$0xff] }
 0x15c   : > { %v4705_v58 = vpop.permute.xlu1 %1133  ;;  %v4712_v47 = vpop.permute.xlu0 %779  ;;  %vm6284_vm11 = vcmask 1039360  }
 0x15d   : > { %v1141_v15 = vrot.slane %v4705_v58, 4  ;;  %v792_v3 = vsel %vm6275_vm12, %v6274_v52, %v4712_v47  ;;  %1891 = vmatpush.bf16.msrb.mxu3 %v1604_v11  ;;  %1949 = vmatpush.bf16.msra.mxu2 %v1605_v12  ;;  %v1197_v11 = vunpack.c.l.bf16 %v1187_v27  ;;  %v1106_v4 = vsel %vm982_vm13, %v1100_v10, %v6203_v31  ;;  %v3325_v12 = vld [vmem:[%s6103_s1 + $0x4] sm:$0xf] }
 0x15e   : > { %v1562_v32 = vpack.c.bf16 %v792_v3, %v754_v16  ;;  %3298 = vmatmul.msk.bf16.gmra.mxu1 %vm1708_vm7, %v4709_v61  ;;  %3302 = vmatmul.msk.bf16.gmra.mxu3 %vm1708_vm7, %v4709_v61  ;;  %v3267_v16 = vld [vmem:[%s6103_s1 + $0x8] sm:$0xf0] }
 0x15f   : > { %v1146_v25 = vsel %vm982_vm13, %v1140_v33, %v1141_v15  ;;  %v1198_v33 = vunpack.c.h.bf16 %v1187_v27  ;;  %v1628_v27 = vld [vmem:[%s6104_s2 + $0x20] sm:$0xff] }
 0x160   : > { %v1147_v0 = vsel %vm1144_vm4, %v1146_v25, %v4705_v58  ;;  %1860 = vmatpush.bf16.msrb.mxu1 %v1562_v32  ;;  %1649 = vperm.xlu1 %3715, %v1627_v54   ;;  %v1107_v25 = vsel %vm1104_vm3, %v1106_v4, %v4616_v40  ;;  %v6276_v32 = vunpack.i.h.bf16 %v4323_v14 }
 0x161   : > { %v1157_v59 = vunpack.c.l.bf16 %v1147_v0  ;;  %v1158_v42 = vunpack.c.h.bf16 %v1147_v0  ;;  %v4769_v0 = vor.u32 %v3325_v12, %v3267_v16  ;;  %v1118_v4 = vunpack.c.h.bf16 %v1107_v25 }
 0x162   : > { %1659 = vperm.xlu0 %3714, %v1629_v1   ;;  %v4758_v50 = vpop.permute.xlu2 %3660  ;;  %1654 = vperm.xlu2 %3716, %v1628_v27  }
 0x163   : > { %v1597_v62 = vpack.c.bf16 %v1197_v11, %v1157_v59  ;;  %v1598_v5 = vpack.c.bf16 %v1198_v33, %v1158_v42  ;;  %v1630_v33 = vld [vmem:[%s6104_s2 + $0x30] sm:$0xff]  ;;  %v2317_v59 = vld [vmem:[%s6105_s3] sm:$0xff]  ;;  %v1117_v42 = vunpack.c.l.bf16 %v1107_v25 }
 0x164   : > { %v4756_v52 = vpop.permute.xlu1 %1053  ;;  %v4761_v3 = vpop.permute.xlu0 %703 }
 0x165   : > { %v1061_v10 = vrot.slane %v4756_v52, 4  ;;  %1892 = vmatpush.bf16.msrb.mxu3 %v1597_v62  ;;  %1950 = vmatpush.bf16.msra.mxu2 %v1598_v5  ;;  %v716_v54 = vsel %vm713_vm15, %v6276_v32, %v4761_v3  ;;  %v1631_v5 = vld [vmem:[%s6104_s2 + $0x38] sm:$0xff]  ;;  %v6277_v32 = vpack.c.bf16 %v4230_v44, %v4088_v45  ;;  %v6278_v45 = vrot.slane %v4406_v53, 4 }
 0x166   : > { %v1555_v11 = vpack.c.bf16 %v716_v54, %v4253_v57  ;;  %v6193_v53 = vunpack.i.h.bf16 %v4707_v20 }
 0x167   : > { %v1066_v1 = vsel %vm982_vm13, %v1060_v23, %v1061_v10  ;;  %1766 = vmatmul.bf16.gmra.mxu0 %v4666_v19 }
 0x168   : > { %v1067_v14 = vsel %vm1064_vm1, %v1066_v1, %v4756_v52  ;;  %1861 = vmatpush.bf16.msrb.mxu1 %v1555_v11  ;;  %1664 = vperm.xlu1 %3715, %v1630_v33   ;;  %v2318_v11 = vld [vmem:[%s6105_s3 + $0x8] sm:$0xff] }
 0x169   : > { %v1077_v6 = vunpack.c.l.bf16 %v1067_v14  ;;  %v1078_v62 = vunpack.c.h.bf16 %v1067_v14  ;;  %3299 = vmatmul.msk.bf16.vlgmr.msrb.gmra.mxu2 %vm1708_vm7, %v4769_v0  ;;  %v2320_v14 = vld [vmem:[%s6105_s3 + $0x18] sm:$0xff] }
 0x16a   : > { %2327 = vperm.xlu0 %3714, %v2317_v59   ;;  %v4793_v16 = vpop.permute.xlu2 %3665  ;;  %1669 = vperm.xlu2 %3716, %v1631_v5   ;;  %v3418_v5 = vunpack.i.h.bf16 %v3987_v29 }
 0x16b   : > { %v1590_v57 = vpack.c.bf16 %v1117_v42, %v1077_v6  ;;  %v1591_v23 = vpack.c.bf16 %v1118_v4, %v1078_v62  ;;  %v6279_v42 = vpack.c.bf16 %v4161_v8, %v4140_v56  ;;  %v3652_v4 = vunpack.i.l.bf16 %v4707_v20 }
 0x16c   : > { %v4791_v12 = vpop.permute.xlu1 %1013  ;;  %v4796_v25 = vpop.permute.xlu0 %972  ;;  %1862 = vmatpush.bf16.msrb.mxu1 %v6277_v32 }
 0x16d   : > { %v6204_v27 = vrot.slane %v4791_v12, 4  ;;  %1893 = vmatpush.bf16.msrb.mxu3 %v1590_v57  ;;  %v6205_v54 = vrot.slane %v4796_v25, 4  ;;  %1951 = vmatpush.bf16.msra.mxu2 %v1591_v23  ;;  %v3327_v57 = vld [vmem:[%s6103_s1 + $0x14] sm:$0xf]  ;;  %v3275_v23 = vld [vmem:[%s6103_s1 + $0x18] sm:$0xf0] }
 0x16f   : > { %v1026_v1 = vsel %vm982_vm13, %v1020_v51, %v6204_v27  ;;  %v986_v44 = vsel %vm982_vm13, %v6278_v45, %v6205_v54 }
 0x170   : > { %v1027_v33 = vsel %vm1024_vm0, %v1026_v1, %v4791_v12  ;;  %v987_v51 = vsel %vm984_vm6, %v986_v44, %v4796_v25  ;;  %1863 = vmatpush.bf16.msrb.mxu1 %v6279_v42  ;;  %2332 = vperm.xlu1 %3715, %v2318_v11   ;;  %v2319_v1 = vld [vmem:[%s6105_s3 + $0x10] sm:$0xff]  ;;  %v6280_v11 = vunpack.i.h.bf16 %v4456_v36  ;;  %v6282_v36 = vunpack.i.h.bf16 %v4587_v9 }
 0x171   : > { %v1037_v63 = vunpack.c.l.bf16 %v1027_v33  ;;  %v1038_v59 = vunpack.c.h.bf16 %v1027_v33  ;;  %v997_v6 = vunpack.c.l.bf16 %v987_v51  ;;  %v998_v62 = vunpack.c.h.bf16 %v987_v51 }
 0x172   : > { %2342 = vperm.xlu0 %3714, %v2320_v14   ;;  %v906_v33 = vsel %vm903_vm2, %v6280_v11, %v4656_v30  ;;  %v6281_v51 = vpack.c.bf16 %v4008_v35, %v4050_v48  ;;  %2337 = vperm.xlu2 %3716, %v2319_v1   ;;  %v6190_v9 = vunpack.i.h.bf16 %v4758_v50 }
 0x173   : > { %v1583_v8 = vpack.c.bf16 %v1037_v63, %v997_v6  ;;  %v1584_v32 = vpack.c.bf16 %v1038_v59, %v998_v62  ;;  %v869_v63 = vsel %vm6189_vm9, %v4530_v49, %v3652_v4  ;;  %v4852_v59 = vpop.permute.xlu2 %1055  ;;  %v4858_v6 = vor.u32 %v3327_v57, %v3275_v23  ;;  %v2321_v57 = vld [vmem:[%s6105_s3 + $0x20] sm:$0xff] }
 0x174   : > { %v4834_v56 = vpop.permute.xlu1 %3645  ;;  %v4845_v14 = vpop.permute.xlu0 %931  ;;  %1864 = vmatpush.bf16.msrb.mxu1 %v6281_v51  ;;  %v870_v62 = vsel %vm6189_vm9, %v3652_v4, %v6193_v53  ;;  %v6285_v23 = vpack.c.bf16 %v4029_v41, %v3956_v22  ;;  %v2322_v41 = vld [vmem:[%s6105_s3 + $0x28] sm:$0xff]  ;;  %v6192_v51 = vunpack.i.h.bf16 %v4793_v16 }
 0x175   : > { %v6194_v45 = vunpack.i.h.bf16 %v4834_v56  ;;  %v3647_v44 = vunpack.i.l.bf16 %v4834_v56  ;;  %v944_v42 = vsel %vm941_vm8, %v6282_v36, %v4845_v14  ;;  %1894 = vmatpush.bf16.msrb.mxu3 %v1583_v8  ;;  %1952 = vmatpush.bf16.msra.mxu2 %v1584_v32  ;;  %v2323_v8 = vld [vmem:[%s6105_s3 + $0x30] sm:$0xff]  ;;  %v3662_v32 = vunpack.i.l.bf16 %v4758_v50 }
 0x176   : > { %v1576_v49 = vpack.c.bf16 %v944_v42, %v906_v33  ;;  %v6294_v53 = vld [vmem:[#allocation33_spill] sm:$0xff] }
 0x177   : > { %v831_v35 = vsel %vm827_vm10, %v4614_v39, %v3647_v44  ;;  %v832_v48 = vsel %vm827_vm10, %v3647_v44, %v6194_v45  ;;  %3295 = vmatmul.msk.bf16.vlgmr.msrb.gmra.mxu0 %vm1708_vm7, %v4769_v0  ;;  %v6283_v39 = vunpack.i.l.bf16 %v3987_v29  ;;  %v794_v22 = vsel %vm6275_vm12, %v3662_v32, %v6190_v9 }
 0x178   : > { %v1570_v11 = vpack.c.bf16 %v869_v63, %v831_v35  ;;  %1865 = vmatpush.bf16.msrb.mxu1 %v6285_v23  ;;  %v1571_v1 = vpack.c.bf16 %v870_v62, %v832_v48  ;;  %2347 = vperm.xlu1 %3715, %v2321_v57   ;;  %v3667_v63 = vunpack.i.l.bf16 %v4793_v16  ;;  %v6198_v62 = vunpack.i.h.bf16 %v4183_v28 }
 0x179   : > { %v336_v4 = vsel %vm6284_vm11, %v6283_v39, %v3418_v5  ;;  %3300 = vmatmul.msk.bf16.gmra.mxu2 %vm1708_vm7, %v4858_v6  ;;  %1895 = vmatpush.bf16.msrb.mxu3 %v1576_v49  ;;  %v3602_v48 = vunpack.i.l.bf16 %v4183_v28  ;;  %vm6286_vm11 = vcmask 146432   ;;  %v6196_v39 = vunpack.i.h.bf16 %v4219_v46 }
 0x17a   : > { %1917 = vmatpush.bf16.msra.mxu0 %v1570_v11  ;;  %v1520_v33 = vpack.c.bf16 %v336_v4, %v3901_v13  ;;  %2357 = vperm.xlu0 %3714, %v2323_v8   ;;  %v793_v11 = vsel %vm6275_vm12, %v4712_v47, %v3662_v32  ;;  %vm6287_vm9 = vmmov %vm6286_vm11  ;;  %v6288_v23 = vrot.slane %v4628_v17, 4  ;;  %v718_v17 = vsel %vm713_vm15, %v3667_v63, %v6192_v51 }
 0x17b   : > { %2352 = vperm.xlu2 %3716, %v2322_v41   ;;  %v4916_v4 = vpop.permute.xlu2 %1015  ;;  %v717_v41 = vsel %vm713_vm15, %v4761_v3, %v3667_v63  ;;  %v6295_v45 = vunpack.i.h.bf16 %v6294_v53  ;;  %vm6296_vm12 = vcmask 228352   ;;  %v6299_v53 = vld [vmem:[#allocation13_spill] sm:$0xff] }
 0x17c   : > { %v4889_v44 = vpop.permute.xlu1 %3655  ;;  %v4901_v13 = vpop.permute.xlu0 %1295  ;;  %1866 = vmatpush.bf16.msrb.mxu1 %v1520_v33  ;;  %3303 = vmatmul.msk.bf16.vlgmr.msrb.gmra.mxu3 %vm1708_vm7, %v4769_v0 }
 0x17d   : > { %v6191_v36 = vunpack.i.h.bf16 %v4889_v44  ;;  %v3657_v42 = vunpack.i.l.bf16 %v4889_v44  ;;  %v6202_v35 = vrot.slane %v4901_v13, 4 }
 0x17f   : > { %v755_v49 = vsel %vm6286_vm11, %v4561_v37, %v3657_v42  ;;  %v756_v57 = vsel %vm6287_vm9, %v3657_v42, %v6191_v36  ;;  %v1308_v8 = vsel %vm982_vm13, %v6288_v23, %v6202_v35  ;;  %1867 = vmatmul.bf16.vlgmr.msrb.gmra.mxu1 %v4468_v2  ;;  %v2324_v37 = vld [vmem:[%s6105_s3 + $0x38] sm:$0xff]  ;;  %v6289_v23 = vld [vmem:[#allocation32_spill] sm:$0xff]  ;;  %vm6292_vm9 = vcmask 220160  }
 0x180   : > { %1975 = vmatpush.bf16.msra.mxu1 %v1571_v1  ;;  %v1563_v47 = vpack.c.bf16 %v793_v11, %v755_v49  ;;  %v1564_v32 = vpack.c.bf16 %v794_v22, %v756_v57  ;;  %v3582_v1 = vunpack.i.l.bf16 %v4219_v46  ;;  %v4930_v33 = vsel %vm1304_vm14, %v1308_v8, %v4901_v13  ;;  %2362 = vperm.xlu1 %3715, %v2324_v37   ;;  %v6290_v11 = vld [vmem:[#allocation34_spill] sm:$0xff]  ;;  %vm6293_vm11 = vmmov %vm6292_vm9  ;;  %v6321_v35 = vld [vmem:[#allocation20_spill] sm:$0xff] }
 0x181   : > { %v1319_v42 = vunpack.c.l.bf16 %v4930_v33  ;;  %v6195_v49 = vunpack.i.h.bf16 %v6289_v23  ;;  %v3562_v22 = vunpack.i.l.bf16 %v6289_v23  ;;  %v6291_v57 = vunpack.i.h.bf16 %v6290_v11 }
 0x182   : > { %1918 = vmatpush.bf16.msra.mxu0 %v1563_v47  ;;  %v680_v3 = vsel %vm6293_vm11, %v3602_v48, %v6198_v62  ;;  %v641_v37 = vsel %vm6296_vm12, %v6295_v45, %v3582_v1  ;;  %vm6301_vm11 = vcmask 867328  }
 0x183   : > { %v679_v8 = vsel %vm6292_vm9, %v6291_v57, %v3602_v48  ;;  %v1613_v9 = vpack.c.bf16 %v1319_v42, %v1319_v42  ;;  %v1557_v51 = vpack.c.bf16 %v718_v17, %v680_v3  ;;  %vm6297_vm9 = vmmov %vm6296_vm12  ;;  %v6300_v42 = vunpack.i.h.bf16 %v6299_v53  ;;  %v6306_v53 = vld [vmem:[#allocation12_spill] sm:$0xff] }
 0x184   : > { %1976 = vmatpush.bf16.msra.mxu1 %v1564_v32  ;;  %v4946_v36 = vpop.permute.xlu1 %1255  ;;  %v1556_v63 = vpack.c.bf16 %v717_v41, %v679_v8  ;;  %v4949_v32 = vpop.permute.xlu0 %1215  ;;  %v642_v11 = vsel %vm6297_vm9, %v3582_v1, %v6196_v39  ;;  %v6298_v41 = vrot.slane %v4654_v55, 4  ;;  %vm6302_vm12 = vmmov %vm6301_vm11  ;;  %vm6303_vm9 = vcmask 285696   ;;  %v6311_v39 = vld [vmem:[#allocation22_spill] sm:$0xff] }
 0x185   : > { %v6197_v47 = vrot.slane %v4946_v36, 4  ;;  %v6201_v57 = vrot.slane %v4949_v32, 4  ;;  %v1735_v48 = vsel %vm982_vm13, %v1613_v9, 0  ;;  %v603_v45 = vsel %vm6301_vm11, %v6300_v42, %v3562_v22  ;;  %v4974_v9 = vpop.permute.xlu2 %3680 }
 0x186   : > { %1919 = vmatpush.bf16.msra.mxu0 %v1556_v63  ;;  %2006 = vmatpush.bf16.msra.mxu3 %v1735_v48  ;;  %v604_v1 = vsel %vm6302_vm12, %v3562_v22, %v6195_v49  ;;  %v6304_v55 = vrot.slane %v4659_v21, 4  ;;  %v1549_v3 = vpack.c.bf16 %v641_v37, %v603_v45  ;;  %vm6305_vm11 = vcmask 293888   ;;  %v6307_v45 = vld [vmem:[#allocation26_spill] sm:$0xff] }
 0x187   : > { %v1268_v17 = vsel %vm982_vm13, %v6298_v41, %v6197_v47  ;;  %3296 = vmatmul.msk.bf16.gmra.mxu0 %vm1708_vm7, %v4858_v6  ;;  %v1550_v63 = vpack.c.bf16 %v642_v11, %v604_v1  ;;  %v3462_v42 = vunpack.i.l.bf16 %v6306_v53  ;;  %v3463_v37 = vunpack.i.h.bf16 %v6306_v53  ;;  %v6308_v1 = vld [vmem:[#allocation25_spill] sm:$0xff]  ;;  %v6312_v47 = vld [vmem:[#allocation23_spill] sm:$0xff] }
 0x188   : > { %1977 = vmatpush.bf16.msra.mxu1 %v1557_v51  ;;  %v4972_v51 = vsel %vm6303_vm9, %v1268_v17, %v4946_v36  ;;  %v1228_v8 = vsel %vm982_vm13, %v6304_v55, %v6201_v57  ;;  %v6313_v62 = vpack.c.bf16 %v6311_v39, %v6312_v47  ;;  %vm6315_vm12 = vcmask 965632   ;;  %v6316_v47 = vld [vmem:[#allocation7_spill] sm:$0xff] }
 0x189   : > { %v1279_v48 = vunpack.c.l.bf16 %v4972_v51  ;;  %v4986_v22 = vsel %vm6305_vm11, %v1228_v8, %v4949_v32  ;;  %v6309_v8 = vpack.c.bf16 %v6307_v45, %v6308_v1  ;;  %vm6320_vm9 = vmmov %vm6315_vm12  ;;  %vm6325_vm11 = vcmask 1031168  }
 0x18a   : > { %v1239_v41 = vunpack.c.l.bf16 %v4986_v22  ;;  %1920 = vmatpush.bf16.msra.mxu0 %v1549_v3  ;;  %v6310_v3 = vld [vmem:[#allocation11_spill] sm:$0xff] }
 0x18c   : > { %1978 = vmatpush.bf16.msra.mxu1 %v1550_v63  ;;  %v4989_v17 = vpop.permute.xlu1 %1175  ;;  %v1606_v21 = vpack.c.bf16 %v1279_v48, %v1239_v41  ;;  %v4993_v49 = vpop.permute.xlu0 %1135  ;;  %3304 = vmatmul.msk.bf16.gmra.mxu3 %vm1708_vm7, %v4858_v6  ;;  %v6208_v63 = vunpack.i.h.bf16 %v6310_v3  ;;  %v3442_v48 = vunpack.i.l.bf16 %v6310_v3 }
 0x18d   : > { %v6199_v55 = vrot.slane %v4989_v17, 4  ;;  %v6200_v11 = vrot.slane %v4993_v49, 4 }
 0x18e   : > { %2007 = vmatpush.bf16.msra.mxu3 %v1606_v21  ;;  %1921 = vmatpush.bf16.msra.mxu0 %v6309_v8  ;;  %v1062_v21 = vrot.slane %v4852_v59, 4  ;;  %v6206_v8 = vunpack.i.h.bf16 %v6316_v47 }
 0x18f   : > { %v1188_v41 = vsel %vm982_vm13, %v1181_v26, %v6199_v55  ;;  %v1148_v1 = vsel %vm982_vm13, %v1141_v15, %v6200_v11  ;;  %1872 = vmatmul.bf16.gmra.mxu1 %v4537_v60  ;;  %v5033_v55 = vpop.permute.xlu2 %3690  ;;  %v6317_v15 = vld [vmem:[#allocation19_spill] sm:$0xff]  ;;  %v6318_v11 = vld [vmem:[#allocation14_spill] sm:$0xff] }
 0x190   : > { %1979 = vmatpush.bf16.msra.mxu1 %v6313_v62  ;;  %v5015_v45 = vsel %vm1184_vm5, %v1188_v41, %v4989_v17  ;;  %v5026_v26 = vsel %vm1144_vm4, %v1148_v1, %v4993_v49  ;;  %v6314_v62 = vunpack.i.h.bf16 %v4020_v38  ;;  %v3422_v41 = vunpack.i.l.bf16 %v6316_v47  ;;  %v6322_v38 = vld [vmem:[#allocation15_spill] sm:$0xff] }
 0x191   : > { %v1199_v43 = vunpack.c.l.bf16 %v5015_v45  ;;  %v1159_v58 = vunpack.c.l.bf16 %v5026_v26  ;;  %v6319_v57 = vpack.c.bf16 %v6317_v15, %v6318_v11  ;;  %v414_v1 = vsel %vm6320_vm9, %v3462_v42, %v3463_v37 }
 0x192   : > { %v413_v39 = vsel %vm6315_vm12, %v6314_v62, %v3462_v42  ;;  %v6323_v31 = vpack.c.bf16 %v6321_v35, %v6322_v38  ;;  %v6324_v62 = vunpack.i.h.bf16 %v3943_v18  ;;  %vm6326_vm12 = vmmov %vm6325_vm11  ;;  %v6207_v42 = vrot.slane %v4916_v4, 4 }
 0x193   : > { %1922 = vmatpush.bf16.msra.mxu0 %v6319_v57  ;;  %v376_v54 = vsel %vm6326_vm12, %v3442_v48, %v6208_v63  ;;  %v1068_v57 = vsel %vm982_vm13, %v1061_v10, %v1062_v21  ;;  %v1599_v35 = vpack.c.bf16 %v1199_v43, %v1159_v58  ;;  %vm6327_vm9 = vcmask 1039360   ;;  %v2512_v63 = vld [vmem:[#allocation4] sm:$0x1] }
 0x194   : > { %1980 = vmatpush.bf16.msra.mxu1 %v6323_v31  ;;  %v375_v27 = vsel %vm6325_vm11, %v6324_v62, %v3442_v48  ;;  %v5057_v11 = vpop.permute.xlu1 %974  ;;  %v5060_v15 = vpop.permute.xlu0 %1095  ;;  %v1529_v38 = vpack.c.bf16 %v414_v1, %v376_v54  ;;  %v337_v48 = vsel %vm6327_vm9, %v3418_v5, %v3422_v41  ;;  %vm6328_vm11 = vmmov %vm6327_vm9  ;;  %v5071_v10 = vsel %vm1064_vm1, %v1068_v57, %v4852_v59  ;;  %v6333_v57 = vld [vmem:[#allocation5_spill] sm:$0xff] }
 0x195   : > { %v1528_v31 = vpack.c.bf16 %v413_v39, %v375_v27  ;;  %v6209_v18 = vrot.slane %v5057_v11, 4  ;;  %v1102_v62 = vrot.slane %v5060_v15, 4  ;;  %2008 = vmatpush.bf16.msra.mxu3 %v1599_v35  ;;  %v338_v52 = vsel %vm6328_vm11, %v3422_v41, %v6206_v8  ;;  %v6332_v41 = vld [vmem:[#allocation6_spill] sm:$0xff]  ;;  %2515 = vperm.xlu2 %3716, %v2512_v63  }
 0x196   : > { %v6329_v27 = vrot.slane %v4796_v25, 4  ;;  %v6330_v54 = vrot.slane %v4791_v12, 4  ;;  %v6331_v43 = vrot.slane %v4616_v40, 4  ;;  %v1521_v58 = vpack.c.bf16 %v337_v48, %v6332_v41 }
 0x197   : > { %1923 = vmatpush.bf16.msra.mxu0 %v1528_v31  ;;  %v6334_v12 = vunpack.c.l.bf16 %v6333_v57  ;;  %v1079_v31 = vunpack.c.l.bf16 %v5071_v10  ;;  %v1320_v48 = vunpack.c.h.bf16 %v4930_v33  ;;  %v1160_v63 = vunpack.c.h.bf16 %v5026_v26 }
 0x198   : > { %v988_v29 = vsel %vm982_vm13, %v6329_v27, %v6209_v18  ;;  %1981 = vmatpush.bf16.msra.mxu1 %v1529_v38  ;;  %v1028_v5 = vsel %vm982_vm13, %v6330_v54, %v6207_v42  ;;  %v1108_v39 = vsel %vm982_vm13, %v6331_v43, %v1102_v62  ;;  %vm6346_vm11 = vcmask 138240  }
 0x199   : > { %v5091_v25 = vsel %vm984_vm6, %v988_v29, %v5057_v11  ;;  %v5095_v1 = vsel %vm1104_vm3, %v1108_v39, %v5060_v15  ;;  %v1522_v35 = vpack.c.bf16 %v338_v52, %v6334_v12  ;;  %v5103_v40 = vsel %vm1024_vm0, %v1028_v5, %v4916_v4  ;;  %v5107_v29 = vpop.permute.xlu2 %1217  ;;  %v6367_v15 = vld [vmem:[#allocation28_spill] sm:$0xff] }
 0x19a   : > { %v1119_v38 = vunpack.c.l.bf16 %v5095_v1  ;;  %v999_v27 = vunpack.c.l.bf16 %v5091_v25  ;;  %v1039_v33 = vunpack.c.l.bf16 %v5103_v40  ;;  %v1614_v12 = vpack.c.bf16 %v1320_v48, %v1320_v48 }
 0x19b   : > { %1924 = vmatpush.bf16.msra.mxu0 %v1521_v58  ;;  %v1280_v48 = vunpack.c.h.bf16 %v4972_v51  ;;  %v6335_v51 = vrot.slane %v4901_v13, 4 }
 0x19c   : > { %1982 = vmatpush.bf16.msra.mxu1 %v1522_v35  ;;  %v5109_v54 = vpop.permute.xlu1 %3675  ;;  %v1592_v43 = vpack.c.bf16 %v1119_v38, %v1079_v31  ;;  %v5113_v41 = vpop.permute.xlu0 %3670  ;;  %3305 = vmatmul.msk.bf16.gmra.mxu3 %vm1708_vm7, %v4618_v24  ;;  %v1585_v38 = vpack.c.bf16 %v1039_v33, %v999_v27  ;;  %v3682_v27 = vunpack.i.l.bf16 %v4974_v9 }
 0x19d   : > { %v6210_v52 = vunpack.i.h.bf16 %v5109_v54  ;;  %v3677_v39 = vunpack.i.l.bf16 %v5109_v54  ;;  %v6211_v5 = vunpack.i.h.bf16 %v5113_v41  ;;  %v3672_v58 = vunpack.i.l.bf16 %v5113_v41 }
 0x19e   : > { %1925 = vmatmul.bf16.vlgmr.msra.gmra.mxu0 %v4468_v2  ;;  %2009 = vmatpush.bf16.msra.mxu3 %v1592_v43  ;;  %v3683_v43 = vunpack.i.h.bf16 %v4974_v9 }
 0x19f   : > { %v945_v35 = vsel %vm941_vm8, %v4845_v14, %v3677_v39  ;;  %v946_v31 = vsel %vm941_vm8, %v3677_v39, %v6210_v52  ;;  %1877 = vmatmul.bf16.gmra.mxu1 %v4591_v34  ;;  %v907_v8 = vsel %vm903_vm2, %v4656_v30, %v3672_v58  ;;  %v908_v42 = vsel %vm903_vm2, %v3672_v58, %v6211_v5 }
 0x1a0   : > { %v1240_v14 = vunpack.c.h.bf16 %v4986_v22  ;;  %v1577_v18 = vpack.c.bf16 %v945_v35, %v907_v8  ;;  %v1578_v39 = vpack.c.bf16 %v946_v31, %v908_v42  ;;  %v1738_v30 = vsel %vm982_vm13, %v1614_v12, 0 }
 0x1a1   : > { %v834_v58 = vsel %vm827_vm10, %v3682_v27, %v3683_v43  ;;  %v1200_v52 = vunpack.c.h.bf16 %v5015_v45  ;;  %v5143_v42 = vpop.permute.xlu2 %1177  ;;  %v6336_v12 = vunpack.i.h.bf16 %v4834_v56  ;;  %v6337_v31 = vunpack.i.h.bf16 %v4707_v20 }
 0x1a2   : > { %2010 = vmatpush.bf16.msra.mxu3 %v1585_v38  ;;  %1953 = vmatpush.bf16.msra.mxu2 %v1577_v18  ;;  %v1607_v8 = vpack.c.bf16 %v1280_v48, %v1240_v14  ;;  %v1120_v48 = vunpack.c.h.bf16 %v5095_v1  ;;  %v1080_v56 = vunpack.c.h.bf16 %v5071_v10 }
 0x1a3   : > { %v833_v45 = vsel %vm827_vm10, %v6336_v12, %v3682_v27  ;;  %v3692_v27 = vunpack.i.l.bf16 %v5033_v55  ;;  %vm6340_vm10 = vcmask 146432   ;;  %v1040_v12 = vunpack.c.h.bf16 %v5103_v40 }
 0x1a4   : > { %v1298_v33 = vpop.permute.xlu1 %1297  ;;  %v3686_v22 = vpop.permute.xlu0 %3685  ;;  %v1593_v1 = vpack.c.bf16 %v1120_v48, %v1080_v56  ;;  %vm6344_vm9 = vmmov %vm6340_vm10 }
 0x1a5   : > { %v1310_v5 = vsel %vm1304_vm14, %v6335_v51, %v1298_v33  ;;  %v3688_v18 = vunpack.i.h.bf16 %v3686_v22  ;;  %v3687_v35 = vunpack.i.l.bf16 %v3686_v22  ;;  %3307 = vmatmul.msk.bf16.vlgmr.msra.gmra.mxu2 %vm1708_vm7, %v4769_v0  ;;  %vm6338_vm14 = vcmask 64512  }
 0x1a6   : > { %2064 = vmatpush.bf16.msrb.mxu2 %v1738_v30  ;;  %v1321_v9 = vunpack.c.l.bf16 %v1310_v5  ;;  %2011 = vmatpush.bf16.msra.mxu3 %v1578_v39  ;;  %vm6339_vm12 = vmmov %vm6338_vm14  ;;  %v3693_v5 = vunpack.i.h.bf16 %v5033_v55  ;;  %v1600_v30 = vpack.c.bf16 %v1200_v52, %v1160_v63  ;;  %v1000_v33 = vunpack.c.h.bf16 %v5091_v25  ;;  %v6341_v63 = vld [vmem:[#allocation24_spill] sm:$0xff] }
 0x1a7   : > { %v871_v38 = vsel %vm6338_vm14, %v6337_v31, %v3687_v35  ;;  %v872_v26 = vsel %vm6339_vm12, %v3687_v35, %v3688_v18  ;;  %v6342_v18 = vld [vmem:[#allocation35_spill] sm:$0xff]  ;;  %vm6347_vm14 = vmmov %vm6346_vm11  ;;  %v3587_v48 = vunpack.i.l.bf16 %v6341_v63  ;;  %vm6351_vm12 = vcmask 293888  }
 0x1a8   : > { %v1615_v13 = vpack.c.bf16 %v1321_v9, %v1321_v9  ;;  %v1572_v43 = vpack.c.bf16 %v871_v38, %v833_v45  ;;  %v1573_v14 = vpack.c.bf16 %v872_v26, %v834_v58  ;;  %v758_v10 = vsel %vm6340_vm10, %v3692_v27, %v3693_v5 }
 0x1a9   : > { %v3588_v9 = vunpack.i.h.bf16 %v6341_v63  ;;  %v3608_v35 = vunpack.i.h.bf16 %v6342_v18  ;;  %v3607_v25 = vunpack.i.l.bf16 %v6342_v18  ;;  %v5170_v45 = vpop.permute.xlu2 %976  ;;  %v6345_v38 = vunpack.i.h.bf16 %v4758_v50 }
 0x1aa   : > { %2065 = vmatpush.bf16.msrb.mxu2 %v1607_v8  ;;  %v1741_v39 = vsel %vm982_vm13, %v1615_v13, 0  ;;  %2033 = vmatpush.bf16.msrb.mxu0 %v1572_v43  ;;  %v6343_v13 = vunpack.i.h.bf16 %v4889_v44  ;;  %v6348_v43 = vld [vmem:[#allocation31_spill] sm:$0xff]  ;;  %v1586_v56 = vpack.c.bf16 %v1040_v12, %v1000_v33  ;;  %v6350_v50 = vrot.slane %v4949_v32, 4 }
 0x1ab   : > { %2122 = vmatpush.bf16.msrb.mxu3 %v1741_v39  ;;  %2091 = vmatpush.bf16.msrb.mxu1 %v1573_v14  ;;  %v3568_v14 = vunpack.i.h.bf16 %v6348_v43  ;;  %v3567_v39 = vunpack.i.l.bf16 %v6348_v43  ;;  %vm6353_vm10 = vcmask 220160   ;;  %v6355_v18 = vrot.slane %v4946_v36, 4 }
 0x1ac   : > { %v3701_v20 = vpop.permute.xlu1 %3700  ;;  %v3696_v51 = vpop.permute.xlu0 %3695  ;;  %3306 = vmatmul.msk.bf16.gmra.mxu3 %vm1708_vm7, %v4709_v61  ;;  %v757_v31 = vsel %vm6344_vm9, %v6343_v13, %v3692_v27  ;;  %vm6354_vm9 = vmmov %vm6353_vm10  ;;  %v6361_v13 = vrot.slane %v4993_v49, 4  ;;  %v6362_v36 = vunpack.i.h.bf16 %v6289_v23  ;;  %v6365_v23 = vld [vmem:[#allocation8_spill] sm:$0xff] }
 0x1ad   : > { %v5160_v22 = vpop.f32.mrf.mxu2  ;;  %v3703_v52 = vunpack.i.h.bf16 %v3701_v20  ;;  %v3702_v55 = vunpack.i.l.bf16 %v3701_v20  ;;  %v3698_v58 = vunpack.i.h.bf16 %v3696_v51  ;;  %v3697_v8 = vunpack.i.l.bf16 %v3696_v51 }
 0x1ae   : > { %2066 = vmatpush.bf16.msrb.mxu2 %v1600_v30  ;;  %1930 = vmatmul.bf16.gmra.mxu0 %v4537_v60  ;;  %v6349_v20 = vunpack.i.h.bf16 %v4793_v16  ;;  %v1230_v51 = vsel %vm6351_vm12, %v6350_v50, %v5107_v29  ;;  %v682_v16 = vsel %vm6354_vm9, %v3607_v25, %v3608_v35  ;;  %v6357_v29 = vunpack.i.h.bf16 %v4219_v46 }
 0x1af   : > { %1882 = vmatmul.bf16.gmra.mxu1 %v4666_v19  ;;  %v795_v26 = vsel %vm6346_vm11, %v6345_v38, %v3697_v8  ;;  %v796_v5 = vsel %vm6347_vm14, %v3697_v8, %v3698_v58  ;;  %v720_v27 = vsel %vm713_vm15, %v3702_v55, %v3703_v52  ;;  %vm6358_vm11 = vcmask 228352  }
 0x1b0   : > { %v1565_v40 = vpack.c.bf16 %v795_v26, %v757_v31  ;;  %v1566_v30 = vpack.c.bf16 %v796_v5, %v758_v10  ;;  %v719_v44 = vsel %vm713_vm15, %v6349_v20, %v3702_v55  ;;  %v6352_v10 = vunpack.i.h.bf16 %v4183_v28  ;;  %vm6360_vm12 = vmmov %vm6358_vm11 }
 0x1b1   : > { %v1559_v55 = vpack.c.bf16 %v720_v27, %v682_v16  ;;  %vm6356_vm15 = vcmask 285696   ;;  %v643_v28 = vsel %vm6358_vm11, %v6357_v29, %v3587_v48  ;;  %vm6359_vm14 = vcmask 867328  }
 0x1b2   : > { %2067 = vmatpush.bf16.msrb.mxu2 %v1593_v1  ;;  %2034 = vmatpush.bf16.msrb.mxu0 %v1565_v40  ;;  %v681_v33 = vsel %vm6353_vm10, %v6352_v10, %v3607_v25  ;;  %v606_v12 = vsel %vm6359_vm14, %v3567_v39, %v3568_v14  ;;  %v644_v35 = vsel %vm6360_vm12, %v3587_v48, %v3588_v9  ;;  %v1241_v25 = vunpack.c.l.bf16 %v1230_v51  ;;  %vm6363_vm10 = vmmov %vm6359_vm14  ;;  %v5219_v40 = vpop.permute.xlu2 %3710 }
 0x1b3   : > { %2092 = vmatpush.bf16.msrb.mxu1 %v1566_v30  ;;  %v1558_v52 = vpack.c.bf16 %v719_v44, %v681_v33  ;;  %v605_v26 = vsel %vm6363_vm10, %v6362_v36, %v3567_v39  ;;  %v6364_v46 = vrot.slane %v4989_v17, 4  ;;  %v1552_v14 = vpack.c.bf16 %v644_v35, %v606_v12  ;;  %v6366_v17 = vld [vmem:[#allocation10_spill] sm:$0xff] }
 0x1b4   : > { %v1138_v1 = vpop.permute.xlu1 %1137  ;;  %v5191_v58 = vpop.f32.mrf.mxu0  ;;  %v1551_v43 = vpack.c.bf16 %v643_v28, %v605_v26  ;;  %v3468_v39 = vunpack.i.h.bf16 %v6365_v23  ;;  %v3467_v20 = vunpack.i.l.bf16 %v6365_v23  ;;  %v3448_v44 = vunpack.i.h.bf16 %v6366_v17  ;;  %v6374_v28 = vld [vmem:[#allocation9_spill] sm:$0xff]  ;;  %v6380_v36 = vld [vmem:[#allocation18_spill] sm:$0xff] }
 0x1b5   : > { %v1258_v8 = vpop.permute.xlu0 %1257  ;;  %v5197_v63 = vpop.f32.mrf.mxu2  ;;  %3308 = vmatmul.msk.bf16.gmra.mxu2 %vm1708_vm7, %v4858_v6  ;;  %v1150_v31 = vsel %vm1144_vm4, %v6361_v13, %v1138_v1  ;;  %v1190_v5 = vsel %vm1184_vm5, %v6364_v46, %v5143_v42  ;;  %v3447_v51 = vunpack.i.l.bf16 %v6366_v17  ;;  %vm6373_vm4 = vcmask 965632   ;;  %v6377_v13 = vld [vmem:[#allocation21_spill] sm:$0xff] }
 0x1b6   : > { %2068 = vmatpush.bf16.msrb.mxu2 %v1586_v56  ;;  %v1270_v32 = vsel %vm6356_vm15, %v6355_v18, %v1258_v8  ;;  %2035 = vmatpush.bf16.msrb.mxu0 %v1558_v52  ;;  %v1161_v48 = vunpack.c.l.bf16 %v1150_v31  ;;  %v1201_v49 = vunpack.c.l.bf16 %v1190_v5  ;;  %v6368_v8 = vld [vmem:[#allocation27_spill] sm:$0xff]  ;;  %v6370_v52 = vld [vmem:[#allocation30_spill] sm:$0xff]  ;;  %v416_v29 = vsel %vm6373_vm4, %v3467_v20, %v3468_v39  ;;  %vm6375_vm5 = vmmov %vm6373_vm4 }
 0x1b7   : > { %v1281_v38 = vunpack.c.l.bf16 %v1270_v32  ;;  %2093 = vmatpush.bf16.msrb.mxu1 %v1559_v55  ;;  %v6371_v55 = vld [vmem:[#allocation29_spill] sm:$0xff]  ;;  %v3428_v59 = vunpack.i.h.bf16 %v6374_v28  ;;  %v415_v12 = vsel %vm6375_vm5, %v3463_v37, %v3467_v20  ;;  %v6378_v31 = vld [vmem:[#allocation16_spill] sm:$0xff]  ;;  %v6383_v5 = vrot.slane %v5057_v11, 4 }
 0x1b8   : > { %v1601_v33 = vpack.c.bf16 %v1201_v49, %v1161_v48  ;;  %v6372_v18 = vpack.c.bf16 %v6370_v52, %v6371_v55  ;;  %v6381_v26 = vld [vmem:[#allocation17_spill] sm:$0xff]  ;;  %v6386_v20 = vrot.slane %v4916_v4, 4 }
 0x1b9   : > { %v1608_v9 = vpack.c.bf16 %v1281_v38, %v1241_v25  ;;  %v3712_v25 = vunpack.i.l.bf16 %v5219_v40  ;;  %v6379_v38 = vpack.c.bf16 %v6377_v13, %v6378_v31  ;;  %v6382_v46 = vpack.c.bf16 %v6380_v36, %v6381_v26 }
 0x1ba   : > { %2036 = vmatpush.bf16.msrb.mxu0 %v1551_v43  ;;  %v990_v43 = vsel %vm984_vm6, %v6383_v5, %v5170_v45  ;;  %v5263_v53 = vpop.permute.xlu2 %1644  ;;  %v6387_v45 = vunpack.i.h.bf16 %v6316_v47  ;;  %vm6388_vm6 = vcmask 1039360  }
 0x1bb   : > { %2094 = vmatpush.bf16.msrb.mxu1 %v1552_v14  ;;  %2123 = vmatpush.bf16.msrb.mxu3 %v1608_v9  ;;  %v6384_v14 = vunpack.i.h.bf16 %v6310_v3  ;;  %vm6389_vm9 = vmmov %vm6388_vm6 }
 0x1bc   : > { %v1098_v30 = vpop.permute.xlu1 %1097  ;;  %v5221_v56 = vpop.f32.mrf.mxu0  ;;  %3311 = vmatmul.msk.bf16.vlgmr.msra.gmra.mxu3 %vm1708_vm7, %v4769_v0 }
 0x1bd   : > { %v1110_v42 = vsel %vm1104_vm3, %v1102_v62, %v1098_v30  ;;  %v1058_v27 = vpop.permute.xlu0 %1057  ;;  %v5229_v50 = vpop.f32.mrf.mxu2  ;;  %v6369_v62 = vpack.c.bf16 %v6367_v15, %v6368_v8  ;;  %v6393_v15 = vunpack.c.l.bf16 %v3883_v7 }
 0x1be   : > { %1935 = vmatmul.bf16.gmra.mxu0 %v4591_v34  ;;  %v1121_v1 = vunpack.c.l.bf16 %v1110_v42  ;;  %v1070_v10 = vsel %vm1064_vm1, %v1062_v21, %v1058_v27  ;;  %v3427_v21 = vunpack.i.l.bf16 %v6374_v28  ;;  %vm6376_vm1 = vcmask 1031168  }
 0x1bf   : > { %v1081_v16 = vunpack.c.l.bf16 %v1070_v10  ;;  %2037 = vmatpush.bf16.msrb.mxu0 %v6369_v62  ;;  %2095 = vmatpush.bf16.msrb.mxu1 %v6372_v18  ;;  %v378_v35 = vsel %vm6376_vm1, %v3447_v51, %v3448_v44  ;;  %vm6385_vm3 = vmmov %vm6376_vm1  ;;  %v1001_v42 = vunpack.c.l.bf16 %v990_v43 }
 0x1c0   : > { %2124 = vmatpush.bf16.msrb.mxu3 %v1601_v33  ;;  %1983 = vmatmul.bf16.vlgmr.msra.gmra.mxu1 %v4468_v2  ;;  %v377_v9 = vsel %vm6385_vm3, %v6384_v14, %v3447_v51  ;;  %v1531_v39 = vpack.c.bf16 %v416_v29, %v378_v35  ;;  %v339_v3 = vsel %vm6388_vm6, %v6387_v45, %v3427_v21  ;;  %v6390_v51 = vunpack.i.h.bf16 %v5113_v41 }
 0x1c1   : > { %v1594_v32 = vpack.c.bf16 %v1121_v1, %v1081_v16  ;;  %v1530_v23 = vpack.c.bf16 %v415_v12, %v377_v9  ;;  %v340_v44 = vsel %vm6389_vm9, %v3427_v21, %v3428_v59  ;;  %v6391_v1 = vunpack.i.h.bf16 %v5109_v54 }
 0x1c2   : > { %v6392_v16 = vunpack.c.h.bf16 %v6333_v57  ;;  %v1524_v8 = vpack.c.bf16 %v340_v44, %v6393_v15  ;;  %v5298_v57 = vpop.permute.xlu2 %1654  ;;  %v3713_v29 = vunpack.i.h.bf16 %v5219_v40 }
 0x1c3   : > { %2038 = vmatpush.bf16.msrb.mxu0 %v6379_v38  ;;  %2096 = vmatpush.bf16.msrb.mxu1 %v6382_v46  ;;  %v947_v10 = vsel %vm941_vm8, %v6391_v1, %v3712_v25 }
 0x1c4   : > { %2125 = vmatpush.bf16.msrb.mxu3 %v1594_v32  ;;  %v3706_v37 = vpop.permute.xlu1 %3705  ;;  %v5268_v30 = vpop.f32.mrf.mxu0  ;;  %v1523_v47 = vpack.c.bf16 %v339_v3, %v6392_v16  ;;  %v948_v38 = vsel %vm941_vm8, %v3712_v25, %v3713_v29 }
 0x1c5   : > { %v3707_v48 = vunpack.i.l.bf16 %v3706_v37  ;;  %v1018_v49 = vpop.permute.xlu0 %1017  ;;  %v5273_v17 = vpop.f32.mrf.mxu2  ;;  %3309 = vmatmul.msk.bf16.gmra.mxu2 %vm1708_vm7, %v4618_v24  ;;  %v3708_v28 = vunpack.i.h.bf16 %v3706_v37 }
 0x1c6   : > { %v1030_v11 = vsel %vm1024_vm0, %v6386_v20, %v1018_v49 }
 0x1c7   : > { %v1041_v27 = vunpack.c.l.bf16 %v1030_v11  ;;  %2039 = vmatpush.bf16.msrb.mxu0 %v1530_v23  ;;  %2097 = vmatpush.bf16.msrb.mxu1 %v1531_v39  ;;  %v909_v4 = vsel %vm903_vm2, %v6390_v51, %v3707_v48  ;;  %v910_v31 = vsel %vm903_vm2, %v3707_v48, %v3708_v28 }
 0x1c8   : > { %v1579_v33 = vpack.c.bf16 %v947_v10, %v909_v4  ;;  %v1580_v36 = vpack.c.bf16 %v948_v38, %v910_v31 }
 0x1c9   : > { %v1587_v62 = vpack.c.bf16 %v1041_v27, %v1001_v42 }
 0x1ca   : > { %2069 = vmatpush.bf16.msrb.mxu2 %v1579_v33  ;;  %v1791_v55 = vpop.f32.mrf.mxu1  ;;  %v5352_v1 = vpop.permute.xlu2 %1669 }
 0x1cb   : > { %2040 = vmatpush.bf16.msrb.mxu0 %v1523_v47  ;;  %2098 = vmatpush.bf16.msrb.mxu1 %v1524_v8  ;;  %v1816_v8 = vadd.f32 %v5229_v50, %v5263_v53 }
 0x1cc   : > { %2126 = vmatpush.bf16.msrb.mxu3 %v1587_v62  ;;  %v5291_v52 = vpop.permute.xlu1 %1639  ;;  %v5293_v41 = vpop.f32.mrf.mxu0 }
 0x1cd   : > { %3312 = vmatmul.msk.bf16.gmra.mxu3 %vm1708_vm7, %v4858_v6  ;;  %v1820_v54 = vpop.f32.mrf.mxu2  ;;  %v5334_v39 = vpop.permute.xlu0 %1634  ;;  %v1813_v42 = vadd.f32 %v5197_v63, %v5291_v52 }
 0x1ce   : > { %1940 = vmatmul.bf16.gmra.mxu0 %v4666_v19  ;;  %v1821_v7 = vadd.f32 %v1820_v54, %v5298_v57  ;;  %v1811_v3 = vadd.f32 %v5160_v22, %v5334_v39  ;;  %v1753_v10 = vadd.f32 %v5191_v58, %v5334_v39 }
 0x1d0   : > { %1988 = vmatmul.bf16.gmra.mxu1 %v4537_v60  ;;  %2127 = vmatpush.bf16.msrb.mxu3 %v1580_v36 }
 0x1d1   : > { %v1849_v18 = vpop.f32.mrf.mxu3 }
 0x1d2   : > { %v5302_v32 = vadd.f32 %v1849_v18, %v1821_v7  ;;  %v5321_v46 = vpop.f32.mrf.mxu1  ;;  %v5375_v36 = vpop.permute.xlu2 %2337 }
 0x1d4   : > { %v5305_v59 = vpop.permute.xlu1 %1649  ;;  %v1762_v21 = vpop.f32.mrf.mxu0  ;;  %vm2178_vm10 = vcmp.ge.f32.partialorder %v5302_v32, 0.0 }
 0x1d5   : > { %v1763_v12 = vadd.f32 %v1762_v21, %v5298_v57  ;;  %v1822_v35 = vpop.f32.mrf.mxu2  ;;  %3310 = vmatmul.msk.bf16.gmra.mxu2 %vm1708_vm7, %v4709_v61  ;;  %v5346_v44 = vpop.permute.xlu0 %1659 }
 0x1d6   : > { %v1823_v50 = vadd.f32 %v1822_v35, %v5346_v44 }
 0x1d7   : > { %v5310_v13 = vadd.f32 %v1791_v55, %v1763_v12  ;;  %v1755_v55 = vadd.f32 %v5221_v56, %v5291_v52 }
 0x1d9   : > { %v5314_v26 = vpop.f32.mrf.mxu3  ;;  %vm2177_vm1 = vcmp.ge.f32.partialorder %v5310_v13, 0.0 }
 0x1da   : > { %v1852_v35 = vadd.f32 %v5314_v26, %v1823_v50 }
 0x1db   : > { %v1796_v23 = vpop.f32.mrf.mxu1 }
 0x1dc   : > { %v5316_v40 = vpop.f32.mrf.mxu0  ;;  %v5323_v43 = vpop.permute.xlu1 %1664  ;;  %vm2185_vm14 = vcmp.ge.f32.partialorder %v1852_v35, 0.0 }
 0x1dd   : > { %3313 = vmatmul.msk.bf16.gmra.mxu3 %vm1708_vm7, %v4618_v24  ;;  %v1825_v5 = vpop.f32.mrf.mxu2  ;;  %v5362_v62 = vpop.permute.xlu0 %2327  ;;  %v1765_v26 = vadd.f32 %v5316_v40, %v5346_v44 }
 0x1de   : > { %2041 = vmatmul.bf16.vlgmr.msrb.gmra.mxu0 %v4468_v2  ;;  %v1826_v37 = vadd.f32 %v1825_v5, %v5323_v43 }
 0x1e0   : > { %1993 = vmatmul.bf16.gmra.mxu1 %v4591_v34 }
 0x1e1   : > { %v1854_v25 = vpop.f32.mrf.mxu3 }
 0x1e2   : > { %v5327_v14 = vadd.f32 %v1854_v25, %v1826_v37 }
 0x1e3   : > { %v5350_v51 = vpop.f32.mrf.mxu1 }
 0x1e4   : > { %v1767_v9 = vpop.f32.mrf.mxu0  ;;  %v5364_v54 = vpop.permute.xlu1 %2332  ;;  %vm2192_vm5 = vcmp.ge.f32.partialorder %v5327_v14, 0.0 }
 0x1e5   : > { %v1768_v48 = vadd.f32 %v1767_v9, %v5323_v43  ;;  %v5330_v49 = vpop.f32.mrf.mxu2  ;;  %3315 = vmatmul.msk.bf16.vlgmr.msrb.gmra.mxu2 %vm1708_vm7, %v4769_v0 }
 0x1e7   : > { %v5336_v20 = vadd.f32 %v1796_v23, %v1768_v48 }
 0x1e9   : > { %v5358_v47 = vpop.f32.mrf.mxu3 }
 0x1ec   : > { %v5338_v11 = vpop.f32.mrf.mxu0 }
 0x1ed   : > { %3314 = vmatmul.msk.bf16.gmra.mxu3 %vm1708_vm7, %v4709_v61  ;;  %v1839_v45 = vpop.f32.mrf.mxu2 }
 0x1ee   : > { %2046 = vmatmul.bf16.gmra.mxu0 %v4537_v60  ;;  %v1840_v27 = vadd.f32 %v1839_v45, %v1811_v3  ;;  %v1818_v3 = vadd.f32 %v5273_v17, %v5305_v59  ;;  %v5397_v17 = vpop.permute.xlu0 %2342 }
 0x1f0   : > { %1998 = vmatmul.bf16.gmra.mxu1 %v4666_v19  ;;  %v2206_v16 = vmul.f32 0.01, %v1840_v27  ;;  %vm2150_vm0 = vcmp.ge.f32.partialorder %v1840_v27, 0.0 }
 0x1f2   : > { %v2262_v58 = vsel %vm2150_vm0, %v1840_v27, %v2206_v16  ;;  %vm2191_vm0 = vcmp.ge.f32.partialorder %v5336_v20, 0.0 }
 0x1f3   : > { %v2366_v31 = vmul.f32 %v5362_v62, %v2262_v58 }
 0x1f4   : > { %v1781_v4 = vpop.f32.mrf.mxu0 }
 0x1f5   : > { %v1841_v33 = vpop.f32.mrf.mxu2  ;;  %3316 = vmatmul.msk.bf16.gmra.mxu2 %vm1708_vm7, %v4858_v6  ;;  %v1782_v15 = vadd.f32 %v1781_v4, %v1753_v10 }
 0x1f6   : > { %v1842_v22 = vadd.f32 %v1841_v33, %v1813_v42  ;;  %v1758_v42 = vadd.f32 %v5268_v30, %v5263_v53  ;;  %v1828_v30 = vadd.f32 %v5330_v49, %v5352_v1 }
 0x1f7   : > { %v2205_v7 = vmul.f32 0.01, %v1782_v15  ;;  %vm2149_vm8 = vcmp.ge.f32.partialorder %v1782_v15, 0.0 }
 0x1f8   : > { %v2213_v63 = vmul.f32 0.01, %v1842_v22  ;;  %vm2157_vm2 = vcmp.ge.f32.partialorder %v1842_v22, 0.0 }
 0x1f9   : > { %v2261_v56 = vsel %vm2149_vm8, %v1782_v15, %v2205_v7  ;;  %v2234_v7 = vmul.f32 0.01, %v5302_v32 }
 0x1fa   : > { %v2269_v18 = vsel %vm2157_vm2, %v1842_v22, %v2213_v63  ;;  %v2365_v48 = vmul.f32 %v5362_v62, %v2261_v56  ;;  %v2241_v22 = vmul.f32 0.01, %v1852_v35 }
 0x1fb   : > { %v2373_v5 = vmul.f32 %v5364_v54, %v2269_v18 }
 0x1fc   : > { %v1783_v29 = vpop.f32.mrf.mxu0  ;;  %v5368_v28 = vpop.f32.mrf.mxu1  ;;  %v2297_v50 = vsel %vm2185_vm14, %v1852_v35, %v2241_v22 }
 0x1fd   : > { %3319 = vmatmul.msk.bf16.vlgmr.msrb.gmra.mxu3 %vm1708_vm7, %v4769_v0  ;;  %v1784_v21 = vadd.f32 %v1783_v29, %v1755_v55  ;;  %v1844_v12 = vpop.f32.mrf.mxu2  ;;  %v2434_v27 = vadd.f32 %v2373_v5, %v2366_v31  ;;  %v1794_v29 = vadd.f32 %v5321_v46, %v1765_v26  ;;  %v2248_v31 = vmul.f32 0.01, %v5327_v14  ;;  %v5442_v26 = vpop.permute.xlu0 %2357 }
 0x1fe   : > { %2051 = vmatmul.bf16.gmra.mxu0 %v4591_v34  ;;  %v1845_v38 = vadd.f32 %v1844_v12, %v1816_v8  ;;  %v5399_v8 = vpop.permute.xlu1 %2347  ;;  %v1760_v12 = vadd.f32 %v5293_v41, %v5305_v59  ;;  %v1770_v46 = vadd.f32 %v5338_v11, %v5352_v1  ;;  %v2233_v41 = vmul.f32 0.01, %v5310_v13 }
 0x1ff   : > { %vm2156_vm15 = vcmp.ge.f32.partialorder %v1784_v21, 0.0  ;;  %v2212_v37 = vmul.f32 0.01, %v1784_v21  ;;  %v5378_v25 = vpop.f32.mrf.mxu3  ;;  %vm2184_vm3 = vcmp.ge.f32.partialorder %v1794_v29, 0.0 }
 0x200   : > { %2099 = vmatmul.bf16.vlgmr.msrb.gmra.mxu1 %v4468_v2  ;;  %vm2164_vm11 = vcmp.ge.f32.partialorder %v1845_v38, 0.0  ;;  %v2220_v0 = vmul.f32 0.01, %v1845_v38 }
 0x201   : > { %v2268_v9 = vsel %vm2156_vm15, %v1784_v21, %v2212_v37  ;;  %v5406_v21 = vpop.permute.xlu2 %2352  ;;  %v2290_v37 = vsel %vm2178_vm10, %v5302_v32, %v2234_v7 }
 0x202   : > { %v2372_v23 = vmul.f32 %v5364_v54, %v2268_v9  ;;  %v2276_v45 = vsel %vm2164_vm11, %v1845_v38, %v2220_v0  ;;  %v1857_v38 = vadd.f32 %v5358_v47, %v1828_v30  ;;  %v2401_v9 = vmul.f32 %v5406_v21, %v2297_v50 }
 0x203   : > { %v2380_v4 = vmul.f32 %v5375_v36, %v2276_v45  ;;  %v2394_v32 = vmul.f32 %v5399_v8, %v2290_v37  ;;  %v2240_v45 = vmul.f32 0.01, %v1794_v29  ;;  %v5467_v37 = vld [vmem:[%s6107_s5 + $0x8] sm:$0xff] }
 0x204   : > { %v2421_v2 = vadd.f32 %v2372_v23, %v2365_v48  ;;  %v1786_v10 = vpop.f32.mrf.mxu0  ;;  %v5389_v33 = vpop.f32.mrf.mxu1  ;;  %vm2199_vm6 = vcmp.ge.f32.partialorder %v1857_v38, 0.0 }
 0x205   : > { %v2435_v16 = vadd.f32 %v2434_v27, %v2380_v4  ;;  %v1787_v15 = vadd.f32 %v1786_v10, %v1758_v42  ;;  %v1846_v63 = vpop.f32.mrf.mxu2  ;;  %3317 = vmatmul.msk.bf16.gmra.mxu2 %vm1708_vm7, %v4618_v24  ;;  %v2255_v42 = vmul.f32 0.01, %v1857_v38  ;;  %v5433_v27 = vld [vmem:[%s6107_s5] sm:$0xff] }
 0x206   : > { %v1847_v58 = vadd.f32 %v1846_v63, %v1818_v3  ;;  %v2304_v3 = vsel %vm2192_vm5, %v5327_v14, %v2248_v31  ;;  %v2289_v14 = vsel %vm2177_vm1, %v5310_v13, %v2233_v41  ;;  %v5444_v22 = vpop.permute.xlu1 %2362  ;;  %v2712_v50 = vperm.slane %v5433_v27, 4 }
 0x207   : > { %vm2163_vm12 = vcmp.ge.f32.partialorder %v1787_v15, 0.0  ;;  %v2219_v40 = vmul.f32 0.01, %v1787_v15  ;;  %v5402_v55 = vpop.f32.mrf.mxu3  ;;  %v2713_v41 = vperm.slane %v5467_v37, 0 }
 0x208   : > { %vm2171_vm4 = vcmp.ge.f32.partialorder %v1847_v58, 0.0  ;;  %v2227_v18 = vmul.f32 0.01, %v1847_v58  ;;  %2719 = vrot.lane.b32.xlu1 %v2712_v50, %s3800_s15 }
 0x209   : > { %v2275_v49 = vsel %vm2163_vm12, %v1787_v15, %v2219_v40  ;;  %v2247_v15 = vmul.f32 0.01, %v5336_v20  ;;  %2721 = vrot.lane.b32.xlu2 %v2713_v41, %s3800_s15 }
 0x20a   : > { %v2379_v56 = vmul.f32 %v5375_v36, %v2275_v49  ;;  %v2283_v5 = vsel %vm2171_vm4, %v1847_v58, %v2227_v18  ;;  %v2296_v58 = vsel %vm2184_vm3, %v1794_v29, %v2240_v45  ;;  %v2393_v49 = vmul.f32 %v5399_v8, %v2289_v14 }
 0x20b   : > { %v2387_v0 = vmul.f32 %v5397_v17, %v2283_v5  ;;  %v2303_v31 = vsel %vm2191_vm0, %v5336_v20, %v2247_v15  ;;  %v2714_v20 = vperm.slane %v5467_v37, 4  ;;  %v1869_v14 = vadd.f32 %v5368_v28, %v5334_v39 }
 0x20c   : > { %v2422_v35 = vadd.f32 %v2421_v2, %v2379_v56  ;;  %v1788_v47 = vpop.f32.mrf.mxu0  ;;  %v5421_v48 = vpop.f32.mrf.mxu1 }
 0x20d   : > { %3320 = vmatmul.msk.bf16.gmra.mxu3 %vm1708_vm7, %v4858_v6  ;;  %v2436_v11 = vadd.f32 %v2435_v16, %v2387_v0  ;;  %v1789_v23 = vadd.f32 %v1788_v47, %v1760_v12  ;;  %v1799_v6 = vadd.f32 %v5350_v51, %v1770_v46  ;;  %v2711_v16 = vperm.slane %v5433_v27, 0 }
 0x20e   : > { %2056 = vmatmul.bf16.gmra.mxu0 %v4666_v19  ;;  %v2408_v51 = vmul.f32 %v5442_v26, %v2304_v3 }
 0x20f   : > { %v2437_v4 = vadd.f32 %v2436_v11, %v2394_v32  ;;  %vm2170_vm9 = vcmp.ge.f32.partialorder %v1789_v23, 0.0  ;;  %v2226_v2 = vmul.f32 0.01, %v1789_v23  ;;  %v5436_v10 = vpop.f32.mrf.mxu3  ;;  %2717 = vrot.lane.b32.xlu0 %v2711_v16, %s3800_s15  ;;  %v2254_v7 = vmul.f32 0.01, %v1799_v6 }
 0x210   : > { %2104 = vmatmul.bf16.gmra.mxu1 %v4537_v60  ;;  %v2311_v60 = vsel %vm2199_vm6, %v1857_v38, %v2255_v42  ;;  %vm2198_vm2 = vcmp.ge.f32.partialorder %v1799_v6, 0.0  ;;  %v2400_v38 = vmul.f32 %v5406_v21, %v2296_v58  ;;  %v1871_v42 = vadd.f32 %v5389_v33, %v5291_v52 }
 0x211   : > { %v2438_v63 = vadd.f32 %v2437_v4, %v2401_v9  ;;  %v2282_v30 = vsel %vm2170_vm9, %v1789_v23, %v2226_v2  ;;  %v2415_v40 = vmul.f32 %v5444_v22, %v2311_v60  ;;  %v2310_v46 = vsel %vm2198_vm2, %v1799_v6, %v2254_v7 }
 0x212   : > { %v2386_v13 = vmul.f32 %v5397_v17, %v2282_v30  ;;  %v2414_v32 = vmul.f32 %v5444_v22, %v2310_v46  ;;  %v2793_v23 = vperm.slane %v5433_v27, 5  ;;  %v2794_v4 = vperm.slane %v5467_v37, 1 }
 0x213   : > { %v2439_v18 = vadd.f32 %v2438_v63, %v2408_v51  ;;  %v2792_v2 = vperm.slane %v5433_v27, 1  ;;  %v1900_v33 = vadd.f32 %v5402_v55, %v1871_v42  ;;  %v1898_v63 = vadd.f32 %v5378_v25, %v1869_v14 }
 0x214   : > { %v2423_v12 = vadd.f32 %v2422_v35, %v2386_v13  ;;  %v1875_v29 = vpop.f32.mrf.mxu1  ;;  %v2407_v35 = vmul.f32 %v5442_v26, %v2303_v31  ;;  %2801 = vrot.lane.b32.xlu1 %v2793_v23, %s3801_s8  ;;  %2803 = vrot.lane.b32.xlu2 %v2794_v4, %s3801_s8  ;;  %v2795_v55 = vperm.slane %v5467_v37, 5 }
 0x215   : > { %v5458_v56 = vadd.f32 %v2439_v18, %v2415_v40  ;;  %3318 = vmatmul.msk.bf16.gmra.mxu2 %vm1708_vm7, %v4709_v61  ;;  %v1876_v15 = vadd.f32 %v1875_v29, %v5305_v59  ;;  %v2214_v58 = vmul.f32 0.01, %v1900_v33  ;;  %vm2158_vm8 = vcmp.ge.f32.partialorder %v1900_v33, 0.0 }
 0x216   : > { %v2424_v5 = vadd.f32 %v2423_v12, %v2393_v49  ;;  %v2207_v18 = vmul.f32 0.01, %v1898_v63  ;;  %vm2151_vm15 = vcmp.ge.f32.partialorder %v1898_v63, 0.0 }
 0x217   : > { %v1904_v0 = vpop.f32.mrf.mxu3  ;;  %2723 = vrot.lane.b32.xlu0 %v2714_v20, %s3800_s15  ;;  %v2270_v12 = vsel %vm2158_vm8, %v1900_v33, %v2214_v58 }
 0x218   : > { %v2425_v9 = vadd.f32 %v2424_v5, %v2400_v38  ;;  %v2263_v5 = vsel %vm2151_vm15, %v1898_v63, %v2207_v18 }
 0x21a   : > { %v2426_v11 = vadd.f32 %v2425_v9, %v2407_v35 }
 0x21b   : > { %v1926_v47 = vpop.f32.mrf.mxu0 }
 0x21c   : > { %v5476_v45 = vadd.f32 %v2426_v11, %v2414_v32  ;;  %v1878_v3 = vpop.f32.mrf.mxu1  ;;  %v1927_v60 = vadd.f32 %v1926_v47, %v5334_v39  ;;  %2805 = vrot.lane.b32.xlu2 %v2795_v55, %s3801_s8  ;;  %v2367_v11 = vmul.f32 %v5362_v62, %v2263_v5 }
 0x21d   : > { %3321 = vmatmul.msk.bf16.gmra.mxu3 %vm1708_vm7, %v4618_v24  ;;  %v1874_v24 = vadd.f32 %v5421_v48, %v5263_v53  ;;  %v1879_v30 = vadd.f32 %v1878_v3, %v5298_v57  ;;  %v1905_v48 = vadd.f32 %v1904_v0, %v1876_v15  ;;  %v2374_v0 = vmul.f32 %v5364_v54, %v2270_v12 }
 0x21f   : > { %v1907_v6 = vpop.f32.mrf.mxu3  ;;  %2799 = vrot.lane.b32.xlu0 %v2792_v2, %s3801_s8  ;;  %v1903_v28 = vadd.f32 %v5436_v10, %v1874_v24  ;;  %v2228_v29 = vmul.f32 0.01, %v1905_v48  ;;  %vm2172_vm14 = vcmp.ge.f32.partialorder %v1905_v48, 0.0  ;;  %v2447_v2 = vadd.f32 %v2374_v0, %v2367_v11 }
 0x220   : > { %2109 = vmatmul.bf16.gmra.mxu1 %v4591_v34  ;;  %v2875_v34 = vperm.slane %v5433_v27, 2  ;;  %v1908_v49 = vadd.f32 %v1907_v6, %v1879_v30 }
 0x221   : > { %v2221_v10 = vmul.f32 0.01, %v1903_v28  ;;  %vm2165_vm11 = vcmp.ge.f32.partialorder %v1903_v28, 0.0  ;;  %v2284_v35 = vsel %vm2172_vm14, %v1905_v48, %v2228_v29 }
 0x222   : > { %2882 = vrot.lane.b32.xlu1 %v2875_v34, %s3802_s14  ;;  %v2235_v20 = vmul.f32 0.01, %v1908_v49  ;;  %vm2179_vm12 = vcmp.ge.f32.partialorder %v1908_v49, 0.0  ;;  %v2388_v14 = vmul.f32 %v5397_v17, %v2284_v35 }
 0x223   : > { %v1928_v16 = vpop.f32.mrf.mxu0  ;;  %v2277_v41 = vsel %vm2165_vm11, %v1903_v28, %v2221_v10 }
 0x224   : > { %v1880_v51 = vpop.f32.mrf.mxu1  ;;  %v1929_v9 = vadd.f32 %v1928_v16, %v5291_v52  ;;  %v2381_v42 = vmul.f32 %v5375_v36, %v2277_v41  ;;  %v2291_v16 = vsel %vm2179_vm12, %v1908_v49, %v2235_v20 }
 0x225   : > { %v1881_v7 = vadd.f32 %v1880_v51, %v5346_v44  ;;  %v2395_v63 = vmul.f32 %v5399_v8, %v2291_v16  ;;  %v2516_v16 = vpop.permute.xlu2 %2515 }
 0x226   : > { %v2448_v51 = vadd.f32 %v2447_v2, %v2381_v42 }
 0x227   : > { %v1909_v13 = vpop.f32.mrf.mxu3 }
 0x228   : > { %v1955_v40 = vpop.f32.mrf.mxu2  ;;  %v1910_v31 = vadd.f32 %v1909_v13, %v1881_v7  ;;  %v2449_v13 = vadd.f32 %v2448_v51, %v2388_v14  ;;  %v5534_v51 = vperm.slane %v2516_v16, 0 }
 0x229   : > { %v1956_v25 = vadd.f32 %v1955_v40, %v1927_v60 }
 0x22a   : > { %v2242_v23 = vmul.f32 0.01, %v1910_v31  ;;  %v2450_v10 = vadd.f32 %v2449_v13, %v2395_v63 }
 0x22b   : > { %v5502_v50 = vpop.f32.mrf.mxu0  ;;  %v2208_v47 = vmul.f32 0.01, %v1956_v25  ;;  %vm2152_vm10 = vcmp.ge.f32.partialorder %v1956_v25, 0.0 }
 0x22c   : > { %v1883_v38 = vpop.f32.mrf.mxu1 }
 0x22d   : > { %3322 = vmatmul.msk.bf16.gmra.mxu3 %vm1708_vm7, %v4709_v61  ;;  %v1884_v46 = vadd.f32 %v1883_v38, %v5323_v43  ;;  %vm2186_vm7 = vcmp.ge.f32.partialorder %v1910_v31, 0.0  ;;  %v2264_v33 = vsel %vm2152_vm10, %v1956_v25, %v2208_v47 }
 0x22e   : > { %v2298_v15 = vsel %vm2186_vm7, %v1910_v31, %v2242_v23  ;;  %v2368_v58 = vmul.f32 %v5362_v62, %v2264_v33 }
 0x22f   : > { %v1912_v32 = vpop.f32.mrf.mxu3  ;;  %v2402_v55 = vmul.f32 %v5406_v21, %v2298_v15 }
 0x230   : > { %2114 = vmatmul.bf16.gmra.mxu1 %v4666_v19  ;;  %v1913_v61 = vadd.f32 %v1912_v32, %v1884_v46  ;;  %v1957_v3 = vpop.f32.mrf.mxu2  ;;  %v2428_v46 = vrot.slane %v5476_v45, 4 }
 0x231   : > { %v1958_v6 = vadd.f32 %v1957_v3, %v1929_v9  ;;  %v2451_v31 = vadd.f32 %v2450_v10, %v2402_v55  ;;  %v2441_v3 = vrot.slane %v5458_v56, 4 }
 0x232   : > { %v2249_v24 = vmul.f32 0.01, %v1913_v61  ;;  %vm2193_vm4 = vcmp.ge.f32.partialorder %v1913_v61, 0.0  ;;  %v2429_v47 = vadd.f32 %v2428_v46, %v5476_v45 }
 0x233   : > { %v5513_v4 = vpop.f32.mrf.mxu0  ;;  %vm2159_vm5 = vcmp.ge.f32.partialorder %v1958_v6, 0.0  ;;  %v2215_v19 = vmul.f32 0.01, %v1958_v6  ;;  %v2442_v33 = vadd.f32 %v2441_v3, %v5458_v56 }
 0x234   : > { %v1885_v34 = vpop.f32.mrf.mxu1  ;;  %v2305_v48 = vsel %vm2193_vm4, %v1913_v61, %v2249_v24  ;;  %v2430_v42 = vrot.slane %v2429_v47, 2 }
 0x235   : > { %v2271_v28 = vsel %vm2159_vm5, %v1958_v6, %v2215_v19  ;;  %v1886_v30 = vadd.f32 %v1885_v34, %v5352_v1  ;;  %v2409_v49 = vmul.f32 %v5442_v26, %v2305_v48 }
 0x236   : > { %v2375_v60 = vmul.f32 %v5364_v54, %v2271_v28  ;;  %v2431_v19 = vadd.f32 %v2430_v42, %v2429_v47  ;;  %v2443_v28 = vrot.slane %v2442_v33, 2 }
 0x237   : > { %v1914_v7 = vpop.f32.mrf.mxu3  ;;  %v2452_v0 = vadd.f32 %v2451_v31, %v2409_v49  ;;  %v1932_v49 = vadd.f32 %v5502_v50, %v5263_v53 }
 0x238   : > { %v5522_v40 = vadd.f32 %v2375_v60, %v2368_v58  ;;  %v1915_v18 = vadd.f32 %v1914_v7, %v1886_v30  ;;  %v1960_v25 = vpop.f32.mrf.mxu2  ;;  %v2432_v30 = vrot.slane %v2431_v19, 1  ;;  %v2444_v60 = vadd.f32 %v2443_v28, %v2442_v33 }
 0x239   : > { %v1961_v31 = vadd.f32 %v1960_v25, %v1932_v49 }
 0x23a   : > { %vm2200_vm1 = vcmp.ge.f32.partialorder %v1915_v18, 0.0  ;;  %v2256_v29 = vmul.f32 0.01, %v1915_v18  ;;  %v2433_v13 = vadd.f32 %v2432_v30, %v2431_v19  ;;  %v2876_v30 = vperm.slane %v5433_v27, 6 }
 0x23b   : > { %v5525_v12 = vpop.f32.mrf.mxu0  ;;  %vm2166_vm3 = vcmp.ge.f32.partialorder %v1961_v31, 0.0 }
 0x23c   : > { %v2312_v38 = vsel %vm2200_vm1, %v1915_v18, %v2256_v29  ;;  %v2445_v18 = vrot.slane %v2444_v60, 1  ;;  %v5546_v10 = vadd.f32 %v5534_v51, %v2433_v13 }
 0x23d   : > { %v1984_v5 = vpop.f32.mrf.mxu1  ;;  %v2416_v41 = vmul.f32 %v5444_v22, %v2312_v38 }
 0x23e   : > { %v2446_v46 = vadd.f32 %v2445_v18, %v2444_v60  ;;  %v1985_v50 = vadd.f32 %v1984_v5, %v5334_v39 }
 0x23f   : > { %v2453_v20 = vadd.f32 %v2452_v0, %v2416_v41  ;;  %v2013_v35 = vpop.f32.mrf.mxu3  ;;  %v1934_v41 = vadd.f32 %v5513_v4, %v5305_v59  ;;  %v1937_v4 = vadd.f32 %v5525_v12, %v5298_v57  ;;  %v2877_v12 = vperm.slane %v5467_v37, 2 }
 0x240   : > { %v1962_v9 = vpop.f32.mrf.mxu2  ;;  %v5563_v25 = vadd.f32 %v5534_v51, %v2446_v46  ;;  %v2014_v5 = vadd.f32 %v2013_v35, %v1985_v50  ;;  %v2878_v35 = vperm.slane %v5467_v37, 6 }
 0x241   : > { %v2454_v32 = vrot.slane %v2453_v20, 4 }
 0x242   : > { %vm2153_vm9 = vcmp.ge.f32.partialorder %v2014_v5, 0.0 }
 0x243   : > { %v5530_v11 = vpop.f32.mrf.mxu0  ;;  %v2455_v23 = vadd.f32 %v2454_v32, %v2453_v20  ;;  %v2222_v20 = vmul.f32 0.01, %v1961_v31  ;;  %v1963_v32 = vadd.f32 %v1962_v9, %v1934_v41 }
 0x245   : > { %v1986_v61 = vpop.f32.mrf.mxu1  ;;  %v2456_v6 = vrot.slane %v2455_v23, 2  ;;  %v2278_v42 = vsel %vm2166_vm3, %v1961_v31, %v2222_v20  ;;  %vm2173_vm6 = vcmp.ge.f32.partialorder %v1963_v32, 0.0 }
 0x246   : > { %v2382_v19 = vmul.f32 %v5375_v36, %v2278_v42 }
 0x247   : > { %v2457_v2 = vadd.f32 %v2456_v6, %v2455_v23  ;;  %v2015_v14 = vpop.f32.mrf.mxu3  ;;  %v1987_v23 = vadd.f32 %v1986_v61, %v5291_v52  ;;  %v2229_v61 = vmul.f32 0.01, %v1963_v32 }
 0x248   : > { %v1965_v24 = vpop.f32.mrf.mxu2  ;;  %v2461_v27 = vadd.f32 %v5522_v40, %v2382_v19 }
 0x249   : > { %v2458_v15 = vrot.slane %v2457_v2, 1  ;;  %v2016_v6 = vadd.f32 %v2015_v14, %v1987_v23  ;;  %v1966_v16 = vadd.f32 %v1965_v24, %v1937_v4  ;;  %v2285_v60 = vsel %vm2173_vm6, %v1963_v32, %v2229_v61 }
 0x24b   : > { %v1941_v34 = vpop.f32.mrf.mxu0  ;;  %v2459_v45 = vadd.f32 %v2458_v15, %v2457_v2  ;;  %v1939_v15 = vadd.f32 %v5530_v11, %v5346_v44  ;;  %v2216_v24 = vmul.f32 0.01, %v2016_v6  ;;  %vm2160_vm0 = vcmp.ge.f32.partialorder %v2016_v6, 0.0 }
 0x24c   : > { %v2236_v18 = vmul.f32 0.01, %v1966_v16  ;;  %vm2180_vm2 = vcmp.ge.f32.partialorder %v1966_v16, 0.0 }
 0x24d   : > { %v1989_v63 = vpop.f32.mrf.mxu1  ;;  %v5537_v58 = vadd.f32 %v5534_v51, %v2459_v45  ;;  %v2209_v45 = vmul.f32 0.01, %v2014_v5  ;;  %v2272_v41 = vsel %vm2160_vm0, %v2016_v6, %v2216_v24  ;;  %vm2681_vm0 = vcmask 818176  }
 0x24e   : > { %v1990_v33 = vadd.f32 %v1989_v63, %v5263_v53  ;;  %v1942_v63 = vadd.f32 %v1941_v34, %v5323_v43  ;;  %v2292_v50 = vsel %vm2180_vm2, %v1966_v16, %v2236_v18 }
 0x24f   : > { %2837 = vrot.lane.b32.xlu1 %v5537_v58, %s3802_s14  ;;  %2753 = vrot.lane.b32.xlu0 %v5537_v58, %s3801_s8 }
 0x250   : > { %v2018_v48 = vpop.f32.mrf.mxu3  ;;  %2673 = vrot.lane.b32.xlu2 %v5537_v58, %s3800_s15  ;;  %v1967_v56 = vpop.f32.mrf.mxu2 }
 0x251   : > { %v1968_v13 = vadd.f32 %v1967_v56, %v1939_v15  ;;  %v2019_v49 = vadd.f32 %v2018_v48, %v1990_v33 }
 0x253   : > { %v1943_v55 = vpop.f32.mrf.mxu0  ;;  %v2243_v20 = vmul.f32 0.01, %v1968_v13  ;;  %vm2187_vm8 = vcmp.ge.f32.partialorder %v1968_v13, 0.0  ;;  %vm2167_vm15 = vcmp.ge.f32.partialorder %v2019_v49, 0.0 }
 0x254   : > { %v1944_v37 = vadd.f32 %v1943_v55, %v5352_v1  ;;  %v5597_v55 = vld [vmem:[%s6107_s5 + $0x18] sm:$0xf] }
 0x255   : > { %v1991_v7 = vpop.f32.mrf.mxu1  ;;  %v2299_v19 = vsel %vm2187_vm8, %v1968_v13, %v2243_v20 }
 0x256   : > { %v1992_v28 = vadd.f32 %v1991_v7, %v5305_v59  ;;  %v2265_v7 = vsel %vm2153_vm9, %v2014_v5, %v2209_v45  ;;  %v2798_v5 = vperm.slane %v5597_v55, 1  ;;  %vm2763_vm9 = vcmask 80896  }
 0x257   : > { %2749 = vrot.lane.b32.xlu1 %v5546_v10, %s3801_s8  ;;  %2669 = vrot.lane.b32.xlu0 %v5546_v10, %s3800_s15 }
 0x258   : > { %v2020_v29 = vpop.f32.mrf.mxu3  ;;  %2833 = vrot.lane.b32.xlu2 %v5546_v10, %s3802_s14  ;;  %v1970_v38 = vpop.f32.mrf.mxu2 }
 0x259   : > { %v1971_v31 = vadd.f32 %v1970_v38, %v1942_v63  ;;  %v2021_v34 = vadd.f32 %v2020_v29, %v1992_v28  ;;  %v2389_v38 = vmul.f32 %v5397_v17, %v2285_v60  ;;  %v5604_v29 = vld [vmem:[%s6107_s5 + $0x10] sm:$0xff]  ;;  %v2376_v28 = vmul.f32 %v5364_v54, %v2272_v41 }
 0x25a   : > { %v2797_v4 = vperm.slane %v5604_v29, 5  ;;  %v2796_v33 = vperm.slane %v5604_v29, 1  ;;  %v2403_v60 = vmul.f32 %v5406_v21, %v2299_v19  ;;  %v2716_v41 = vperm.slane %v5604_v29, 4 }
 0x25b   : > { %v5556_v0 = vpop.f32.mrf.mxu0  ;;  %v2250_v42 = vmul.f32 0.01, %v1971_v31  ;;  %v2230_v61 = vmul.f32 0.01, %v2021_v34  ;;  %vm2194_vm11 = vcmp.ge.f32.partialorder %v1971_v31, 0.0  ;;  %vm2174_vm14 = vcmp.ge.f32.partialorder %v2021_v34, 0.0 }
 0x25c   : > { %v2462_v45 = vadd.f32 %v2461_v27, %v2389_v38 }
 0x25d   : > { %v1994_v47 = vpop.f32.mrf.mxu1  ;;  %v2286_v24 = vsel %vm2174_vm14, %v2021_v34, %v2230_v61 }
 0x25e   : > { %v1995_v11 = vadd.f32 %v1994_v47, %v5298_v57  ;;  %v2223_v47 = vmul.f32 0.01, %v2019_v49  ;;  %v2390_v38 = vmul.f32 %v5397_v17, %v2286_v24 }
 0x25f   : > { %2671 = vrot.lane.b32.xlu1 %v5563_v25, %s3800_s15  ;;  %2835 = vrot.lane.b32.xlu0 %v5563_v25, %s3802_s14 }
 0x260   : > { %v2023_v3 = vpop.f32.mrf.mxu3  ;;  %2751 = vrot.lane.b32.xlu2 %v5563_v25, %s3801_s8  ;;  %v1972_v9 = vpop.f32.mrf.mxu2 }
 0x261   : > { %v1973_v40 = vadd.f32 %v1972_v9, %v1944_v37  ;;  %v2024_v32 = vadd.f32 %v2023_v3, %v1995_v11  ;;  %v2396_v3 = vmul.f32 %v5399_v8, %v2292_v50 }
 0x263   : > { %v5573_v2 = vpop.f32.mrf.mxu0  ;;  %v2257_v16 = vmul.f32 0.01, %v1973_v40  ;;  %vm2201_vm12 = vcmp.ge.f32.partialorder %v1973_v40, 0.0  ;;  %vm2181_vm10 = vcmp.ge.f32.partialorder %v2024_v32, 0.0 }
 0x265   : > { %v1996_v14 = vpop.f32.mrf.mxu1  ;;  %v2313_v37 = vsel %vm2201_vm12, %v1973_v40, %v2257_v16  ;;  %v2715_v40 = vperm.slane %v5604_v29, 0 }
 0x266   : > { %v1997_v56 = vadd.f32 %v1996_v14, %v5346_v44  ;;  %v2306_v14 = vsel %vm2194_vm11, %v1971_v31, %v2250_v42  ;;  %v2463_v31 = vadd.f32 %v2462_v45, %v2396_v3 }
 0x267   : > { %2886 = vrot.lane.b32.xlu0 %v2877_v12, %s3802_s14  ;;  %2888 = vrot.lane.b32.xlu1 %v2878_v35, %s3802_s14  ;;  %v2279_v12 = vsel %vm2167_vm15, %v2019_v49, %v2223_v47  ;;  %v2237_v35 = vmul.f32 0.01, %v2024_v32  ;;  %v2369_v49 = vmul.f32 %v5362_v62, %v2265_v7  ;;  %v2417_v7 = vmul.f32 %v5444_v22, %v2313_v37 }
 0x268   : > { %v2025_v46 = vpop.f32.mrf.mxu3  ;;  %2884 = vrot.lane.b32.xlu2 %v2876_v30, %s3802_s14  ;;  %v5592_v48 = vpop.f32.mrf.mxu2  ;;  %v2383_v11 = vmul.f32 %v5375_v36, %v2279_v12  ;;  %v2464_v20 = vadd.f32 %v2463_v31, %v2403_v60 }
 0x269   : > { %v2026_v9 = vadd.f32 %v2025_v46, %v1997_v56  ;;  %v2410_v46 = vmul.f32 %v5442_v26, %v2306_v14  ;;  %v2293_v27 = vsel %vm2181_vm10, %v2024_v32, %v2237_v35  ;;  %v2473_v34 = vadd.f32 %v2376_v28, %v2369_v49 }
 0x26a   : > { %v2881_v14 = vperm.slane %v5597_v55, 2 }
 0x26b   : > { %v5607_v23 = vpop.f32.mrf.mxu0  ;;  %v2244_v63 = vmul.f32 0.01, %v2026_v9  ;;  %vm2188_vm7 = vcmp.ge.f32.partialorder %v2026_v9, 0.0  ;;  %v2465_v61 = vadd.f32 %v2464_v20, %v2410_v46  ;;  %v2880_v20 = vperm.slane %v5604_v29, 6 }
 0x26d   : > { %v1999_v6 = vpop.f32.mrf.mxu1  ;;  %v2300_v50 = vsel %vm2188_vm7, %v2026_v9, %v2244_v63  ;;  %v2879_v63 = vperm.slane %v5604_v29, 2 }
 0x26e   : > { %v2000_v15 = vadd.f32 %v1999_v6, %v5323_v43  ;;  %v2404_v19 = vmul.f32 %v5406_v21, %v2300_v50 }
 0x26f   : > { %2809 = vrot.lane.b32.xlu0 %v2797_v4, %s3801_s8  ;;  %2811 = vrot.lane.b32.xlu1 %v2798_v5, %s3801_s8  ;;  %v2474_v4 = vadd.f32 %v2473_v34, %v2383_v11  ;;  %v2397_v5 = vmul.f32 %v5399_v8, %v2293_v27 }
 0x270   : > { %v2028_v30 = vpop.f32.mrf.mxu3  ;;  %2807 = vrot.lane.b32.xlu2 %v2796_v33, %s3801_s8  ;;  %v5619_v18 = vpop.f32.mrf.mxu2 }
 0x271   : > { %v2029_v13 = vadd.f32 %v2028_v30, %v2000_v15  ;;  %v2475_v33 = vadd.f32 %v2474_v4, %v2390_v38  ;;  %v2466_v15 = vadd.f32 %v2465_v61, %v2417_v7  ;;  %v2045_v61 = vadd.f32 %v5573_v2, %v5291_v52 }
 0x273   : > { %v2251_v56 = vmul.f32 0.01, %v2029_v13  ;;  %vm2195_vm4 = vcmp.ge.f32.partialorder %v2029_v13, 0.0  ;;  %v2049_v47 = vpop.f32.mrf.mxu0  ;;  %v2476_v12 = vadd.f32 %v2475_v33, %v2397_v5  ;;  %v2467_v30 = vrot.slane %v2466_v15, 4 }
 0x274   : > { %v2074_v29 = vadd.f32 %v5619_v18, %v2045_v61 }
 0x275   : > { %v2001_v42 = vpop.f32.mrf.mxu1  ;;  %v2307_v6 = vsel %vm2195_vm4, %v2029_v13, %v2251_v56  ;;  %v2477_v28 = vadd.f32 %v2476_v12, %v2404_v19  ;;  %v2468_v46 = vadd.f32 %v2467_v30, %v2466_v15  ;;  %v5645_v56 = vpop.permute.xlu2 %2721  ;;  %v2048_v12 = vadd.f32 %v5607_v23, %v5263_v53 }
 0x276   : > { %v2002_v32 = vadd.f32 %v2001_v42, %v5352_v1  ;;  %v2411_v35 = vmul.f32 %v5442_v26, %v2307_v6  ;;  %v2217_v18 = vmul.f32 0.01, %v2074_v29  ;;  %vm2161_vm1 = vcmp.ge.f32.partialorder %v2074_v29, 0.0 }
 0x277   : > { %2727 = vrot.lane.b32.xlu0 %v2716_v41, %s3800_s15  ;;  %v2469_v38 = vrot.slane %v2468_v46, 2 }
 0x278   : > { %v2030_v16 = vpop.f32.mrf.mxu3  ;;  %2725 = vrot.lane.b32.xlu2 %v2715_v40, %s3800_s15  ;;  %v2076_v9 = vpop.f32.mrf.mxu2  ;;  %v2478_v13 = vadd.f32 %v2477_v28, %v2411_v35 }
 0x279   : > { %v2031_v3 = vadd.f32 %v2030_v16, %v2002_v32  ;;  %v2470_v40 = vadd.f32 %v2469_v38, %v2468_v46  ;;  %v2077_v28 = vadd.f32 %v2076_v9, %v2048_v12 }
 0x27b   : > { %vm2202_vm5 = vcmp.ge.f32.partialorder %v2031_v3, 0.0  ;;  %v2258_v45 = vmul.f32 0.01, %v2031_v3  ;;  %v2052_v11 = vpop.f32.mrf.mxu0  ;;  %v2471_v16 = vrot.slane %v2470_v40, 1  ;;  %vm2168_vm6 = vcmp.ge.f32.partialorder %v2077_v28, 0.0 }
 0x27d   : > { %v2314_v60 = vsel %vm2202_vm5, %v2031_v3, %v2258_v45  ;;  %v5637_v24 = vpop.f32.mrf.mxu1  ;;  %v5655_v33 = vpop.permute.xlu2 %2803  ;;  %v2043_v3 = vadd.f32 %v5556_v0, %v5334_v39  ;;  %v2050_v45 = vadd.f32 %v2049_v47, %v5305_v59  ;;  %v2472_v0 = vadd.f32 %v2471_v16, %v2470_v40 }
 0x27e   : > { %v2418_v49 = vmul.f32 %v5444_v22, %v2314_v60  ;;  %v2224_v60 = vmul.f32 0.01, %v2077_v28 }
 0x27f   : > { %2894 = vrot.lane.b32.xlu0 %v2881_v14, %s3802_s14  ;;  %v2072_v2 = vadd.f32 %v5592_v48, %v2043_v3  ;;  %v2053_v48 = vadd.f32 %v2052_v11, %v5298_v57 }
 0x280   : > { %v2479_v37 = vadd.f32 %v2478_v13, %v2418_v49  ;;  %v5641_v31 = vpop.f32.mrf.mxu3  ;;  %2890 = vrot.lane.b32.xlu2 %v2879_v63, %s3802_s14  ;;  %v2078_v27 = vpop.f32.mrf.mxu2  ;;  %v5682_v49 = vadd.f32 %v5534_v51, %v2472_v0 }
 0x281   : > { %v5657_v19 = vpop.permute.xlu0 %2717  ;;  %v2079_v30 = vadd.f32 %v2078_v27, %v2050_v45  ;;  %v2210_v9 = vmul.f32 0.01, %v2072_v2  ;;  %vm2154_vm3 = vcmp.ge.f32.partialorder %v2072_v2, 0.0 }
 0x282   : > { %v2480_v55 = vrot.slane %v2479_v37, 4 }
 0x283   : > { %v2054_v4 = vpop.f32.mrf.mxu0  ;;  %vm2175_vm2 = vcmp.ge.f32.partialorder %v2079_v30, 0.0 }
 0x284   : > { %v2481_v34 = vadd.f32 %v2480_v55, %v2479_v37  ;;  %v2055_v63 = vadd.f32 %v2054_v4, %v5346_v44  ;;  %v2273_v37 = vsel %vm2161_vm1, %v2074_v29, %v2217_v18  ;;  %v2231_v55 = vmul.f32 0.01, %v2079_v30 }
 0x285   : > { %v5647_v41 = vpop.f32.mrf.mxu1  ;;  %v5684_v38 = vpop.permute.xlu2 %2805 }
 0x286   : > { %v2482_v7 = vrot.slane %v2481_v34, 2  ;;  %v5691_v27 = vsel %vm2763_vm9, %v5655_v33, %v5684_v38 }
 0x288   : > { %v2483_v50 = vadd.f32 %v2482_v7, %v2481_v34  ;;  %v5650_v42 = vpop.f32.mrf.mxu3  ;;  %2892 = vrot.lane.b32.xlu2 %v2880_v20, %s3802_s14  ;;  %v2081_v5 = vpop.f32.mrf.mxu2  ;;  %v2266_v7 = vsel %vm2154_vm3, %v2072_v2, %v2210_v9 }
 0x289   : > { %v2082_v13 = vadd.f32 %v2081_v5, %v2053_v48  ;;  %v5686_v11 = vpop.permute.xlu0 %2723  ;;  %v2370_v3 = vmul.f32 %v5362_v62, %v2266_v7 }
 0x28a   : > { %v2484_v32 = vrot.slane %v2483_v50, 1  ;;  %v5696_v20 = vsel %vm2681_vm0, %v5645_v56, %v5686_v11 }
 0x28b   : > { %v2057_v47 = vpop.f32.mrf.mxu0  ;;  %v2238_v40 = vmul.f32 0.01, %v2082_v13  ;;  %vm2182_vm8 = vcmp.ge.f32.partialorder %v2082_v13, 0.0 }
 0x28c   : > { %v2485_v6 = vadd.f32 %v2484_v32, %v2483_v50  ;;  %v2280_v50 = vsel %vm2168_vm6, %v2077_v28, %v2224_v60  ;;  %v2058_v4 = vadd.f32 %v2057_v47, %v5323_v43  ;;  %v2377_v32 = vmul.f32 %v5364_v54, %v2273_v37 }
 0x28d   : > { %v5660_v15 = vpop.f32.mrf.mxu1  ;;  %v2384_v12 = vmul.f32 %v5375_v36, %v2280_v50  ;;  %v2294_v2 = vsel %vm2182_vm8, %v2082_v13, %v2238_v40  ;;  %v2103_v13 = vadd.f32 %v5647_v41, %v5291_v52  ;;  %vm6397_vm8 = vcmask 965632  }
 0x28e   : > { %v5667_v35 = vadd.f32 %v5534_v51, %v2485_v6  ;;  %v2287_v6 = vsel %vm2175_vm2, %v2079_v30, %v2231_v55  ;;  %v2486_v28 = vadd.f32 %v2377_v32, %v2370_v3  ;;  %v2398_v9 = vmul.f32 %v5399_v8, %v2294_v2 }
 0x28f   : > { %v2391_v0 = vmul.f32 %v5397_v17, %v2287_v6  ;;  %v2132_v6 = vadd.f32 %v5650_v42, %v2103_v13  ;;  %vm2847_vm2 = vcmask 7168  }
 0x290   : > { %v5671_v14 = vpop.f32.mrf.mxu3  ;;  %2677 = vrot.lane.b32.xlu1 %v5667_v35, %s3800_s15  ;;  %2841 = vrot.lane.b32.xlu0 %v5667_v35, %s3802_s14  ;;  %v2083_v23 = vpop.f32.mrf.mxu2  ;;  %v2487_v47 = vadd.f32 %v2486_v28, %v2384_v12 }
 0x291   : > { %2757 = vrot.lane.b32.xlu2 %v5667_v35, %s3801_s8  ;;  %v2084_v34 = vadd.f32 %v2083_v23, %v2055_v63  ;;  %v5722_v12 = vpop.permute.xlu1 %2719  ;;  %vm2162_vm12 = vcmp.ge.f32.partialorder %v2132_v6, 0.0 }
 0x292   : > { %v2488_v37 = vadd.f32 %v2487_v47, %v2391_v0 }
 0x293   : > { %v2245_v16 = vmul.f32 0.01, %v2084_v34  ;;  %vm2189_vm15 = vcmp.ge.f32.partialorder %v2084_v34, 0.0  ;;  %v2059_v18 = vpop.f32.mrf.mxu0 }
 0x294   : > { %v2060_v30 = vadd.f32 %v2059_v18, %v5352_v1  ;;  %v2489_v40 = vadd.f32 %v2488_v37, %v2398_v9 }
 0x295   : > { %v2107_v46 = vpop.f32.mrf.mxu1  ;;  %v2301_v48 = vsel %vm2189_vm15, %v2084_v34, %v2245_v16  ;;  %v2101_v34 = vadd.f32 %v5637_v24, %v5334_v39  ;;  %vm6398_vm15 = vmmov %vm6397_vm8 }
 0x296   : > { %v2405_v55 = vmul.f32 %v5406_v21, %v2301_v48  ;;  %v2108_v52 = vadd.f32 %v2107_v46, %v5305_v59 }
 0x298   : > { %v2136_v5 = vpop.f32.mrf.mxu3  ;;  %2755 = vrot.lane.b32.xlu1 %v5682_v49, %s3801_s8  ;;  %2675 = vrot.lane.b32.xlu0 %v5682_v49, %s3800_s15  ;;  %v2086_v61 = vpop.f32.mrf.mxu2  ;;  %v2490_v16 = vadd.f32 %v2489_v40, %v2405_v55 }
 0x299   : > { %v2087_v29 = vadd.f32 %v2086_v61, %v2058_v4  ;;  %v2106_v4 = vadd.f32 %v5660_v15, %v5263_v53  ;;  %v2137_v28 = vadd.f32 %v2136_v5, %v2108_v52 }
 0x29b   : > { %v2252_v45 = vmul.f32 0.01, %v2087_v29  ;;  %vm2196_vm11 = vcmp.ge.f32.partialorder %v2087_v29, 0.0  ;;  %v2135_v39 = vadd.f32 %v5671_v14, %v2106_v4  ;;  %v2232_v47 = vmul.f32 0.01, %v2137_v28 }
 0x29c   : > { %vm2176_vm4 = vcmp.ge.f32.partialorder %v2137_v28, 0.0 }
 0x29d   : > { %v2110_v23 = vpop.f32.mrf.mxu1  ;;  %v2308_v60 = vsel %vm2196_vm11, %v2087_v29, %v2252_v45  ;;  %v2130_v29 = vadd.f32 %v5641_v31, %v2101_v34  ;;  %v2218_v45 = vmul.f32 0.01, %v2132_v6  ;;  %v2225_v46 = vmul.f32 0.01, %v2135_v39 }
 0x29e   : > { %v2412_v32 = vmul.f32 %v5442_v26, %v2308_v60  ;;  %v2111_v53 = vadd.f32 %v2110_v23, %v5298_v57  ;;  %vm2169_vm7 = vcmp.ge.f32.partialorder %v2135_v39, 0.0 }
 0x29f   : > { %v2211_v59 = vmul.f32 0.01, %v2130_v29  ;;  %vm2155_vm10 = vcmp.ge.f32.partialorder %v2130_v29, 0.0  ;;  %v2274_v14 = vsel %vm2162_vm12, %v2132_v6, %v2218_v45  ;;  %v2281_v60 = vsel %vm2169_vm7, %v2135_v39, %v2225_v46 }
 0x2a0   : > { %v2139_v63 = vpop.f32.mrf.mxu3  ;;  %2839 = vrot.lane.b32.xlu0 %v5682_v49, %s3802_s14  ;;  %v2088_v7 = vpop.f32.mrf.mxu2  ;;  %v2491_v24 = vadd.f32 %v2490_v16, %v2412_v32  ;;  %v2378_v13 = vmul.f32 %v5364_v54, %v2274_v14  ;;  %v2385_v32 = vmul.f32 %v5375_v36, %v2281_v60  ;;  %vm2959_vm7 = vcmask 483328  }
 0x2a1   : > { %v2089_v50 = vadd.f32 %v2088_v7, %v2060_v30  ;;  %v2140_v31 = vadd.f32 %v2139_v63, %v2111_v53  ;;  %v2267_v30 = vsel %vm2155_vm10, %v2130_v29, %v2211_v59  ;;  %v5732_v63 = vpop.permute.xlu1 %2801  ;;  %v2288_v7 = vsel %vm2176_vm4, %v2137_v28, %v2232_v47 }
 0x2a2   : > { %v2371_v4 = vmul.f32 %v5362_v62, %v2267_v30  ;;  %v2392_v52 = vmul.f32 %v5397_v17, %v2288_v7 }
 0x2a3   : > { %vm2203_vm14 = vcmp.ge.f32.partialorder %v2089_v50, 0.0  ;;  %v2259_v61 = vmul.f32 0.01, %v2089_v50  ;;  %vm2183_vm5 = vcmp.ge.f32.partialorder %v2140_v31, 0.0 }
 0x2a4   : > { %v2499_v16 = vadd.f32 %v2378_v13, %v2371_v4 }
 0x2a5   : > { %v2112_v41 = vpop.f32.mrf.mxu1  ;;  %v2315_v3 = vsel %vm2203_vm14, %v2089_v50, %v2259_v61 }
 0x2a6   : > { %v2419_v15 = vmul.f32 %v5444_v22, %v2315_v3  ;;  %v2113_v0 = vadd.f32 %v2112_v41, %v5346_v44  ;;  %v2239_v44 = vmul.f32 0.01, %v2140_v31  ;;  %v2500_v39 = vadd.f32 %v2499_v16, %v2385_v32 }
 0x2a8   : > { %v2141_v2 = vpop.f32.mrf.mxu3  ;;  %v2492_v42 = vadd.f32 %v2491_v24, %v2419_v15 }
 0x2a9   : > { %v2142_v23 = vadd.f32 %v2141_v2, %v2113_v0  ;;  %v2501_v2 = vadd.f32 %v2500_v39, %v2392_v52  ;;  %v5752_v0 = vpop.permute.xlu1 %2882 }
 0x2aa   : > { %v2493_v18 = vrot.slane %v2492_v42, 4  ;;  %v5728_v48 = vpop.permute.xlu2 %2673 }
 0x2ab   : > { %v2246_v50 = vmul.f32 0.01, %v2142_v23  ;;  %vm2190_vm1 = vcmp.ge.f32.partialorder %v2142_v23, 0.0 }
 0x2ac   : > { %v2494_v57 = vadd.f32 %v2493_v18, %v2492_v42  ;;  %v2800_v42 = vpop.permute.xlu0 %2799 }
 0x2ad   : > { %v2115_v9 = vpop.f32.mrf.mxu1  ;;  %v2302_v29 = vsel %vm2190_vm1, %v2142_v23, %v2246_v50  ;;  %v2813_v16 = vsel %vm2763_vm9, %v2800_v42, %v5732_v63 }
 0x2ae   : > { %v2116_v5 = vadd.f32 %v2115_v9, %v5323_v43  ;;  %v2495_v37 = vrot.slane %v2494_v57, 2  ;;  %v2295_v43 = vsel %vm2183_vm5, %v2140_v31, %v2239_v44  ;;  %v2406_v17 = vmul.f32 %v5406_v21, %v2302_v29  ;;  %vm6405_vm5 = vmmov %vm6397_vm8 }
 0x2af   : > { %v2399_v24 = vmul.f32 %v5399_v8, %v2295_v43  ;;  %vm6406_vm1 = vmmov %vm6405_vm5 }
 0x2b0   : > { %v2144_v55 = vpop.f32.mrf.mxu3  ;;  %v2496_v34 = vadd.f32 %v2495_v37, %v2494_v57 }
 0x2b1   : > { %v2145_v40 = vadd.f32 %v2144_v55, %v2116_v5  ;;  %v2502_v8 = vadd.f32 %v2501_v2, %v2399_v24 }
 0x2b2   : > { %v2497_v61 = vrot.slane %v2496_v34, 1  ;;  %v5737_v54 = vpop.permute.xlu2 %2833 }
 0x2b3   : > { %v2253_v6 = vmul.f32 0.01, %v2145_v40  ;;  %vm2197_vm3 = vcmp.ge.f32.partialorder %v2145_v40, 0.0  ;;  %v2861_v15 = vsub.f32 %v5546_v10, %v5737_v54  ;;  %v2503_v31 = vadd.f32 %v2502_v8, %v2406_v17 }
 0x2b4   : > { %v2498_v41 = vadd.f32 %v2497_v61, %v2496_v34  ;;  %v2730_v8 = vsel %vm2681_vm0, %v5722_v12, %v5645_v56 }
 0x2b5   : > { %v2117_v3 = vpop.f32.mrf.mxu1  ;;  %v2309_v53 = vsel %vm2197_vm3, %v2145_v40, %v2253_v6  ;;  %v2868_v59 = vand.u32 2147483647, %v2861_v15  ;;  %vm6407_vm3 = vmmov %vm6406_vm1 }
 0x2b6   : > { %v2118_v62 = vadd.f32 %v2117_v3, %v5352_v1  ;;  %v5742_v36 = vadd.f32 %v5534_v51, %v2498_v41  ;;  %v2413_v1 = vmul.f32 %v5442_v26, %v2309_v53 }
 0x2b7   : > { %v2909_v47 = vmul.f32 %v5752_v0, %v2868_v59 }
 0x2b8   : > { %v2146_v45 = vpop.f32.mrf.mxu3  ;;  %2679 = vrot.lane.b32.xlu2 %v5742_v36, %s3800_s15  ;;  %2843 = vrot.lane.b32.xlu0 %v5742_v36, %s3802_s14  ;;  %v2504_v21 = vadd.f32 %v2503_v31, %v2413_v1 }
 0x2b9   : > { %v2147_v28 = vadd.f32 %v2146_v45, %v2118_v62 }
 0x2ba   : > { %v2752_v57 = vpop.permute.xlu2 %2751 }
 0x2bb   : > { %vm2204_vm6 = vcmp.ge.f32.partialorder %v2147_v28, 0.0  ;;  %v2260_v46 = vmul.f32 0.01, %v2147_v28 }
 0x2bd   : > { %v2316_v18 = vsel %vm2204_vm6, %v2147_v28, %v2260_v46  ;;  %v2729_v28 = vsel %vm2681_vm0, %v5657_v19, %v5722_v12  ;;  %vm6408_vm6 = vcmask 1039360  }
 0x2be   : > { %v2420_v14 = vmul.f32 %v5444_v22, %v2316_v18  ;;  %v2814_v22 = vsel %vm2763_vm9, %v5732_v63, %v5655_v33 }
 0x2c0   : > { %v2505_v23 = vadd.f32 %v2504_v21, %v2420_v14  ;;  %3038 = vrot.lane.b32.xlu2 %v2909_v47, %s6394_s20 }
 0x2c1   : > { %v5757_v5 = vpop.permute.xlu1 %2837  ;;  %v5759_v26 = vpop.permute.xlu0 %2753 }
 0x2c2   : > { %v2506_v9 = vrot.slane %v2505_v23, 4  ;;  %v2765_v30 = vsel %vm2763_vm9, %v2752_v57, %v5759_v26  ;;  %v2885_v7 = vpop.permute.xlu2 %2884 }
 0x2c3   : > { %v2779_v44 = vsub.f32 %v5537_v58, %v2765_v30 }
 0x2c4   : > { %v2507_v60 = vadd.f32 %v2506_v9, %v2505_v23 }
 0x2c5   : > { %v2786_v37 = vand.u32 2147483647, %v2779_v44 }
 0x2c6   : > { %v2508_v13 = vrot.slane %v2507_v60, 2 }
 0x2c7   : > { %v2828_v55 = vmul.f32 %v2814_v22, %v2786_v37 }
 0x2c8   : > { %v2509_v40 = vadd.f32 %v2508_v13, %v2507_v60 }
 0x2c9   : > { %v2750_v34 = vpop.permute.xlu1 %2749  ;;  %2983 = vrot.lane.b32.xlu0 %v2828_v55, %s6395_s21  ;;  %v2670_v50 = vpop.permute.xlu0 %2669 }
 0x2ca   : > { %v2764_v4 = vsel %vm2763_vm9, %v2750_v34, %v2752_v57  ;;  %v2777_v32 = vsub.f32 %v5546_v10, %v2750_v34  ;;  %v2510_v33 = vrot.slane %v2509_v40, 1  ;;  %v2808_v53 = vpop.permute.xlu2 %2807  ;;  %v2694_v23 = vsub.f32 %v5546_v10, %v2670_v50 }
 0x2cb   : > { %v2778_v43 = vsub.f32 %v5563_v25, %v2764_v4 }
 0x2cc   : > { %v2784_v61 = vand.u32 2147483647, %v2777_v32  ;;  %v2511_v39 = vadd.f32 %v2510_v33, %v2509_v40  ;;  %v2701_v30 = vand.u32 2147483647, %v2694_v23 }
 0x2cd   : > { %v2785_v6 = vand.u32 2147483647, %v2778_v43 }
 0x2ce   : > { %v2826_v52 = vmul.f32 %v2800_v42, %v2784_v61  ;;  %v5789_v1 = vadd.f32 %v5534_v51, %v2511_v39  ;;  %v2896_v51 = vsel %vm2847_vm2, %v5752_v0, %v2885_v7  ;;  %v2741_v44 = vmul.f32 %v5657_v19, %v2701_v30 }
 0x2cf   : > { %v2827_v41 = vmul.f32 %v2813_v16, %v2785_v6 }
 0x2d0   : > { %2979 = vrot.lane.b32.xlu1 %v2826_v52, %s6395_s21 }
 0x2d1   : > { %2981 = vrot.lane.b32.xlu2 %v2827_v41, %s6395_s21  ;;  %v2672_v29 = vpop.permute.xlu1 %2671  ;;  %v2836_v3 = vpop.permute.xlu0 %2835 }
 0x2d2   : > { %v2682_v24 = vsel %vm2681_vm0, %v2670_v50, %v2672_v29  ;;  %v2683_v62 = vsel %vm2681_vm0, %v2672_v29, %v5728_v48  ;;  %v2848_v2 = vsel %vm2847_vm2, %v5737_v54, %v2836_v3  ;;  %v5798_v21 = vpop.permute.xlu2 %2725  ;;  %v2849_v60 = vsel %vm2847_vm2, %v2836_v3, %v5757_v5 }
 0x2d3   : > { %v2695_v15 = vsub.f32 %v5563_v25, %v2682_v24  ;;  %v2696_v63 = vsub.f32 %v5537_v58, %v2683_v62  ;;  %v2862_v46 = vsub.f32 %v5563_v25, %v2848_v2  ;;  %v2863_v37 = vsub.f32 %v5537_v58, %v2849_v60 }
 0x2d5   : > { %v2702_v17 = vand.u32 2147483647, %v2695_v15  ;;  %v2703_v45 = vand.u32 2147483647, %v2696_v63  ;;  %v2869_v18 = vand.u32 2147483647, %v2862_v46 }
 0x2d6   : > { %v2870_v50 = vand.u32 2147483647, %v2863_v37 }
 0x2d7   : > { %v2742_v42 = vmul.f32 %v2729_v28, %v2702_v17  ;;  %v2743_v59 = vmul.f32 %v2730_v8, %v2703_v45  ;;  %v2910_v56 = vmul.f32 %v2896_v51, %v2869_v18 }
 0x2d8   : > { %2761 = vrot.lane.b32.xlu1 %v5789_v1, %s3801_s8 }
 0x2d9   : > { %2927 = vrot.lane.b32.xlu0 %v2743_v59, %s6396_s22  ;;  %2925 = vrot.lane.b32.xlu2 %v2742_v42, %s6396_s22  ;;  %v2887_v54 = vpop.permute.xlu0 %2886  ;;  %v5796_v31 = vpop.permute.xlu1 %2888  ;;  %v2732_v42 = vsel %vm2681_vm0, %v5686_v11, %v5798_v21 }
 0x2da   : > { %v5812_v9 = vpop.permute.xlu2 %2890  ;;  %v2897_v34 = vsel %vm2847_vm2, %v2885_v7, %v2887_v54 }
 0x2db   : > { %v2911_v40 = vmul.f32 %v2897_v34, %v2870_v50  ;;  %v2899_v51 = vsel %vm2847_vm2, %v5796_v31, %v5812_v9 }
 0x2e0   : > { %2845 = vrot.lane.b32.xlu1 %v5789_v1, %s3802_s14 }
 0x2e1   : > { %3040 = vrot.lane.b32.xlu0 %v2910_v56, %s6394_s20  ;;  %v2810_v12 = vpop.permute.xlu0 %2809  ;;  %v2812_v14 = vpop.permute.xlu1 %2811 }
 0x2e2   : > { %v5806_v47 = vsel %vm2763_vm9, %v2808_v53, %v2810_v12  ;;  %v5809_v57 = vsel %vm2763_vm9, %v2810_v12, %v2812_v14  ;;  %v2893_v22 = vpop.permute.xlu2 %2892 }
 0x2e8   : > { %2759 = vrot.lane.b32.xlu1 %v5742_v36, %s3801_s8  ;;  %s3346_s8 = smul.u32 7, %s6434_s23 }
 0x2e9   : > { %v2728_v0 = vpop.permute.xlu0 %2727 }
 0x2ea   : > { %v2733_v12 = vsel %vm2681_vm0, %v5798_v21, %v2728_v0  ;;  %v2900_v21 = vsel %vm2847_vm2, %v5812_v9, %v2893_v22  ;;  %s287_s17 = scalar_lea.vmem %s6108_s6, %s3346_s8 }
 0x2eb   : > { %v5826_v43 = vpop.permute.xlu2 %2757 }
 0x2f0   : > { %2923 = vrot.lane.b32.xlu1 %v2741_v44, %s6396_s22 }
 0x2f1   : > { %v2895_v13 = vpop.permute.xlu0 %2894 }
 0x2f2   : > { %v5822_v55 = vsel %vm2847_vm2, %v2893_v22, %v2895_v13 }
 0x2f8   : > { %3042 = vrot.lane.b32.xlu1 %v2911_v40, %s6394_s20 }
 0x302   : > { %v2678_v4 = vpop.permute.xlu1 %2677  ;;  %v2842_v32 = vpop.permute.xlu0 %2841 }
 0x30a   : > { %v2756_v19 = vpop.permute.xlu1 %2755  ;;  %v2676_v61 = vpop.permute.xlu0 %2675 }
 0x30b   : > { %v2766_v6 = vsel %vm2763_vm9, %v5759_v26, %v2756_v19  ;;  %v2767_v16 = vsel %vm2763_vm9, %v2756_v19, %v5826_v43  ;;  %v2684_v33 = vsel %vm2681_vm0, %v5728_v48, %v2676_v61  ;;  %v2685_v39 = vsel %vm2681_vm0, %v2676_v61, %v2678_v4 }
 0x30c   : > { %v2780_v7 = vsub.f32 %v5682_v49, %v2766_v6  ;;  %v2781_v52 = vsub.f32 %v5667_v35, %v2767_v16  ;;  %v2697_v41 = vsub.f32 %v5682_v49, %v2684_v33  ;;  %v2816_v26 = vsel %vm2763_vm9, %v5684_v38, %v2808_v53 }
 0x30d   : > { %v2698_v48 = vsub.f32 %v5667_v35, %v2685_v39 }
 0x30e   : > { %v2787_v29 = vand.u32 2147483647, %v2780_v7  ;;  %v2788_v3 = vand.u32 2147483647, %v2781_v52  ;;  %v2704_v24 = vand.u32 2147483647, %v2697_v41 }
 0x30f   : > { %v2705_v53 = vand.u32 2147483647, %v2698_v48 }
 0x310   : > { %v2829_v62 = vmul.f32 %v5691_v27, %v2787_v29  ;;  %v2830_v15 = vmul.f32 %v2816_v26, %v2788_v3  ;;  %v2744_v63 = vmul.f32 %v5696_v20, %v2704_v24  ;;  %v2898_v27 = vsel %vm2847_vm2, %v2887_v54, %v5796_v31 }
 0x312   : > { %2987 = vrot.lane.b32.xlu0 %v2830_v15, %s6395_s21  ;;  %2985 = vrot.lane.b32.xlu1 %v2829_v62, %s6395_s21  ;;  %v2840_v2 = vpop.permute.xlu0 %2839  ;;  %v2680_v45 = vpop.permute.xlu2 %2679 }
 0x313   : > { %2929 = vrot.lane.b32.xlu2 %v2744_v63, %s6396_s22  ;;  %v2850_v17 = vsel %vm2847_vm2, %v5757_v5, %v2840_v2  ;;  %v2851_v20 = vsel %vm2847_vm2, %v2840_v2, %v2842_v32  ;;  %v2686_v8 = vsel %vm2681_vm0, %v2678_v4, %v2680_v45  ;;  %v2745_v5 = vmul.f32 %v2732_v42, %v2705_v53 }
 0x314   : > { %v2864_v38 = vsub.f32 %v5682_v49, %v2850_v17  ;;  %v2865_v59 = vsub.f32 %v5667_v35, %v2851_v20  ;;  %v2699_v18 = vsub.f32 %v5742_v36, %v2686_v8  ;;  %v2700_v14 = vsub.f32 %v5789_v1, %v2680_v45 }
 0x315   : > { %vm2949_vm0 = vcmask 1040384  }
 0x316   : > { %v2871_v28 = vand.u32 2147483647, %v2864_v38  ;;  %v2872_v54 = vand.u32 2147483647, %v2865_v59  ;;  %v2706_v56 = vand.u32 2147483647, %v2699_v18 }
 0x317   : > { %v2707_v30 = vand.u32 2147483647, %v2700_v14 }
 0x318   : > { %v2912_v46 = vmul.f32 %v2898_v27, %v2871_v28  ;;  %v2913_v11 = vmul.f32 %v2899_v51, %v2872_v54  ;;  %v2746_v23 = vmul.f32 %v2733_v12, %v2706_v56 }
 0x319   : > { %v2747_v60 = vmul.f32 %v2728_v0, %v2707_v30 }
 0x31a   : > { %3044 = vrot.lane.b32.xlu1 %v2912_v46, %s6394_s20  ;;  %v5874_v50 = vpop.permute.xlu2 %3038 }
 0x31b   : > { %2931 = vrot.lane.b32.xlu2 %v2745_v5, %s6396_s22 }
 0x322   : > { %3046 = vrot.lane.b32.xlu1 %v2913_v11, %s6394_s20 }
 0x323   : > { %2933 = vrot.lane.b32.xlu2 %v2746_v23, %s6396_s22 }
 0x32a   : > { %v2844_v44 = vpop.permute.xlu0 %2843 }
 0x32b   : > { %2935 = vrot.lane.b32.xlu2 %v2747_v60, %s6396_s22  ;;  %v2852_v37 = vsel %vm2847_vm2, %v2842_v32, %v2844_v44  ;;  %v2982_v4 = vpop.permute.xlu2 %2981 }
 0x32c   : > { %v2866_v31 = vsub.f32 %v5742_v36, %v2852_v37 }
 0x32e   : > { %v2873_v13 = vand.u32 2147483647, %v2866_v31 }
 0x330   : > { %v2914_v34 = vmul.f32 %v2900_v21, %v2873_v13 }
 0x332   : > { %3048 = vrot.lane.b32.xlu1 %v2914_v34, %s6394_s20 }
 0x333   : > { %v2926_v63 = vpop.permute.xlu2 %2925 }
 0x33b   : > { %v2984_v40 = vpop.permute.xlu0 %2983 }
 0x33c   : > { %v2994_v0 = vsel %vm6397_vm8, %v2982_v4, %v2984_v40 }
 0x33d   : > { %v3007_v32 = vsel %vm2949_vm0, %v2994_v0, 0.0 }
 0x342   : > { %v2980_v19 = vpop.permute.xlu1 %2979 }
 0x343   : > { %v2993_v61 = vsel %vm6398_vm15, %v2980_v19, %v2982_v4 }
 0x344   : > { %v3006_v6 = vsel %vm2949_vm0, %v2993_v61, 0.0 }
 0x345   : > { %v3008_v16 = vadd.f32 %v3007_v32, %v3006_v6 }
 0x34a   : > { %v2762_v9 = vpop.permute.xlu1 %2761 }
 0x34b   : > { %v2928_v45 = vpop.permute.xlu0 %2927 }
 0x352   : > { %v2846_v22 = vpop.permute.xlu1 %2845 }
 0x353   : > { %v2853_v33 = vsel %vm2847_vm2, %v2844_v44, %v2846_v22  ;;  %v3041_v60 = vpop.permute.xlu0 %3040  ;;  %vm6409_vm2 = vmmov %vm6408_vm6 }
 0x354   : > { %v2867_v7 = vsub.f32 %v5789_v1, %v2853_v33  ;;  %vm6410_vm8 = vmmov %vm6409_vm2 }
 0x355   : > { %vm6411_vm15 = vmmov %vm6409_vm2 }
 0x356   : > { %v2874_v52 = vand.u32 2147483647, %v2867_v7 }
 0x358   : > { %v2915_v41 = vmul.f32 %v5822_v55, %v2874_v52 }
 0x35a   : > { %v2760_v29 = vpop.permute.xlu1 %2759 }
 0x35b   : > { %v2768_v3 = vsel %vm2763_vm9, %v5826_v43, %v2760_v29  ;;  %v2769_v24 = vsel %vm2763_vm9, %v2760_v29, %v2762_v9  ;;  %vm6399_vm9 = vcmask 228352   ;;  %v3052_v9 = vsel %vm6409_vm2, %v5874_v50, %v3041_v60 }
 0x35c   : > { %v2782_v39 = vsub.f32 %v5742_v36, %v2768_v3  ;;  %v2783_v62 = vsub.f32 %v5789_v1, %v2769_v24  ;;  %vm6400_vm11 = vmmov %vm6399_vm9  ;;  %v3065_v3 = vsel %vm2949_vm0, %v3052_v9, 0.0  ;;  %v2528_v9 = vsub.f32 0.0, %v5537_v58 }
 0x35d   : > { %v2938_v27 = vsel %vm6400_vm11, %v2926_v63, %v2928_v45  ;;  %vm6401_vm14 = vmmov %vm6399_vm9 }
 0x35e   : > { %v2789_v26 = vand.u32 2147483647, %v2782_v39  ;;  %v2790_v48 = vand.u32 2147483647, %v2783_v62  ;;  %vm6402_vm12 = vmmov %vm6399_vm9 }
 0x35f   : > { %vm6403_vm10 = vmmov %vm6399_vm9 }
 0x360   : > { %v2831_v15 = vmul.f32 %v5806_v47, %v2789_v26  ;;  %v2832_v2 = vmul.f32 %v5809_v57, %v2790_v48  ;;  %v2951_v57 = vsel %vm2949_vm0, %v2938_v27, 0.0  ;;  %vm6404_vm4 = vmmov %vm6399_vm9 }
 0x361   : > { %vm6412_vm11 = vmmov %vm6406_vm1 }
 0x362   : > { %2989 = vrot.lane.b32.xlu0 %v2831_v15, %s6395_s21  ;;  %v2924_v17 = vpop.permute.xlu1 %2923 }
 0x363   : > { %v2937_v38 = vsel %vm6399_vm9, %v2924_v17, %v2926_v63  ;;  %vm3017_vm9 = vcmask 172032  }
 0x364   : > { %v2950_v53 = vsel %vm2949_vm0, %v2937_v38, 0.0 }
 0x365   : > { %v2952_v42 = vadd.f32 %v2951_v57, %v2950_v53 }
 0x36a   : > { %2991 = vrot.lane.b32.xlu0 %v2832_v2, %s6395_s21  ;;  %v3043_v23 = vpop.permute.xlu1 %3042 }
 0x36b   : > { %v3053_v61 = vsel %vm6408_vm6, %v3041_v60, %v3043_v23 }
 0x36c   : > { %v3066_v33 = vsel %vm2949_vm0, %v3053_v61, 0.0 }
 0x36d   : > { %v2930_v55 = vpop.permute.xlu2 %2929  ;;  %v3067_v50 = vadd.f32 %v3066_v33, %v3065_v3 }
 0x36e   : > { %v2939_v47 = vsel %vm6401_vm14, %v2928_v45, %v2930_v55  ;;  %vm6413_vm14 = vmmov %vm6409_vm2 }
 0x36f   : > { %v2953_v8 = vsel %vm2949_vm0, %v2939_v47, 0.0 }
 0x370   : > { %v2954_v5 = vadd.f32 %v2953_v8, %v2952_v42 }
 0x372   : > { %3050 = vrot.lane.b32.xlu0 %v2915_v41, %s6394_s20 }
 0x375   : > { %v2932_v43 = vpop.permute.xlu2 %2931 }
 0x376   : > { %v2940_v28 = vsel %vm6402_vm12, %v2930_v55, %v2932_v43  ;;  %vm3076_vm12 = vcmask 245760  }
 0x377   : > { %v2955_v46 = vsel %vm2949_vm0, %v2940_v28, 0.0 }
 0x378   : > { %v2956_v54 = vadd.f32 %v2955_v46, %v2954_v5 }
 0x37d   : > { %v2934_v20 = vpop.permute.xlu2 %2933 }
 0x37e   : > { %v2941_v59 = vsel %vm6403_vm10, %v2932_v43, %v2934_v20  ;;  %vm6414_vm10 = vmmov %vm6409_vm2 }
 0x37f   : > { %v2957_v18 = vsel %vm2949_vm0, %v2941_v59, 0.0 }
 0x380   : > { %v2958_v56 = vadd.f32 %v2957_v18, %v2956_v54 }
 0x384   : > { %v2986_v30 = vpop.permute.xlu1 %2985  ;;  %v2988_v37 = vpop.permute.xlu0 %2987 }
 0x385   : > { %v2936_v51 = vpop.permute.xlu2 %2935  ;;  %v2995_v31 = vsel %vm6405_vm5, %v2984_v40, %v2986_v30  ;;  %v2996_v0 = vsel %vm6406_vm1, %v2986_v30, %v2988_v37 }
 0x386   : > { %v2942_v12 = vsel %vm6404_vm4, %v2934_v20, %v2936_v51  ;;  %v3009_v21 = vsel %vm2949_vm0, %v2995_v31, 0.0  ;;  %v3011_v32 = vsel %vm2949_vm0, %v2996_v0, 0.0 }
 0x387   : > { %v2960_v11 = vsel %vm2959_vm7, %v2942_v12, 0.0  ;;  %v3010_v4 = vadd.f32 %v3009_v21, %v3008_v16 }
 0x388   : > { %v2961_v14 = vadd.f32 %v2960_v11, %v2958_v56  ;;  %v2527_v56 = vsub.f32 0.0, %v5563_v25  ;;  %v2531_v25 = vsub.f32 0.0, %v5742_v36 }
 0x389   : > { %v3012_v22 = vadd.f32 %v3011_v32, %v3010_v4  ;;  %v2529_v4 = vsub.f32 0.0, %v5682_v49  ;;  %v2532_v49 = vsub.f32 0.0, %v5789_v1 }
 0x38a   : > { %2962 = vadd.xlane.f32.xlu1 %v2961_v14 }
 0x38b   : > { %v2539_v61 = vmul.f32 1.442695, %v2529_v4 }
 0x38c   : > { %v3045_v44 = vpop.permute.xlu1 %3044 }
 0x38d   : > { %v3054_v40 = vsel %vm6410_vm8, %v3043_v23, %v3045_v44  ;;  %v2526_v23 = vsub.f32 0.0, %v5546_v10  ;;  %v2543_v10 = vmul.f32 1.442695, %v2531_v25 }
 0x38e   : > { %v3068_v39 = vsel %vm2949_vm0, %v3054_v40, 0.0  ;;  %v2530_v40 = vsub.f32 0.0, %v5667_v35 }
 0x38f   : > { %v3069_v48 = vadd.f32 %v3068_v39, %v3067_v50 }
 0x394   : > { %v3047_v13 = vpop.permute.xlu1 %3046 }
 0x395   : > { %v3055_v52 = vsel %vm6411_vm15, %v3045_v44, %v3047_v13  ;;  %v2535_v44 = vmul.f32 1.442695, %v2527_v56 }
 0x396   : > { %v3070_v15 = vsel %vm2949_vm0, %v3055_v52, 0.0 }
 0x397   : > { %v3071_v43 = vadd.f32 %v3070_v15, %v3069_v48  ;;  %3717 = vpow2.f32 %v2535_v44 }
 0x3a3   : > { %3120 = vrot.lane.b32.xlu1 %v5789_v1, %s3803_s26 }
 0x3a4   : > { %v3049_v7 = vpop.permute.xlu1 %3048 }
 0x3a5   : > { %v3056_v26 = vsel %vm6413_vm14, %v3047_v13, %v3049_v7 }
 0x3a6   : > { %v3072_v55 = vsel %vm2949_vm0, %v3056_v26, 0.0 }
 0x3a7   : > { %v3073_v45 = vadd.f32 %v3072_v55, %v3071_v43 }
 0x3d4   : > { %v2990_v34 = vpop.permute.xlu0 %2989 }
 0x3d5   : > { %v2997_v19 = vsel %vm6407_vm3, %v2988_v37, %v2990_v34 }
 0x3d6   : > { %v3013_v6 = vsel %vm2949_vm0, %v2997_v19, 0.0 }
 0x3d7   : > { %v3014_v41 = vadd.f32 %v3013_v6, %v3012_v22  ;;  %v3718_v6 = vpop.eup %3717 }
 0x3dc   : > { %v2992_v16 = vpop.permute.xlu0 %2991 }
 0x3dd   : > { %v2998_v29 = vsel %vm6412_vm11, %v2990_v34, %v2992_v16  ;;  %v3018_v63 = vsel %vm3017_vm9, %v2992_v16, 0.0  ;;  %v2533_v34 = vmul.f32 1.442695, %v2526_v23  ;;  %v2537_v16 = vmul.f32 1.442695, %v2528_v9 }
 0x3de   : > { %v3015_v24 = vsel %vm2949_vm0, %v2998_v29, 0.0 }
 0x3df   : > { %v3016_v62 = vadd.f32 %v3015_v24, %v3014_v41  ;;  %3719 = vpow2.f32 %v2533_v34  ;;  %v2545_v41 = vmul.f32 1.442695, %v2532_v49 }
 0x3e0   : > { %3721 = vpow2.f32 %v2539_v61 }
 0x3e1   : > { %v3019_v2 = vadd.f32 %v3018_v63, %v3016_v62  ;;  %3723 = vpow2.f32 %v2543_v10 }
 0x3e3   : > { %3020 = vadd.xlane.f32.xlu2 %v3019_v2 }
 0x3e4   : > { %v3051_v17 = vpop.permute.xlu0 %3050 }
 0x3e5   : > { %v3057_v38 = vsel %vm6414_vm10, %v3049_v7, %v3051_v17  ;;  %v3077_v53 = vsel %vm3076_vm12, %v3051_v17, 0.0  ;;  %v3720_v33 = vpop.eup %3719  ;;  %v2548_v7 = vadd.f32 1.0, %v3718_v6 }
 0x3e6   : > { %v3074_v27 = vsel %vm2949_vm0, %v3057_v38, 0.0  ;;  %v5936_v52 = vadd.f32 1.0, %v3720_v33  ;;  %v3722_v29 = vpop.eup %3721 }
 0x3e7   : > { %v3075_v47 = vadd.f32 %v3074_v27, %v3073_v45  ;;  %3725 = vrcp.f32 %v2548_v7  ;;  %v3724_v3 = vpop.eup %3723  ;;  %v5939_v58 = vadd.f32 1.0, %v3722_v29  ;;  %vm2574_vm4 = vweird.f32 %v2548_v7 }
 0x3e8   : > { %3727 = vpow2.f32 %v2537_v16  ;;  %v5941_v35 = vadd.f32 1.0, %v3724_v3  ;;  %vm2559_vm5 = vweird.f32 %v5936_v52 }
 0x3e9   : > { %v3078_v20 = vadd.f32 %v3077_v53, %v3075_v47  ;;  %v2610_v25 = vand.u32 2147483648, %v5939_v58  ;;  %vm2604_vm15 = vweird.f32 %v5939_v58  ;;  %v2608_v10 = vand.u32 2147483647, %v5939_v58 }
 0x3ea   : > { %v2640_v6 = vand.u32 2147483648, %v5941_v35  ;;  %vm2634_vm14 = vweird.f32 %v5941_v35 }
 0x3eb   : > { %3079 = vadd.xlane.f32.xlu0 %v3078_v20 }
 0x3ec   : > { %v2641_v3 = vor.u32 1.1754944e-38, %v2640_v6 }
 0x3ed   : > { %v5943_v1 = vpop.eup %3725 }
 0x3ee   : > { %v3728_v39 = vpop.eup %3727  ;;  %v2570_v2 = vmul.f32 %v5943_v1, %v2548_v7  ;;  %vm2575_vm0 = vweird.f32 %v5943_v1 }
 0x3ef   : > { %v5949_v62 = vadd.f32 1.0, %v3728_v39  ;;  %vm5991_vm1 = vmor %vm2574_vm4, %vm2575_vm0 }
 0x3f0   : > { %v2571_v45 = vsub.f32 1.0, %v2570_v2 }
 0x3f1   : > { %vm2589_vm10 = vweird.f32 %v5949_v62  ;;  %v2595_v39 = vand.u32 2147483648, %v5949_v62 }
 0x3fb   : > { %3118 = vrot.lane.b32.xlu2 %v5742_v36, %s3803_s26  ;;  %v2541_v36 = vmul.f32 1.442695, %v2530_v40  ;;  %v2638_v40 = vand.u32 2147483647, %v5941_v35 }
 0x3fd   : > { %v2963_v28 = vpop.xlane.xlu1 %2962  ;;  %3729 = vpow2.f32 %v2541_v36  ;;  %v2611_v36 = vor.u32 1.1754944e-38, %v2610_v25 }
 0x3fe   : > { %v2964_v57 = vrot.slane %v2963_v28, 4  ;;  %3731 = vrcp.f32 %v5936_v52 }
 0x3ff   : > { %3733 = vpow2.f32 %v2545_v41 }
 0x400   : > { %v2965_v8 = vadd.f32 %v2964_v57, %v2963_v28  ;;  %3735 = vrcp.f32 %v5939_v58  ;;  %v2572_v28 = vmul.f32 %v5943_v1, %v2571_v45 }
 0x401   : > { %3737 = vrcp.f32 %v5941_v35 }
 0x402   : > { %v2966_v42 = vrot.slane %v2965_v8, 2  ;;  %3739 = vrcp.f32 %v5949_v62  ;;  %v2573_v56 = vadd.f32 %v5943_v1, %v2572_v28 }
 0x403   : > { %v3730_v24 = vpop.eup %3729 }
 0x404   : > { %v2967_v59 = vadd.f32 %v2966_v42, %v2965_v8  ;;  %v5946_v50 = vpop.eup %3731  ;;  %v5951_v15 = vadd.f32 1.0, %v3730_v24  ;;  %v2577_v4 = vsel %vm5991_vm1, %v5943_v1, %v2573_v56  ;;  %v2593_v1 = vand.u32 2147483647, %v5949_v62 }
 0x405   : > { %v3734_v26 = vpop.eup %3733  ;;  %v2555_v48 = vmul.f32 %v5946_v50, %v5936_v52  ;;  %vm2560_vm7 = vweird.f32 %v5946_v50 }
 0x406   : > { %v2968_v46 = vrot.slane %v2967_v59, 1  ;;  %v5953_v63 = vadd.f32 1.0, %v3734_v26  ;;  %v5958_v55 = vpop.eup %3735  ;;  %3741 = vrcp.f32 %v5951_v15  ;;  %vm5999_vm6 = vmor %vm2559_vm5, %vm2560_vm7  ;;  %vm2609_vm7 = vcmp.eq.f32.partialorder %v2608_v10, 8.507059e+37 }
 0x407   : > { %v5961_v43 = vpop.eup %3737  ;;  %v2556_v17 = vsub.f32 1.0, %v2555_v48  ;;  %v2600_v38 = vmul.f32 %v5958_v55, %v5939_v58  ;;  %vm2605_vm2 = vweird.f32 %v5958_v55  ;;  %vm2639_vm5 = vcmp.eq.f32.partialorder %v2638_v40, 8.507059e+37 }
 0x408   : > { %v2969_v5 = vadd.f32 %v2968_v46, %v2967_v59  ;;  %3743 = vrcp.f32 %v5953_v63  ;;  %v2630_v27 = vmul.f32 %v5961_v43, %v5941_v35  ;;  %v5969_v47 = vpop.eup %3739  ;;  %v2578_v59 = vand.u32 2147483647, %v2548_v7  ;;  %vm6019_vm11 = vmor %vm2604_vm15, %vm2605_vm2 }
 0x409   : > { %v2557_v20 = vmul.f32 %v5946_v50, %v2556_v17  ;;  %v2601_v57 = vsub.f32 1.0, %v2600_v38  ;;  %v2585_v46 = vmul.f32 %v5969_v47, %v5949_v62  ;;  %vm2635_vm8 = vweird.f32 %v5961_v43 }
 0x40a   : > { %3347 = vpush %v2969_v5  ;;  %v2631_v8 = vsub.f32 1.0, %v2630_v27  ;;  %v2565_v5 = vand.u32 2147483648, %v5936_v52  ;;  %vm5995_vm3 = vcmp.eq.f32.partialorder %v2578_v59, 8.507059e+37  ;;  %vm6031_vm12 = vmor %vm2634_vm14, %vm2635_vm8  ;;  %vm2590_vm0 = vweird.f32 %v5969_v47 }
 0x40b   : > { %v2625_v24 = vand.u32 2147483648, %v5951_v15  ;;  %vm6051_vm1 = vmor %vm2589_vm10, %vm2590_vm0  ;;  %v2623_v48 = vand.u32 2147483647, %v5951_v15  ;;  %v2655_v62 = vand.u32 2147483648, %v5953_v63  ;;  %vm2649_vm8 = vweird.f32 %v5953_v63 }
 0x40c   : > { %v5971_v53 = vpop.eup %3741  ;;  %v2653_v38 = vand.u32 2147483647, %v5953_v63 }
 0x40d   : > { %vm2620_vm4 = vweird.f32 %v5971_v53 }
 0x40e   : > { %v5975_v42 = vpop.eup %3743  ;;  %vm2654_vm14 = vcmp.eq.f32.partialorder %v2653_v38, 8.507059e+37 }
 0x415   : > { %v3121_v11 = vpop.permute.xlu1 %3120 }
 0x416   : > { %v2632_v11 = vmul.f32 %v5961_v43, %v2631_v8 }
 0x43b   : > { %s6047_s27 = spop %3347 }
 0x456   : > { %v3021_v18 = vpop.xlane.xlu2 %3020 }
 0x457   : > { %v3022_v54 = vrot.slane %v3021_v18, 4 }
 0x459   : > { %v3023_v51 = vadd.f32 %v3022_v54, %v3021_v18  ;;  %v2580_v18 = vand.u32 2147483648, %v2548_v7  ;;  %v2615_v54 = vmul.f32 %v5971_v53, %v5951_v15 }
 0x45b   : > { %v3024_v12 = vrot.slane %v3023_v51, 2 }
 0x45d   : > { %v3025_v14 = vadd.f32 %v3024_v12, %v3023_v51  ;;  %v2558_v51 = vadd.f32 %v5946_v50, %v2557_v20  ;;  %v2602_v12 = vmul.f32 %v5958_v55, %v2601_v57  ;;  %v2596_v20 = vor.u32 1.1754944e-38, %v2595_v39 }
 0x45e   : > { %v3119_v30 = vpop.permute.xlu2 %3118  ;;  %v3080_v60 = vpop.xlane.xlu0 %3079 }
 0x45f   : > { %v3081_v37 = vrot.slane %v3080_v60, 4  ;;  %v3026_v31 = vrot.slane %v3025_v14, 1  ;;  %v2562_v34 = vsel %vm5999_vm6, %v5946_v50, %v2558_v51  ;;  %vm2650_vm6 = vweird.f32 %v5975_v42  ;;  %v3748_v30 = vld [vmem:[%s6107_s5 + $0x18] sm:$0xf] }
 0x460   : > { %vm2651_vm15 = vmor %vm2649_vm8, %vm2650_vm6  ;;  %vm3129_vm0 = vcmp.gt.f32.partialorder %v3748_v30, 0.5 }
 0x461   : > { %v3082_v21 = vadd.f32 %v3081_v37, %v3080_v60  ;;  %v3027_v13 = vadd.f32 %v3026_v31, %v3025_v14  ;;  %v2645_v14 = vmul.f32 %v5975_v42, %v5953_v63  ;;  %v2586_v60 = vsub.f32 1.0, %v2585_v46 }
 0x462   : > { %v2563_v37 = vand.u32 2147483647, %v5936_v52  ;;  %v2566_v31 = vor.u32 1.1754944e-38, %v2565_v5  ;;  %v2656_v5 = vor.u32 1.1754944e-38, %v2655_v62 }
 0x463   : > { %v3083_v0 = vrot.slane %v3082_v21, 2  ;;  %3349 = vpush %v3027_v13  ;;  %v2616_v13 = vsub.f32 1.0, %v2615_v54  ;;  %v2646_v61 = vsub.f32 1.0, %v2645_v14  ;;  %v3747_v14 = vld [vmem:[%s6107_s5 + $0x10] sm:$0xff] }
 0x464   : > { %vm2564_vm9 = vcmp.eq.f32.partialorder %v2563_v37, 8.507059e+37 }
 0x465   : > { %v3084_v19 = vadd.f32 %v3083_v0, %v3082_v21  ;;  %v2581_v21 = vor.u32 1.1754944e-38, %v2580_v18  ;;  %v2603_v0 = vadd.f32 %v5958_v55, %v2602_v12  ;;  %v2567_v33 = vsel %vm2564_vm9, %v2566_v31, %v2562_v34 }
 0x466   : > { %v2647_v41 = vmul.f32 %v5975_v42, %v2646_v61  ;;  %vm2594_vm9 = vcmp.eq.f32.partialorder %v2593_v1, 8.507059e+37  ;;  %v2971_v18 = vstv %s6047_s27 }
 0x467   : > { %v3085_v32 = vrot.slane %v3084_v19, 1  ;;  %v2582_v49 = vsel %vm5995_vm3, %v2581_v21, %v2577_v4  ;;  %v2607_v7 = vsel %vm6019_vm11, %v5958_v55, %v2603_v0  ;;  %vm2619_vm3 = vweird.f32 %v5951_v15 }
 0x468   : > { %v2612_v58 = vsel %vm2609_vm7, %v2611_v36, %v2607_v7  ;;  %v2648_v2 = vadd.f32 %v5975_v42, %v2647_v41  ;;  %vm6062_vm2 = vmor %vm2619_vm3, %vm2620_vm4  ;;  %v3137_v17 = vrot.slane %v2582_v49, 4  ;;  %vm2624_vm11 = vcmp.eq.f32.partialorder %v2623_v48, 8.507059e+37 }
 0x469   : > { %v3086_v22 = vadd.f32 %v3085_v32, %v3084_v19  ;;  %v2633_v19 = vadd.f32 %v5961_v43, %v2632_v11  ;;  %v2587_v32 = vmul.f32 %v5969_v47, %v2586_v60  ;;  %v3138_v45 = vrot.slane %v2612_v58, 4  ;;  %v3745_v11 = vld [vmem:[%s6107_s5] sm:$0xff] }
 0x46a   : > { %v3140_v28 = vsel %vm982_vm13, %v2567_v33, %v3137_v17  ;;  %v2652_v8 = vsel %vm2651_vm15, %v5975_v42, %v2648_v2  ;;  %v3746_v42 = vld [vmem:[%s6107_s5 + $0x8] sm:$0xff]  ;;  %v3166_v4 = vlaneseq }
 0x46b   : > { %3351 = vpush %v3086_v22  ;;  %v2617_v22 = vmul.f32 %v5971_v53, %v2616_v13  ;;  %v2637_v52 = vsel %vm6031_vm12, %v5961_v43, %v2633_v19  ;;  %v2588_v29 = vadd.f32 %v5969_v47, %v2587_v32  ;;  %v2657_v51 = vsel %vm2654_vm14, %v2656_v5, %v2652_v8 }
 0x46c   : > { %v2642_v50 = vsel %vm2639_vm5, %v2641_v3, %v2637_v52  ;;  %v3143_v56 = vrot.slane %v3140_v28, 5  ;;  %vm3126_vm12 = vcmp.gt.f32.partialorder %v3745_v11, 0.5  ;;  %vm3127_vm10 = vcmp.gt.f32.partialorder %v3746_v42, 0.5 }
 0x46d   : > { %v2618_v35 = vadd.f32 %v5971_v53, %v2617_v22  ;;  %v2592_v55 = vsel %vm6051_vm1, %v5969_v47, %v2588_v29  ;;  %v3139_v27 = vrot.slane %v2642_v50, 4  ;;  %v2626_v47 = vor.u32 1.1754944e-38, %v2625_v24 }
 0x46e   : > { %v2597_v59 = vsel %vm2594_vm9, %v2596_v20, %v2592_v55  ;;  %v3146_v37 = vrot.slane %v2657_v51, 5  ;;  %vm3168_vm7 = vcmp.lt.s32.totalorder %v3166_v4, 896 }
 0x46f   : > { %v2622_v15 = vsel %vm6062_vm2, %v5971_v53, %v2618_v35  ;;  %v3141_v53 = vsel %vm982_vm13, %v2597_v59, %v3138_v45 }
 0x470   : > { %v2627_v46 = vsel %vm2624_vm11, %v2626_v47, %v2622_v15  ;;  %v3144_v60 = vrot.slane %v3141_v53, 5 }
 0x471   : > { %v3142_v63 = vsel %vm982_vm13, %v2627_v46, %v3139_v27  ;;  %vm3128_vm13 = vcmp.gt.f32.partialorder %v3747_v14, 0.5 }
 0x472   : > { %v3145_v44 = vrot.slane %v3142_v63, 5 }
 0x494   : > { %s3350_s28 = spop %3349 }
 0x495   : > { %v3029_v57 = vstv %s3350_s28 }
 0x496   : > { %v3030_v54 = vadd.f32 %v3029_v57, %v2971_v18 }
 0x49c   : > { %s3352_s7 = spop %3351 }
 0x49d   : > { %v3088_v12 = vstv %s3352_s7 }
 0x49e   : > { %v3089_v23 = vadd.f32 %v3088_v12, %v3030_v54 }
 0x4a0   : > { %v3151_v31 = vsel %vm3126_vm12, %v3089_v23, %v3143_v56  ;;  %v3152_v21 = vsel %vm3127_vm10, %v3089_v23, %v3144_v60  ;;  %v3153_v13 = vsel %vm3128_vm13, %v3089_v23, %v3145_v44  ;;  %v3154_v34 = vsel %vm3129_vm0, %v3089_v23, %v3146_v37 }
 0x4a1   : > { %3159 = vst [vmem:[#allocation1] sm:$0xff] %v3151_v31 }
 0x4a2   : > { %3160 = vst [vmem:[#allocation1 + $0x8] sm:$0xff] %v3152_v21 }
 0x4a3   : > { %3161 = vst [vmem:[#allocation1 + $0x10] sm:$0xff] %v3153_v13 }
 0x4a4   : > { %3162 = vst [vmem:[#allocation1 + $0x18] sm:$0xff] %v3154_v34 }
 0x4ab   : > { %v3164_v0 = vld [vmem:[#allocation1 + $0x3] ss:$4 sm:$0xff] }
 0x4ac   : > { %3170 = vst.msk [vmem:[%s287_s17] sm:$0x7f] %vm3168_vm7, %v3164_v0 }
 0x4ad PF: > { %s18_s25 = sadd.s32 1, %s3771_s25   ;;  %s6429_s23 = smov %s3767_s24 }
 0x4ae   : > { %p15_p5 = scmp.ge.s32.totalorder %s18_s25, 4   ;;  %s6430_s24 = smov %s6432_s4 }
 0x4b0   :  { %17 = sbr.rel (!%p15_p5) target bundleno = 3 (0x3), region = 79 }

</bundles_post_ra>
